<compile_context>
chip_gen: v6e
topology: v6e:2x2x1
jax: 0.10.0
libtpu: 0.0.40
codegen_flags: <defaults>
</compile_context>

<pallas_src>
import functools

import jax
import jax.numpy as jnp
from jax.experimental import pallas as pl
from jax.experimental.pallas import tpu as pltpu

EPS = 1e-5


def _preprocess_kernel(x_ref, w0_ref, b0_ref, ws_ref, bs_ref, g_ref, be_ref,
                       fold_ref, o_ref, sum_ref, sq_ref, *, tile_rows, m_total):
    i = pl.program_id(0)
    n_steps = pl.num_programs(0)

    @pl.when(i == 0)
    def _init():
        sum_ref[...] = jnp.zeros_like(sum_ref)
        sq_ref[...] = jnp.zeros_like(sq_ref)

    # ---- layer 0 on this streamed tile: packed patch-matmul + bias + ReLU ----
    y = jnp.dot(x_ref[...], w0_ref[...], preferred_element_type=jnp.float32)
    y = jnp.maximum(y + b0_ref[...].astype(jnp.float32), 0.0)
    y_bf = y.astype(jnp.bfloat16)
    y_f = y_bf.astype(jnp.float32)

    # One-pass BN statistics (sum / sum of squares), carried across grid steps.
    sum_ref[...] += jnp.sum(y_f, axis=0, keepdims=True)
    sq_ref[...] += jnp.sum(y_f * y_f, axis=0, keepdims=True)

    # Stash this tile of relu(conv0(x)) in the VMEM-resident output block.
    row0 = i * tile_rows
    if tile_rows % 8 == 0:
        row0 = pl.multiple_of(row0, tile_rows)
    o_ref[pl.ds(row0, tile_rows), :] = y_bf

    # ---- last step: finalize BN stats, run all 1x1 layers on resident data ----
    @pl.when(i == n_steps - 1)
    def _finalize():
        pc = o_ref.shape[-1]
        inv_m = 1.0 / float(m_total)
        fold = fold_ref[...]  # (PC, PC): sums lanes holding the same channel
        eye = (jax.lax.broadcasted_iota(jnp.int32, (pc, pc), 0) ==
               jax.lax.broadcasted_iota(jnp.int32, (pc, pc), 1)).astype(jnp.float32)

        def bn_affine(s_sum, s_sq, layer):
            # Per-channel batch stats, broadcast back to packed lanes via `fold`.
            mean = jnp.dot(s_sum, fold, preferred_element_type=jnp.float32) * inv_m
            ex2 = jnp.dot(s_sq, fold, preferred_element_type=jnp.float32) * inv_m
            var = jnp.maximum(ex2 - mean * mean, 0.0)
            scale = g_ref[layer].astype(jnp.float32) * jax.lax.rsqrt(var + EPS)
            shift = be_ref[layer].astype(jnp.float32) - mean * scale
            return scale, shift  # each (1, PC)

        scale, shift = bn_affine(sum_ref[...], sq_ref[...], 0)
        act = o_ref[...]  # (Mp, PC) bf16 resident relu(conv0) activation

        for l in range(4):
            w = ws_ref[l].astype(jnp.float32)  # (PC, PC) block-diagonal
            # Fold the previous BatchNorm (y*scale + shift) into this conv:
            #   W' = diag(scale) @ W ,  b' = shift @ W + b      (tiny matmuls)
            w_eff = jnp.dot(eye * scale, w,
                            preferred_element_type=jnp.float32).astype(jnp.bfloat16)
            b_eff = (jnp.dot(shift, w, preferred_element_type=jnp.float32)
                     + bs_ref[l].astype(jnp.float32))
            z = jnp.dot(act, w_eff, preferred_element_type=jnp.float32) + b_eff
            if l < 3:
                z = jnp.maximum(z, 0.0)
                act = z.astype(jnp.bfloat16)
                z_f = act.astype(jnp.float32)
                scale, shift = bn_affine(jnp.sum(z_f, axis=0, keepdims=True),
                                         jnp.sum(z_f * z_f, axis=0, keepdims=True),
                                         l + 1)
            else:
                # Final BatchNorm has no following conv: apply it at the store.
                scale, shift = bn_affine(jnp.sum(z, axis=0, keepdims=True),
                                         jnp.sum(z * z, axis=0, keepdims=True), 4)
                o_ref[...] = (z * scale + shift).astype(jnp.bfloat16)


def _pick_tile_rows(mp, max_rows):
    """Largest divisor of mp that is <= max_rows and a multiple of 16 (bf16 tile)."""
    if mp <= max_rows:
        return mp
    for t in range(min(max_rows, mp), 15, -1):
        if mp % t == 0 and t % 16 == 0:
            return t
    # TODO(synk): remainder masking for M values with no aligned tile divisor;
    # fall back to a single full-residency tile.
    return mp


def image_preprocess_layer_group(x_nchw, params, *, max_tile_rows=1024):
    """Runs the whole layer group as one Pallas call. x_nchw: [N, Cin, H, W] bf16."""
    N, Cin, H, W = x_nchw.shape
    Cout = params["w0"].shape[0]
    Hs, Ws = H // 2, W // 2
    M, K0 = N * Hs * Ws, Cin * 4

    # Lane-packing factor: P logical rows per physical row -> 128-lane last dim.
    P = 128 // Cout if (Cout < 128 and 128 % Cout == 0 and M % (128 // Cout) == 0) else 1
    Mp, PK, PC = M // P, P * K0, P * Cout

    # Patchify NCHW -> [M, Cin*2*2] (patch order (c, kh, kw) matches the
    # flattened Conv2d weight), then lane-pack to [Mp, P*K0] (free reshape).
    # TODO(synk): fold this patchify transpose and the final NCHW transpose into
    # the kernel via an (N, Hs)-slab index_map to save two HBM round trips.
    xp = x_nchw.reshape(N, Cin, Hs, 2, Ws, 2).transpose(0, 2, 4, 1, 3, 5)
    xp = xp.reshape(Mp, PK)

    # Packed (block-diagonal) conv weights and lane-tiled per-channel vectors.
    eye_p = jnp.eye(P, dtype=jnp.float32)
    w0 = params["w0"].reshape(Cout, K0).T.astype(jnp.float32)               # [K0, Cout]
    w0p = jnp.kron(eye_p, w0).astype(jnp.bfloat16)                          # [PK, PC]
    ws = params["ws"].reshape(4, Cout, Cout).transpose(0, 2, 1).astype(jnp.float32)
    wsp = jnp.stack([jnp.kron(eye_p, ws[l]) for l in range(4)]).astype(jnp.bfloat16)
    b0p = jnp.tile(params["b0"].reshape(1, Cout), (1, P))                   # [1, PC]
    bsp = jnp.tile(params["bs"].reshape(4, 1, Cout), (1, 1, P))             # [4,1,PC]
    gp = jnp.tile(params["gamma"].reshape(5, 1, Cout), (1, 1, P))           # [5,1,PC]
    bep = jnp.tile(params["beta"].reshape(5, 1, Cout), (1, 1, P))           # [5,1,PC]
    # Group-fold matrix: (row_vec @ fold)[n] = sum over lanes with n's channel.
    lane = jnp.arange(PC)
    fold = (lane[:, None] % Cout == lane[None, :] % Cout).astype(jnp.float32)

    tile_rows = _pick_tile_rows(Mp, max_tile_rows)
    n_tiles = Mp // tile_rows

    kernel = functools.partial(_preprocess_kernel, tile_rows=tile_rows, m_total=M)

    # VMEM budget: sized to stay under v7x's 64 MiB (32 MiB default scoped).
    est = (2 * tile_rows * PK * 2 + (PK * PC + 4 * PC * PC) * 2 * 2
           + 2 * Mp * PC * 2 + 3 * Mp * PC * 4 + PC * PC * 4 + 64 * PC * 4)
    vmem_limit = int(min(48 * 2 ** 20, max(32 * 2 ** 20, 2 * est)))

    flops = 2 * M * K0 * Cout + 4 * 2 * M * Cout * Cout
    bytes_accessed = int(xp.size * 2 + Mp * PC * 2 + (w0p.size + wsp.size) * 2)

    out = pl.pallas_call(
        kernel,
        out_shape=jax.ShapeDtypeStruct((Mp, PC), jnp.bfloat16),
        grid=(n_tiles,),
        in_specs=[
            pl.BlockSpec((tile_rows, PK), lambda i: (i, 0)),   # streamed input tiles
            pl.BlockSpec((PK, PC), lambda i: (0, 0)),          # packed 2x2 conv weight
            pl.BlockSpec((1, PC), lambda i: (0, 0)),
            pl.BlockSpec((4, PC, PC), lambda i: (0, 0, 0)),    # packed 1x1 conv weights
            pl.BlockSpec((4, 1, PC), lambda i: (0, 0, 0)),
            pl.BlockSpec((5, 1, PC), lambda i: (0, 0, 0)),
            pl.BlockSpec((5, 1, PC), lambda i: (0, 0, 0)),
            pl.BlockSpec((PC, PC), lambda i: (0, 0)),
        ],
        out_specs=pl.BlockSpec((Mp, PC), lambda i: (0, 0)),    # VMEM-resident output
        scratch_shapes=[pltpu.VMEM((1, PC), jnp.float32),
                        pltpu.VMEM((1, PC), jnp.float32)],
        compiler_params=pltpu.CompilerParams(
            dimension_semantics=("arbitrary",),   # BN stats carried across tiles
            vmem_limit_bytes=vmem_limit),
        cost_estimate=pl.CostEstimate(flops=int(flops), transcendentals=int(6 * Cout),
                                      bytes_accessed=bytes_accessed),
    )(xp, w0p, b0p, wsp, bsp, gp, bep, fold)

    # [Mp, P*Cout] -> [M, Cout] -> [N, Hs, Ws, Cout] -> NCHW
    return out.reshape(N, Hs, Ws, Cout).transpose(0, 3, 1, 2)


def reference(x_nchw, params):
    """Pure-JAX reference mirroring the PyTorch module math (for sanity check)."""
    N, Cin, H, W = x_nchw.shape
    Cout = params["w0"].shape[0]
    Hs, Ws = H // 2, W // 2
    M, K0 = N * Hs * Ws, Cin * 4
    xp = x_nchw.reshape(N, Cin, Hs, 2, Ws, 2).transpose(0, 2, 4, 1, 3, 5).reshape(M, K0)
    w0 = params["w0"].reshape(Cout, K0).T
    b0 = params["b0"].reshape(1, Cout)
    ws = params["ws"].reshape(4, Cout, Cout).transpose(0, 2, 1)
    bs = params["bs"].reshape(4, 1, Cout)
    g = params["gamma"].reshape(5, 1, Cout)
    be = params["beta"].reshape(5, 1, Cout)

    def bn(y, idx):
        m = jnp.mean(y, axis=0, keepdims=True)
        v = jnp.mean((y - m) ** 2, axis=0, keepdims=True)
        return (y - m) * jax.lax.rsqrt(v + EPS) * g[idx].astype(jnp.float32) + be[idx].astype(jnp.float32)

    y = jnp.dot(xp, w0, preferred_element_type=jnp.float32) + b0.astype(jnp.float32)
    y = bn(jnp.maximum(y, 0.0), 0).astype(jnp.bfloat16)
    for i in range(3):
        z = jnp.dot(y, ws[i], preferred_element_type=jnp.float32) + bs[i].astype(jnp.float32)
        y = bn(jnp.maximum(z, 0.0), i + 1).astype(jnp.bfloat16)
    z = jnp.dot(y, ws[3], preferred_element_type=jnp.float32) + bs[3].astype(jnp.float32)
    z = bn(z, 4).astype(jnp.bfloat16)
    return z.reshape(N, Hs, Ws, Cout).transpose(0, 3, 1, 2)


def make_params(key, in_channels, out_channels):
    ks = jax.random.split(key, 6)
    w0 = (jax.random.normal(ks[0], (out_channels, in_channels, 2, 2), jnp.float32) * 0.1).astype(jnp.bfloat16)
    b0 = (jax.random.normal(ks[1], (out_channels,), jnp.float32) * 0.1).astype(jnp.bfloat16)
    ws = (jax.random.normal(ks[2], (4, out_channels, out_channels, 1, 1), jnp.float32) * 0.1).astype(jnp.bfloat16)
    bs = (jax.random.normal(ks[3], (4, out_channels), jnp.float32) * 0.1).astype(jnp.bfloat16)
    gamma = (1.0 + jax.random.normal(ks[4], (5, out_channels), jnp.float32) * 0.1).astype(jnp.bfloat16)
    beta = (jax.random.normal(ks[5], (5, out_channels), jnp.float32) * 0.1).astype(jnp.bfloat16)
    return {"w0": w0, "b0": b0, "ws": ws, "bs": bs, "gamma": gamma, "beta": beta}


if __name__ == "__main__":
    # Small shapes consistent with the module: NCHW input, Cout = Cin // 2.
    N, Cin, H, W = 2, 64, 16, 16
    Cout = Cin // 2

    key = jax.random.PRNGKey(0)
    kx, kp = jax.random.split(key)
    x = jax.random.normal(kx, (N, Cin, H, W), jnp.float32).astype(jnp.bfloat16)
    params = make_params(kp, Cin, Cout)

    # max_tile_rows=16 -> 2 grid steps so the streaming / carried-stat path is exercised.
    out = jax.block_until_ready(image_preprocess_layer_group(x, params, max_tile_rows=16))
    assert out.shape == (N, Cout, H // 2, W // 2) and out.dtype == jnp.bfloat16

    ref = jax.block_until_ready(reference(x, params))
    diff = jnp.max(jnp.abs(out.astype(jnp.float32) - ref.astype(jnp.float32)))
    assert float(diff) < 0.15, f"mismatch vs reference: {float(diff)}"

    print("KERNEL_OK")
</pallas_src>

<mosaic_0001>
module attributes {stable_mosaic.version = 11 : i64} {
  func.func @_preprocess_kernel(%arg0: i32, %arg1: memref<16x1024xbf16, #tpu.memory_space<vmem>>, %arg2: memref<1024x128xbf16, #tpu.memory_space<vmem>>, %arg3: memref<1x128xbf16, #tpu.memory_space<vmem>>, %arg4: memref<4x128x128xbf16, #tpu.memory_space<vmem>>, %arg5: memref<4x1x128xbf16, #tpu.memory_space<vmem>>, %arg6: memref<5x1x128xbf16, #tpu.memory_space<vmem>>, %arg7: memref<5x1x128xbf16, #tpu.memory_space<vmem>>, %arg8: memref<128x128xf32, #tpu.memory_space<vmem>>, %arg9: memref<32x128xbf16, #tpu.memory_space<vmem>>, %arg10: memref<1x128xf32, #tpu.memory_space<vmem>>, %arg11: memref<1x128xf32, #tpu.memory_space<vmem>>) attributes {dimension_semantics = [#tpu.dimension_semantics<arbitrary>], iteration_bounds = array<i64: 2>, scalar_prefetch = 0 : i64, scratch_operands = 2 : i64, tpu.core_type = #tpu.core_type<tc>, window_params = [{transform_indices = @transform_0, window_bounds = array<i64: 16, 1024>}, {pipeline_mode = #tpu.pipeline_mode<synchronous>, transform_indices = @transform_1, window_bounds = array<i64: 1024, 128>}, {pipeline_mode = #tpu.pipeline_mode<synchronous>, transform_indices = @transform_2, window_bounds = array<i64: 1, 128>}, {pipeline_mode = #tpu.pipeline_mode<synchronous>, transform_indices = @transform_3, window_bounds = array<i64: 4, 128, 128>}, {pipeline_mode = #tpu.pipeline_mode<synchronous>, transform_indices = @transform_4, window_bounds = array<i64: 4, 1, 128>}, {pipeline_mode = #tpu.pipeline_mode<synchronous>, transform_indices = @transform_5, window_bounds = array<i64: 5, 1, 128>}, {pipeline_mode = #tpu.pipeline_mode<synchronous>, transform_indices = @transform_6, window_bounds = array<i64: 5, 1, 128>}, {pipeline_mode = #tpu.pipeline_mode<synchronous>, transform_indices = @transform_7, window_bounds = array<i64: 128, 128>}, {pipeline_mode = #tpu.pipeline_mode<synchronous>, transform_indices = @transform_8, window_bounds = array<i64: 32, 128>}]} {
    %c0_i32 = arith.constant 0 : i32
    %0 = arith.cmpi eq, %arg0, %c0_i32 : i32
    %1 = arith.extui %0 : i1 to i32
    %c0_i32_0 = arith.constant 0 : i32
    %2 = arith.cmpi ne, %1, %c0_i32_0 : i32
    scf.if %2 {
      %cst_19 = arith.constant 0.000000e+00 : f32
      %32 = vector.broadcast %cst_19 : f32 to vector<1x128xf32>
      %c0_20 = arith.constant 0 : index
      %c0_21 = arith.constant 0 : index
      %33 = vector.load %arg10[%c0_20, %c0_21] : memref<1x128xf32, #tpu.memory_space<vmem>>, vector<1x128xf32>
      tpu.vector_store %arg10[%c0_20, %c0_21], %32 {strides = array<i32>} : memref<1x128xf32, #tpu.memory_space<vmem>>, vector<1x128xf32>,
      %cst_22 = arith.constant 0.000000e+00 : f32
      %34 = vector.broadcast %cst_22 : f32 to vector<1x128xf32>
      %c0_23 = arith.constant 0 : index
      %c0_24 = arith.constant 0 : index
      %35 = vector.load %arg11[%c0_23, %c0_24] : memref<1x128xf32, #tpu.memory_space<vmem>>, vector<1x128xf32>
      tpu.vector_store %arg11[%c0_23, %c0_24], %34 {strides = array<i32>} : memref<1x128xf32, #tpu.memory_space<vmem>>, vector<1x128xf32>,
    } else {
    }
    %c0 = arith.constant 0 : index
    %c0_1 = arith.constant 0 : index
    %3 = vector.load %arg1[%c0, %c0_1] : memref<16x1024xbf16, #tpu.memory_space<vmem>>, vector<16x1024xbf16>
    %c0_2 = arith.constant 0 : index
    %c0_3 = arith.constant 0 : index
    %4 = vector.load %arg2[%c0_2, %c0_3] : memref<1024x128xbf16, #tpu.memory_space<vmem>>, vector<1024x128xbf16>
    %cst = arith.constant dense<0.000000e+00> : vector<16x128xf32>
    %5 = tpu.matmul %3, %4, %cst {dimension_numbers = #tpu.dot_dimension_numbers<[1], [0], [0], [1], [0, 0, 1, 1], [], []>} : vector<16x1024xbf16>, vector<1024x128xbf16>, vector<16x128xf32> -> vector<16x128xf32>
    %c0_4 = arith.constant 0 : index
    %c0_5 = arith.constant 0 : index
    %6 = vector.load %arg3[%c0_4, %c0_5] : memref<1x128xbf16, #tpu.memory_space<vmem>>, vector<1x128xbf16>
    %7 = arith.extf %6 : vector<1x128xbf16> to vector<1x128xf32>
    %8 = vector.broadcast %7 : vector<1x128xf32> to vector<16x128xf32>
    %9 = arith.addf %5, %8 : vector<16x128xf32>
    %cst_6 = arith.constant 0.000000e+00 : f32
    %10 = vector.broadcast %cst_6 : f32 to vector<16x128xf32>
    %11 = arith.maximumf %9, %10 : vector<16x128xf32>
    %12 = arith.truncf %11 : vector<16x128xf32> to vector<16x128xbf16>
    %13 = arith.extf %12 : vector<16x128xbf16> to vector<16x128xf32>
    %c0_7 = arith.constant 0 : index
    %c0_8 = arith.constant 0 : index
    %14 = vector.load %arg10[%c0_7, %c0_8] : memref<1x128xf32, #tpu.memory_space<vmem>>, vector<1x128xf32>
    %cst_9 = arith.constant dense<0.000000e+00> : vector<128xf32>
    %15 = vector.multi_reduction <add>, %13, %cst_9 [0] : vector<16x128xf32> to vector<128xf32>
    %16 = vector.shape_cast %15 : vector<128xf32> to vector<1x128xf32>
    %17 = arith.addf %14, %16 : vector<1x128xf32>
    %c0_10 = arith.constant 0 : index
    %c0_11 = arith.constant 0 : index
    %18 = vector.load %arg10[%c0_10, %c0_11] : memref<1x128xf32, #tpu.memory_space<vmem>>, vector<1x128xf32>
    tpu.vector_store %arg10[%c0_10, %c0_11], %17 {strides = array<i32>} : memref<1x128xf32, #tpu.memory_space<vmem>>, vector<1x128xf32>,
    %c0_12 = arith.constant 0 : index
    %c0_13 = arith.constant 0 : index
    %19 = vector.load %arg11[%c0_12, %c0_13] : memref<1x128xf32, #tpu.memory_space<vmem>>, vector<1x128xf32>
    %20 = arith.mulf %13, %13 : vector<16x128xf32>
    %cst_14 = arith.constant dense<0.000000e+00> : vector<128xf32>
    %21 = vector.multi_reduction <add>, %20, %cst_14 [0] : vector<16x128xf32> to vector<128xf32>
    %22 = vector.shape_cast %21 : vector<128xf32> to vector<1x128xf32>
    %23 = arith.addf %19, %22 : vector<1x128xf32>
    %c0_15 = arith.constant 0 : index
    %c0_16 = arith.constant 0 : index
    %24 = vector.load %arg11[%c0_15, %c0_16] : memref<1x128xf32, #tpu.memory_space<vmem>>, vector<1x128xf32>
    tpu.vector_store %arg11[%c0_15, %c0_16], %23 {strides = array<i32>} : memref<1x128xf32, #tpu.memory_space<vmem>>, vector<1x128xf32>,
    %c16_i32 = arith.constant 16 : i32
    %25 = arith.muli %arg0, %c16_i32 : i32
    %26 = tpu.assume_multiple %25, 16 : i32
    %27 = arith.index_cast %26 : i32 to index
    %c0_17 = arith.constant 0 : index
    %28 = vector.load %arg9[%27, %c0_17] : memref<32x128xbf16, #tpu.memory_space<vmem>>, vector<16x128xbf16>
    tpu.vector_store %arg9[%27, %c0_17], %12 {strides = array<i32>} : memref<32x128xbf16, #tpu.memory_space<vmem>>, vector<16x128xbf16>,
    %c1_i32 = arith.constant 1 : i32
    %29 = arith.cmpi eq, %arg0, %c1_i32 : i32
    %30 = arith.extui %29 : i1 to i32
    %c0_i32_18 = arith.constant 0 : i32
    %31 = arith.cmpi ne, %30, %c0_i32_18 : i32
    scf.if %31 {
      %c0_19 = arith.constant 0 : index
      %c0_20 = arith.constant 0 : index
      %32 = vector.load %arg8[%c0_19, %c0_20] : memref<128x128xf32, #tpu.memory_space<vmem>>, vector<128x128xf32>
      %33 = tpu.iota {dimensions = array<i32: 0>} : vector<128x128xi32>
      %34 = tpu.iota {dimensions = array<i32: 1>} : vector<128x128xi32>
      %35 = arith.cmpi eq, %33, %34 : vector<128x128xi32>
      %36 = arith.extui %35 : vector<128x128xi1> to vector<128x128xi32>
      %37 = arith.sitofp %36 : vector<128x128xi32> to vector<128x128xf32>
      %c0_21 = arith.constant 0 : index
      %c0_22 = arith.constant 0 : index
      %38 = vector.load %arg10[%c0_21, %c0_22] : memref<1x128xf32, #tpu.memory_space<vmem>>, vector<1x128xf32>
      %c0_23 = arith.constant 0 : index
      %c0_24 = arith.constant 0 : index
      %39 = vector.load %arg11[%c0_23, %c0_24] : memref<1x128xf32, #tpu.memory_space<vmem>>, vector<1x128xf32>
      %cst_25 = arith.constant dense<0.000000e+00> : vector<1x128xf32>
      %40 = tpu.matmul %38, %32, %cst_25 {dimension_numbers = #tpu.dot_dimension_numbers<[1], [0], [0], [1], [0, 0, 1, 1], [], []>} : vector<1x128xf32>, vector<128x128xf32>, vector<1x128xf32> -> vector<1x128xf32>
      %cst_26 = arith.constant 7.812500e-03 : f32
      %41 = vector.broadcast %cst_26 : f32 to vector<1x128xf32>
      %42 = arith.mulf %40, %41 : vector<1x128xf32>
      %cst_27 = arith.constant dense<0.000000e+00> : vector<1x128xf32>
      %43 = tpu.matmul %39, %32, %cst_27 {dimension_numbers = #tpu.dot_dimension_numbers<[1], [0], [0], [1], [0, 0, 1, 1], [], []>} : vector<1x128xf32>, vector<128x128xf32>, vector<1x128xf32> -> vector<1x128xf32>
      %cst_28 = arith.constant 7.812500e-03 : f32
      %44 = vector.broadcast %cst_28 : f32 to vector<1x128xf32>
      %45 = arith.mulf %43, %44 : vector<1x128xf32>
      %46 = arith.mulf %42, %42 : vector<1x128xf32>
      %47 = arith.subf %45, %46 : vector<1x128xf32>
      %cst_29 = arith.constant 0.000000e+00 : f32
      %48 = vector.broadcast %cst_29 : f32 to vector<1x128xf32>
      %49 = arith.maximumf %47, %48 : vector<1x128xf32>
      %c0_30 = arith.constant 0 : index
      %c0_31 = arith.constant 0 : index
      %c0_32 = arith.constant 0 : index
      %50 = vector.load %arg6[%c0_30, %c0_31, %c0_32] : memref<5x1x128xbf16, #tpu.memory_space<vmem>>, vector<1x1x128xbf16>
      %51 = vector.shape_cast %50 : vector<1x1x128xbf16> to vector<1x128xbf16>
      %52 = arith.extf %51 : vector<1x128xbf16> to vector<1x128xf32>
      %cst_33 = arith.constant 9.99999974E-6 : f32
      %53 = vector.broadcast %cst_33 : f32 to vector<1x128xf32>
      %54 = arith.addf %49, %53 : vector<1x128xf32>
      %55 = math.rsqrt %54 : vector<1x128xf32>
      %56 = arith.mulf %52, %55 : vector<1x128xf32>
      %c0_34 = arith.constant 0 : index
      %c0_35 = arith.constant 0 : index
      %c0_36 = arith.constant 0 : index
      %57 = vector.load %arg7[%c0_34, %c0_35, %c0_36] : memref<5x1x128xbf16, #tpu.memory_space<vmem>>, vector<1x1x128xbf16>
      %58 = vector.shape_cast %57 : vector<1x1x128xbf16> to vector<1x128xbf16>
      %59 = arith.extf %58 : vector<1x128xbf16> to vector<1x128xf32>
      %60 = arith.mulf %42, %56 : vector<1x128xf32>
      %61 = arith.subf %59, %60 : vector<1x128xf32>
      %c0_37 = arith.constant 0 : index
      %c0_38 = arith.constant 0 : index
      %62 = vector.load %arg9[%c0_37, %c0_38] : memref<32x128xbf16, #tpu.memory_space<vmem>>, vector<32x128xbf16>
      %c0_39 = arith.constant 0 : index
      %c0_40 = arith.constant 0 : index
      %c0_41 = arith.constant 0 : index
      %63 = vector.load %arg4[%c0_39, %c0_40, %c0_41] : memref<4x128x128xbf16, #tpu.memory_space<vmem>>, vector<1x128x128xbf16>
      %64 = vector.shape_cast %63 : vector<1x128x128xbf16> to vector<128x128xbf16>
      %65 = arith.extf %64 : vector<128x128xbf16> to vector<128x128xf32>
      %66 = vector.broadcast %56 : vector<1x128xf32> to vector<128x128xf32>
      %67 = arith.mulf %37, %66 : vector<128x128xf32>
      %cst_42 = arith.constant dense<0.000000e+00> : vector<128x128xf32>
      %68 = tpu.matmul %67, %65, %cst_42 {dimension_numbers = #tpu.dot_dimension_numbers<[1], [0], [0], [1], [0, 0, 1, 1], [], []>} : vector<128x128xf32>, vector<128x128xf32>, vector<128x128xf32> -> vector<128x128xf32>
      %69 = arith.truncf %68 : vector<128x128xf32> to vector<128x128xbf16>
      %cst_43 = arith.constant dense<0.000000e+00> : vector<1x128xf32>
      %70 = tpu.matmul %61, %65, %cst_43 {dimension_numbers = #tpu.dot_dimension_numbers<[1], [0], [0], [1], [0, 0, 1, 1], [], []>} : vector<1x128xf32>, vector<128x128xf32>, vector<1x128xf32> -> vector<1x128xf32>
      %c0_44 = arith.constant 0 : index
      %c0_45 = arith.constant 0 : index
      %c0_46 = arith.constant 0 : index
      %71 = vector.load %arg5[%c0_44, %c0_45, %c0_46] : memref<4x1x128xbf16, #tpu.memory_space<vmem>>, vector<1x1x128xbf16>
      %72 = vector.shape_cast %71 : vector<1x1x128xbf16> to vector<1x128xbf16>
      %73 = arith.extf %72 : vector<1x128xbf16> to vector<1x128xf32>
      %74 = arith.addf %70, %73 : vector<1x128xf32>
      %cst_47 = arith.constant dense<0.000000e+00> : vector<32x128xf32>
      %75 = tpu.matmul %62, %69, %cst_47 {dimension_numbers = #tpu.dot_dimension_numbers<[1], [0], [0], [1], [0, 0, 1, 1], [], []>} : vector<32x128xbf16>, vector<128x128xbf16>, vector<32x128xf32> -> vector<32x128xf32>
      %76 = vector.broadcast %74 : vector<1x128xf32> to vector<32x128xf32>
      %77 = arith.addf %75, %76 : vector<32x128xf32>
      %cst_48 = arith.constant 0.000000e+00 : f32
      %78 = vector.broadcast %cst_48 : f32 to vector<32x128xf32>
      %79 = arith.maximumf %77, %78 : vector<32x128xf32>
      %80 = arith.truncf %79 : vector<32x128xf32> to vector<32x128xbf16>
      %81 = arith.extf %80 : vector<32x128xbf16> to vector<32x128xf32>
      %cst_49 = arith.constant dense<0.000000e+00> : vector<128xf32>
      %82 = vector.multi_reduction <add>, %81, %cst_49 [0] : vector<32x128xf32> to vector<128xf32>
      %83 = vector.shape_cast %82 : vector<128xf32> to vector<1x128xf32>
      %84 = arith.mulf %81, %81 : vector<32x128xf32>
      %cst_50 = arith.constant dense<0.000000e+00> : vector<128xf32>
      %85 = vector.multi_reduction <add>, %84, %cst_50 [0] : vector<32x128xf32> to vector<128xf32>
      %86 = vector.shape_cast %85 : vector<128xf32> to vector<1x128xf32>
      %cst_51 = arith.constant dense<0.000000e+00> : vector<1x128xf32>
      %87 = tpu.matmul %83, %32, %cst_51 {dimension_numbers = #tpu.dot_dimension_numbers<[1], [0], [0], [1], [0, 0, 1, 1], [], []>} : vector<1x128xf32>, vector<128x128xf32>, vector<1x128xf32> -> vector<1x128xf32>
      %cst_52 = arith.constant 7.812500e-03 : f32
      %88 = vector.broadcast %cst_52 : f32 to vector<1x128xf32>
      %89 = arith.mulf %87, %88 : vector<1x128xf32>
      %cst_53 = arith.constant dense<0.000000e+00> : vector<1x128xf32>
      %90 = tpu.matmul %86, %32, %cst_53 {dimension_numbers = #tpu.dot_dimension_numbers<[1], [0], [0], [1], [0, 0, 1, 1], [], []>} : vector<1x128xf32>, vector<128x128xf32>, vector<1x128xf32> -> vector<1x128xf32>
      %cst_54 = arith.constant 7.812500e-03 : f32
      %91 = vector.broadcast %cst_54 : f32 to vector<1x128xf32>
      %92 = arith.mulf %90, %91 : vector<1x128xf32>
      %93 = arith.mulf %89, %89 : vector<1x128xf32>
      %94 = arith.subf %92, %93 : vector<1x128xf32>
      %cst_55 = arith.constant 0.000000e+00 : f32
      %95 = vector.broadcast %cst_55 : f32 to vector<1x128xf32>
      %96 = arith.maximumf %94, %95 : vector<1x128xf32>
      %c1 = arith.constant 1 : index
      %c0_56 = arith.constant 0 : index
      %c0_57 = arith.constant 0 : index
      %97 = vector.load %arg6[%c1, %c0_56, %c0_57] : memref<5x1x128xbf16, #tpu.memory_space<vmem>>, vector<1x1x128xbf16>
      %98 = vector.shape_cast %97 : vector<1x1x128xbf16> to vector<1x128xbf16>
      %99 = arith.extf %98 : vector<1x128xbf16> to vector<1x128xf32>
      %cst_58 = arith.constant 9.99999974E-6 : f32
      %100 = vector.broadcast %cst_58 : f32 to vector<1x128xf32>
      %101 = arith.addf %96, %100 : vector<1x128xf32>
      %102 = math.rsqrt %101 : vector<1x128xf32>
      %103 = arith.mulf %99, %102 : vector<1x128xf32>
      %c1_59 = arith.constant 1 : index
      %c0_60 = arith.constant 0 : index
      %c0_61 = arith.constant 0 : index
      %104 = vector.load %arg7[%c1_59, %c0_60, %c0_61] : memref<5x1x128xbf16, #tpu.memory_space<vmem>>, vector<1x1x128xbf16>
      %105 = vector.shape_cast %104 : vector<1x1x128xbf16> to vector<1x128xbf16>
      %106 = arith.extf %105 : vector<1x128xbf16> to vector<1x128xf32>
      %107 = arith.mulf %89, %103 : vector<1x128xf32>
      %108 = arith.subf %106, %107 : vector<1x128xf32>
      %c1_62 = arith.constant 1 : index
      %c0_63 = arith.constant 0 : index
      %c0_64 = arith.constant 0 : index
      %109 = vector.load %arg4[%c1_62, %c0_63, %c0_64] : memref<4x128x128xbf16, #tpu.memory_space<vmem>>, vector<1x128x128xbf16>
      %110 = vector.shape_cast %109 : vector<1x128x128xbf16> to vector<128x128xbf16>
      %111 = arith.extf %110 : vector<128x128xbf16> to vector<128x128xf32>
      %112 = vector.broadcast %103 : vector<1x128xf32> to vector<128x128xf32>
      %113 = arith.mulf %37, %112 : vector<128x128xf32>
      %cst_65 = arith.constant dense<0.000000e+00> : vector<128x128xf32>
      %114 = tpu.matmul %113, %111, %cst_65 {dimension_numbers = #tpu.dot_dimension_numbers<[1], [0], [0], [1], [0, 0, 1, 1], [], []>} : vector<128x128xf32>, vector<128x128xf32>, vector<128x128xf32> -> vector<128x128xf32>
      %115 = arith.truncf %114 : vector<128x128xf32> to vector<128x128xbf16>
      %cst_66 = arith.constant dense<0.000000e+00> : vector<1x128xf32>
      %116 = tpu.matmul %108, %111, %cst_66 {dimension_numbers = #tpu.dot_dimension_numbers<[1], [0], [0], [1], [0, 0, 1, 1], [], []>} : vector<1x128xf32>, vector<128x128xf32>, vector<1x128xf32> -> vector<1x128xf32>
      %c1_67 = arith.constant 1 : index
      %c0_68 = arith.constant 0 : index
      %c0_69 = arith.constant 0 : index
      %117 = vector.load %arg5[%c1_67, %c0_68, %c0_69] : memref<4x1x128xbf16, #tpu.memory_space<vmem>>, vector<1x1x128xbf16>
      %118 = vector.shape_cast %117 : vector<1x1x128xbf16> to vector<1x128xbf16>
      %119 = arith.extf %118 : vector<1x128xbf16> to vector<1x128xf32>
      %120 = arith.addf %116, %119 : vector<1x128xf32>
      %cst_70 = arith.constant dense<0.000000e+00> : vector<32x128xf32>
      %121 = tpu.matmul %80, %115, %cst_70 {dimension_numbers = #tpu.dot_dimension_numbers<[1], [0], [0], [1], [0, 0, 1, 1], [], []>} : vector<32x128xbf16>, vector<128x128xbf16>, vector<32x128xf32> -> vector<32x128xf32>
      %122 = vector.broadcast %120 : vector<1x128xf32> to vector<32x128xf32>
      %123 = arith.addf %121, %122 : vector<32x128xf32>
      %cst_71 = arith.constant 0.000000e+00 : f32
      %124 = vector.broadcast %cst_71 : f32 to vector<32x128xf32>
      %125 = arith.maximumf %123, %124 : vector<32x128xf32>
      %126 = arith.truncf %125 : vector<32x128xf32> to vector<32x128xbf16>
      %127 = arith.extf %126 : vector<32x128xbf16> to vector<32x128xf32>
      %cst_72 = arith.constant dense<0.000000e+00> : vector<128xf32>
      %128 = vector.multi_reduction <add>, %127, %cst_72 [0] : vector<32x128xf32> to vector<128xf32>
      %129 = vector.shape_cast %128 : vector<128xf32> to vector<1x128xf32>
      %130 = arith.mulf %127, %127 : vector<32x128xf32>
      %cst_73 = arith.constant dense<0.000000e+00> : vector<128xf32>
      %131 = vector.multi_reduction <add>, %130, %cst_73 [0] : vector<32x128xf32> to vector<128xf32>
      %132 = vector.shape_cast %131 : vector<128xf32> to vector<1x128xf32>
      %cst_74 = arith.constant dense<0.000000e+00> : vector<1x128xf32>
      %133 = tpu.matmul %129, %32, %cst_74 {dimension_numbers = #tpu.dot_dimension_numbers<[1], [0], [0], [1], [0, 0, 1, 1], [], []>} : vector<1x128xf32>, vector<128x128xf32>, vector<1x128xf32> -> vector<1x128xf32>
      %cst_75 = arith.constant 7.812500e-03 : f32
      %134 = vector.broadcast %cst_75 : f32 to vector<1x128xf32>
      %135 = arith.mulf %133, %134 : vector<1x128xf32>
      %cst_76 = arith.constant dense<0.000000e+00> : vector<1x128xf32>
      %136 = tpu.matmul %132, %32, %cst_76 {dimension_numbers = #tpu.dot_dimension_numbers<[1], [0], [0], [1], [0, 0, 1, 1], [], []>} : vector<1x128xf32>, vector<128x128xf32>, vector<1x128xf32> -> vector<1x128xf32>
      %cst_77 = arith.constant 7.812500e-03 : f32
      %137 = vector.broadcast %cst_77 : f32 to vector<1x128xf32>
      %138 = arith.mulf %136, %137 : vector<1x128xf32>
      %139 = arith.mulf %135, %135 : vector<1x128xf32>
      %140 = arith.subf %138, %139 : vector<1x128xf32>
      %cst_78 = arith.constant 0.000000e+00 : f32
      %141 = vector.broadcast %cst_78 : f32 to vector<1x128xf32>
      %142 = arith.maximumf %140, %141 : vector<1x128xf32>
      %c2 = arith.constant 2 : index
      %c0_79 = arith.constant 0 : index
      %c0_80 = arith.constant 0 : index
      %143 = vector.load %arg6[%c2, %c0_79, %c0_80] : memref<5x1x128xbf16, #tpu.memory_space<vmem>>, vector<1x1x128xbf16>
      %144 = vector.shape_cast %143 : vector<1x1x128xbf16> to vector<1x128xbf16>
      %145 = arith.extf %144 : vector<1x128xbf16> to vector<1x128xf32>
      %cst_81 = arith.constant 9.99999974E-6 : f32
      %146 = vector.broadcast %cst_81 : f32 to vector<1x128xf32>
      %147 = arith.addf %142, %146 : vector<1x128xf32>
      %148 = math.rsqrt %147 : vector<1x128xf32>
      %149 = arith.mulf %145, %148 : vector<1x128xf32>
      %c2_82 = arith.constant 2 : index
      %c0_83 = arith.constant 0 : index
      %c0_84 = arith.constant 0 : index
      %150 = vector.load %arg7[%c2_82, %c0_83, %c0_84] : memref<5x1x128xbf16, #tpu.memory_space<vmem>>, vector<1x1x128xbf16>
      %151 = vector.shape_cast %150 : vector<1x1x128xbf16> to vector<1x128xbf16>
      %152 = arith.extf %151 : vector<1x128xbf16> to vector<1x128xf32>
      %153 = arith.mulf %135, %149 : vector<1x128xf32>
      %154 = arith.subf %152, %153 : vector<1x128xf32>
      %c2_85 = arith.constant 2 : index
      %c0_86 = arith.constant 0 : index
      %c0_87 = arith.constant 0 : index
      %155 = vector.load %arg4[%c2_85, %c0_86, %c0_87] : memref<4x128x128xbf16, #tpu.memory_space<vmem>>, vector<1x128x128xbf16>
      %156 = vector.shape_cast %155 : vector<1x128x128xbf16> to vector<128x128xbf16>
      %157 = arith.extf %156 : vector<128x128xbf16> to vector<128x128xf32>
      %158 = vector.broadcast %149 : vector<1x128xf32> to vector<128x128xf32>
      %159 = arith.mulf %37, %158 : vector<128x128xf32>
      %cst_88 = arith.constant dense<0.000000e+00> : vector<128x128xf32>
      %160 = tpu.matmul %159, %157, %cst_88 {dimension_numbers = #tpu.dot_dimension_numbers<[1], [0], [0], [1], [0, 0, 1, 1], [], []>} : vector<128x128xf32>, vector<128x128xf32>, vector<128x128xf32> -> vector<128x128xf32>
      %161 = arith.truncf %160 : vector<128x128xf32> to vector<128x128xbf16>
      %cst_89 = arith.constant dense<0.000000e+00> : vector<1x128xf32>
      %162 = tpu.matmul %154, %157, %cst_89 {dimension_numbers = #tpu.dot_dimension_numbers<[1], [0], [0], [1], [0, 0, 1, 1], [], []>} : vector<1x128xf32>, vector<128x128xf32>, vector<1x128xf32> -> vector<1x128xf32>
      %c2_90 = arith.constant 2 : index
      %c0_91 = arith.constant 0 : index
      %c0_92 = arith.constant 0 : index
      %163 = vector.load %arg5[%c2_90, %c0_91, %c0_92] : memref<4x1x128xbf16, #tpu.memory_space<vmem>>, vector<1x1x128xbf16>
      %164 = vector.shape_cast %163 : vector<1x1x128xbf16> to vector<1x128xbf16>
      %165 = arith.extf %164 : vector<1x128xbf16> to vector<1x128xf32>
      %166 = arith.addf %162, %165 : vector<1x128xf32>
      %cst_93 = arith.constant dense<0.000000e+00> : vector<32x128xf32>
      %167 = tpu.matmul %126, %161, %cst_93 {dimension_numbers = #tpu.dot_dimension_numbers<[1], [0], [0], [1], [0, 0, 1, 1], [], []>} : vector<32x128xbf16>, vector<128x128xbf16>, vector<32x128xf32> -> vector<32x128xf32>
      %168 = vector.broadcast %166 : vector<1x128xf32> to vector<32x128xf32>
      %169 = arith.addf %167, %168 : vector<32x128xf32>
      %cst_94 = arith.constant 0.000000e+00 : f32
      %170 = vector.broadcast %cst_94 : f32 to vector<32x128xf32>
      %171 = arith.maximumf %169, %170 : vector<32x128xf32>
      %172 = arith.truncf %171 : vector<32x128xf32> to vector<32x128xbf16>
      %173 = arith.extf %172 : vector<32x128xbf16> to vector<32x128xf32>
      %cst_95 = arith.constant dense<0.000000e+00> : vector<128xf32>
      %174 = vector.multi_reduction <add>, %173, %cst_95 [0] : vector<32x128xf32> to vector<128xf32>
      %175 = vector.shape_cast %174 : vector<128xf32> to vector<1x128xf32>
      %176 = arith.mulf %173, %173 : vector<32x128xf32>
      %cst_96 = arith.constant dense<0.000000e+00> : vector<128xf32>
      %177 = vector.multi_reduction <add>, %176, %cst_96 [0] : vector<32x128xf32> to vector<128xf32>
      %178 = vector.shape_cast %177 : vector<128xf32> to vector<1x128xf32>
      %cst_97 = arith.constant dense<0.000000e+00> : vector<1x128xf32>
      %179 = tpu.matmul %175, %32, %cst_97 {dimension_numbers = #tpu.dot_dimension_numbers<[1], [0], [0], [1], [0, 0, 1, 1], [], []>} : vector<1x128xf32>, vector<128x128xf32>, vector<1x128xf32> -> vector<1x128xf32>
      %cst_98 = arith.constant 7.812500e-03 : f32
      %180 = vector.broadcast %cst_98 : f32 to vector<1x128xf32>
      %181 = arith.mulf %179, %180 : vector<1x128xf32>
      %cst_99 = arith.constant dense<0.000000e+00> : vector<1x128xf32>
      %182 = tpu.matmul %178, %32, %cst_99 {dimension_numbers = #tpu.dot_dimension_numbers<[1], [0], [0], [1], [0, 0, 1, 1], [], []>} : vector<1x128xf32>, vector<128x128xf32>, vector<1x128xf32> -> vector<1x128xf32>
      %cst_100 = arith.constant 7.812500e-03 : f32
      %183 = vector.broadcast %cst_100 : f32 to vector<1x128xf32>
      %184 = arith.mulf %182, %183 : vector<1x128xf32>
      %185 = arith.mulf %181, %181 : vector<1x128xf32>
      %186 = arith.subf %184, %185 : vector<1x128xf32>
      %cst_101 = arith.constant 0.000000e+00 : f32
      %187 = vector.broadcast %cst_101 : f32 to vector<1x128xf32>
      %188 = arith.maximumf %186, %187 : vector<1x128xf32>
      %c3 = arith.constant 3 : index
      %c0_102 = arith.constant 0 : index
      %c0_103 = arith.constant 0 : index
      %189 = vector.load %arg6[%c3, %c0_102, %c0_103] : memref<5x1x128xbf16, #tpu.memory_space<vmem>>, vector<1x1x128xbf16>
      %190 = vector.shape_cast %189 : vector<1x1x128xbf16> to vector<1x128xbf16>
      %191 = arith.extf %190 : vector<1x128xbf16> to vector<1x128xf32>
      %cst_104 = arith.constant 9.99999974E-6 : f32
      %192 = vector.broadcast %cst_104 : f32 to vector<1x128xf32>
      %193 = arith.addf %188, %192 : vector<1x128xf32>
      %194 = math.rsqrt %193 : vector<1x128xf32>
      %195 = arith.mulf %191, %194 : vector<1x128xf32>
      %c3_105 = arith.constant 3 : index
      %c0_106 = arith.constant 0 : index
      %c0_107 = arith.constant 0 : index
      %196 = vector.load %arg7[%c3_105, %c0_106, %c0_107] : memref<5x1x128xbf16, #tpu.memory_space<vmem>>, vector<1x1x128xbf16>
      %197 = vector.shape_cast %196 : vector<1x1x128xbf16> to vector<1x128xbf16>
      %198 = arith.extf %197 : vector<1x128xbf16> to vector<1x128xf32>
      %199 = arith.mulf %181, %195 : vector<1x128xf32>
      %200 = arith.subf %198, %199 : vector<1x128xf32>
      %c3_108 = arith.constant 3 : index
      %c0_109 = arith.constant 0 : index
      %c0_110 = arith.constant 0 : index
      %201 = vector.load %arg4[%c3_108, %c0_109, %c0_110] : memref<4x128x128xbf16, #tpu.memory_space<vmem>>, vector<1x128x128xbf16>
      %202 = vector.shape_cast %201 : vector<1x128x128xbf16> to vector<128x128xbf16>
      %203 = arith.extf %202 : vector<128x128xbf16> to vector<128x128xf32>
      %204 = vector.broadcast %195 : vector<1x128xf32> to vector<128x128xf32>
      %205 = arith.mulf %37, %204 : vector<128x128xf32>
      %cst_111 = arith.constant dense<0.000000e+00> : vector<128x128xf32>
      %206 = tpu.matmul %205, %203, %cst_111 {dimension_numbers = #tpu.dot_dimension_numbers<[1], [0], [0], [1], [0, 0, 1, 1], [], []>} : vector<128x128xf32>, vector<128x128xf32>, vector<128x128xf32> -> vector<128x128xf32>
      %207 = arith.truncf %206 : vector<128x128xf32> to vector<128x128xbf16>
      %cst_112 = arith.constant dense<0.000000e+00> : vector<1x128xf32>
      %208 = tpu.matmul %200, %203, %cst_112 {dimension_numbers = #tpu.dot_dimension_numbers<[1], [0], [0], [1], [0, 0, 1, 1], [], []>} : vector<1x128xf32>, vector<128x128xf32>, vector<1x128xf32> -> vector<1x128xf32>
      %c3_113 = arith.constant 3 : index
      %c0_114 = arith.constant 0 : index
      %c0_115 = arith.constant 0 : index
      %209 = vector.load %arg5[%c3_113, %c0_114, %c0_115] : memref<4x1x128xbf16, #tpu.memory_space<vmem>>, vector<1x1x128xbf16>
      %210 = vector.shape_cast %209 : vector<1x1x128xbf16> to vector<1x128xbf16>
      %211 = arith.extf %210 : vector<1x128xbf16> to vector<1x128xf32>
      %212 = arith.addf %208, %211 : vector<1x128xf32>
      %cst_116 = arith.constant dense<0.000000e+00> : vector<32x128xf32>
      %213 = tpu.matmul %172, %207, %cst_116 {dimension_numbers = #tpu.dot_dimension_numbers<[1], [0], [0], [1], [0, 0, 1, 1], [], []>} : vector<32x128xbf16>, vector<128x128xbf16>, vector<32x128xf32> -> vector<32x128xf32>
      %214 = vector.broadcast %212 : vector<1x128xf32> to vector<32x128xf32>
      %215 = arith.addf %213, %214 : vector<32x128xf32>
      %cst_117 = arith.constant dense<0.000000e+00> : vector<128xf32>
      %216 = vector.multi_reduction <add>, %215, %cst_117 [0] : vector<32x128xf32> to vector<128xf32>
      %217 = vector.shape_cast %216 : vector<128xf32> to vector<1x128xf32>
      %218 = arith.mulf %215, %215 : vector<32x128xf32>
      %cst_118 = arith.constant dense<0.000000e+00> : vector<128xf32>
      %219 = vector.multi_reduction <add>, %218, %cst_118 [0] : vector<32x128xf32> to vector<128xf32>
      %220 = vector.shape_cast %219 : vector<128xf32> to vector<1x128xf32>
      %cst_119 = arith.constant dense<0.000000e+00> : vector<1x128xf32>
      %221 = tpu.matmul %217, %32, %cst_119 {dimension_numbers = #tpu.dot_dimension_numbers<[1], [0], [0], [1], [0, 0, 1, 1], [], []>} : vector<1x128xf32>, vector<128x128xf32>, vector<1x128xf32> -> vector<1x128xf32>
      %cst_120 = arith.constant 7.812500e-03 : f32
      %222 = vector.broadcast %cst_120 : f32 to vector<1x128xf32>
      %223 = arith.mulf %221, %222 : vector<1x128xf32>
      %cst_121 = arith.constant dense<0.000000e+00> : vector<1x128xf32>
      %224 = tpu.matmul %220, %32, %cst_121 {dimension_numbers = #tpu.dot_dimension_numbers<[1], [0], [0], [1], [0, 0, 1, 1], [], []>} : vector<1x128xf32>, vector<128x128xf32>, vector<1x128xf32> -> vector<1x128xf32>
      %cst_122 = arith.constant 7.812500e-03 : f32
      %225 = vector.broadcast %cst_122 : f32 to vector<1x128xf32>
      %226 = arith.mulf %224, %225 : vector<1x128xf32>
      %227 = arith.mulf %223, %223 : vector<1x128xf32>
      %228 = arith.subf %226, %227 : vector<1x128xf32>
      %cst_123 = arith.constant 0.000000e+00 : f32
      %229 = vector.broadcast %cst_123 : f32 to vector<1x128xf32>
      %230 = arith.maximumf %228, %229 : vector<1x128xf32>
      %c4 = arith.constant 4 : index
      %c0_124 = arith.constant 0 : index
      %c0_125 = arith.constant 0 : index
      %231 = vector.load %arg6[%c4, %c0_124, %c0_125] : memref<5x1x128xbf16, #tpu.memory_space<vmem>>, vector<1x1x128xbf16>
      %232 = vector.shape_cast %231 : vector<1x1x128xbf16> to vector<1x128xbf16>
      %233 = arith.extf %232 : vector<1x128xbf16> to vector<1x128xf32>
      %cst_126 = arith.constant 9.99999974E-6 : f32
      %234 = vector.broadcast %cst_126 : f32 to vector<1x128xf32>
      %235 = arith.addf %230, %234 : vector<1x128xf32>
      %236 = math.rsqrt %235 : vector<1x128xf32>
      %237 = arith.mulf %233, %236 : vector<1x128xf32>
      %c4_127 = arith.constant 4 : index
      %c0_128 = arith.constant 0 : index
      %c0_129 = arith.constant 0 : index
      %238 = vector.load %arg7[%c4_127, %c0_128, %c0_129] : memref<5x1x128xbf16, #tpu.memory_space<vmem>>, vector<1x1x128xbf16>
      %239 = vector.shape_cast %238 : vector<1x1x128xbf16> to vector<1x128xbf16>
      %240 = arith.extf %239 : vector<1x128xbf16> to vector<1x128xf32>
      %241 = arith.mulf %223, %237 : vector<1x128xf32>
      %242 = arith.subf %240, %241 : vector<1x128xf32>
      %243 = vector.broadcast %237 : vector<1x128xf32> to vector<32x128xf32>
      %244 = arith.mulf %215, %243 : vector<32x128xf32>
      %245 = vector.broadcast %242 : vector<1x128xf32> to vector<32x128xf32>
      %246 = arith.addf %244, %245 : vector<32x128xf32>
      %247 = arith.truncf %246 : vector<32x128xf32> to vector<32x128xbf16>
      %c0_130 = arith.constant 0 : index
      %c0_131 = arith.constant 0 : index
      %248 = vector.load %arg9[%c0_130, %c0_131] : memref<32x128xbf16, #tpu.memory_space<vmem>>, vector<32x128xbf16>
      tpu.vector_store %arg9[%c0_130, %c0_131], %247 {strides = array<i32>} : memref<32x128xbf16, #tpu.memory_space<vmem>>, vector<32x128xbf16>,
    } else {
    }
    return
  }
  func.func @transform_0(%arg0: i32) -> (i32, i32) {
    %c0_i32 = arith.constant 0 : i32
    %c0_i32_0 = arith.constant 0 : i32
    return %arg0, %c0_i32 : i32, i32
  }
  func.func @transform_1(%arg0: i32) -> (i32, i32) {
    %c0_i32 = arith.constant 0 : i32
    %c0_i32_0 = arith.constant 0 : i32
    %c0_i32_1 = arith.constant 0 : i32
    return %c0_i32, %c0_i32_0 : i32, i32
  }
  func.func @transform_2(%arg0: i32) -> (i32, i32) {
    %c0_i32 = arith.constant 0 : i32
    %c0_i32_0 = arith.constant 0 : i32
    %c0_i32_1 = arith.constant 0 : i32
    return %c0_i32, %c0_i32_0 : i32, i32
  }
  func.func @transform_3(%arg0: i32) -> (i32, i32, i32) {
    %c0_i32 = arith.constant 0 : i32
    %c0_i32_0 = arith.constant 0 : i32
    %c0_i32_1 = arith.constant 0 : i32
    %c0_i32_2 = arith.constant 0 : i32
    return %c0_i32, %c0_i32_0, %c0_i32_1 : i32, i32, i32
  }
  func.func @transform_4(%arg0: i32) -> (i32, i32, i32) {
    %c0_i32 = arith.constant 0 : i32
    %c0_i32_0 = arith.constant 0 : i32
    %c0_i32_1 = arith.constant 0 : i32
    %c0_i32_2 = arith.constant 0 : i32
    return %c0_i32, %c0_i32_0, %c0_i32_1 : i32, i32, i32
  }
  func.func @transform_5(%arg0: i32) -> (i32, i32, i32) {
    %c0_i32 = arith.constant 0 : i32
    %c0_i32_0 = arith.constant 0 : i32
    %c0_i32_1 = arith.constant 0 : i32
    %c0_i32_2 = arith.constant 0 : i32
    return %c0_i32, %c0_i32_0, %c0_i32_1 : i32, i32, i32
  }
  func.func @transform_6(%arg0: i32) -> (i32, i32, i32) {
    %c0_i32 = arith.constant 0 : i32
    %c0_i32_0 = arith.constant 0 : i32
    %c0_i32_1 = arith.constant 0 : i32
    %c0_i32_2 = arith.constant 0 : i32
    return %c0_i32, %c0_i32_0, %c0_i32_1 : i32, i32, i32
  }
  func.func @transform_7(%arg0: i32) -> (i32, i32) {
    %c0_i32 = arith.constant 0 : i32
    %c0_i32_0 = arith.constant 0 : i32
    %c0_i32_1 = arith.constant 0 : i32
    return %c0_i32, %c0_i32_0 : i32, i32
  }
  func.func @transform_8(%arg0: i32) -> (i32, i32) {
    %c0_i32 = arith.constant 0 : i32
    %c0_i32_0 = arith.constant 0 : i32
    %c0_i32_1 = arith.constant 0 : i32
    return %c0_i32, %c0_i32_0 : i32, i32
  }
}

</mosaic_0001>

<bundles_post_ra>
// kernel: tpu_custom_call.1
= control target key start
LH: loop header
LB: loop body
LE: loop exit
PB: predicated region body
PF: predicated region fallthrough
CT: control target
= control target key end

     0   :  { %13 = vsyncpa [#allocation5], 0  ;;  %s6606_s0 = inlined_call_operand.hbm [shape: bf16[32,1024], index: 0, kind: input, shape index: {}]   ;;  %s6607_s1 = inlined_call_operand.hbm [shape: bf16[1024,128], index: 1, kind: input, shape index: {}]   ;;  %s6608_s2 = inlined_call_operand.vmem [shape: bf16[1,128], index: 2, kind: input, shape index: {}]   ;;  %s6609_s3 = inlined_call_operand.hbm [shape: bf16[4,128,128], index: 3, kind: input, shape index: {}]   ;;  %s6610_s4 = inlined_call_operand.vmem [shape: bf16[4,1,128], index: 4, kind: input, shape index: {}]   ;;  %s6611_s5 = inlined_call_operand.vmem [shape: bf16[5,1,128], index: 5, kind: input, shape index: {}]   ;;  %s6612_s6 = inlined_call_operand.vmem [shape: bf16[5,1,128], index: 6, kind: input, shape index: {}]   ;;  %s6613_s7 = inlined_call_operand.hbm [shape: f32[128,128], index: 7, kind: input, shape index: {}]   ;;  %s6614_s8 = inlined_call_operand.hbm [shape: bf16[32,128], index: 8, kind: output, shape index: {}]  }
   0x1   :  { %15 = vsyncpa [#allocation5 + $0x1], 0 }
   0x2   :  { %16 = vsyncpa [#allocation8], 0 }
   0x3   :  { %17 = vsyncpa [#allocation11], 0 }
   0x4   :  { %18 = vsyncpa [#allocation6], 0  ;;  %s5622_s27 = smov 0   ;;  %s5624_s28 = smov 0  }
   0x5   :  { %s5626_s29 = smov 0   ;;  %s5628_s30 = smov 0  }
   0x6 LB: > { %s5641_s9 = sadd.s32 4294967295, %s5559_s30   ;;  %p44_p0 = scmp.ne.s32.totalorder %s5551_s28, %s5547_s27  ;;  %s5559_s30 = sphi %s5628_s30, %s6632_s30   ;;  %s5555_s29 = sphi %s5626_s29, %s6631_s29   ;;  %s5551_s28 = sphi %s5624_s28, %s6630_s28   ;;  %s5547_s27 = sphi %s5622_s27, %s6629_s27  }
   0x7   : > { %p6615_p1 = scmp.eq.s32.totalorder %s5641_s9, 0  ;;  %p3590_p2 = scmp.ge.s32.totalorder %s5559_s30, 1 }
   0x8   : > { %p223_p3 = scmp.lt.s32.totalorder %s5559_s30, 3  ;;  %s5561_s12 = smov [#allocation7]  }
   0x9   : > { %p5650_p5 = por %p6615_p1, %p44_p0  ;;  %s235_s13 = sshll.u32 %s5561_s12, 4  ;;  %s236_s13 = int_to_ptr.vmem [resolvable:$true] %s235_s13 }
   0xa   : > { %p5654_p6 = pnand %p3590_p2, %p223_p3  ;;  %s5562_s15 = smov [#allocation9]  }
   0xb   : > { %s6618_s10 = scalar_select %p5650_p5, 1, 0 }
   0xc   : > { %s6619_s11 = scalar_select %p5654_p6, 1, 0 }
   0xd   : > { %p5205_p7 = pneg %p5654_p6  ;;  %s251_s16 = sshll.u32 %s5562_s15, 4  ;;  %s252_s16 = int_to_ptr.vmem [resolvable:$true] %s251_s16 }
   0xe   : > { %s5563_s17 = smov [#allocation10]   ;;  %s5394_s19 = scalar_lea.vmem %s236_s13, 8192 }
   0xf   : > { %p5662_p8 = pnand %p5205_p7, %p6615_p1  ;;  %s273_s18 = sshll.u32 %s5563_s17, 4  ;;  %s274_s18 = int_to_ptr.vmem [resolvable:$true] %s273_s18 }
  0x10   : > { %p5395_p10 = scmp.ne.s32.totalorder %s236_s13, %s5394_s19  ;;  %p5402_p13 = scmp.lt.s32.totalorder %s236_s13, %s236_s13 }
  0x11   : > { %p5385_p9 = pneg %p5662_p8  ;;  %p5403_p0 = scmp.lt.s32.totalorder %s5394_s19, %s5394_s19 }
  0x13   : > { %p5397_p11 = pnand %p5395_p10, %p5385_p9  ;;  %p5404_p2 = por %p5403_p0, %p5402_p13 }
  0x15   : > { %p5398_p12 = pneg %p5397_p11 }
  0x17   : > { %p5405_p3 = pnand %p5404_p2, %p5398_p12 }
  0x19   : > { %5408 = shalt.err (!%p5405_p3)
}
  0x1a   : > { %s5564_s20 = smov 64   ;;  %s5565_s21 = smov 4  }
  0x1b   : > { %5208 = dma.hbm_to_vmem [thread:$0]  (!%p5662_p8), %s6607_s1, 8192, %s236_s13, [#allocation8], %s5564_s20, %s5564_s20, %s5565_s21  }
  0x1c   : > { %s5420_s24 = scalar_lea.vmem %s252_s16, 4096  ;;  %p5428_p4 = scmp.lt.s32.totalorder %s252_s16, %s252_s16 }
  0x1d   : > { %p5421_p7 = scmp.ne.s32.totalorder %s252_s16, %s5420_s24  ;;  %p5429_p1 = scmp.lt.s32.totalorder %s5420_s24, %s5420_s24 }
  0x1f   : > { %p5423_p10 = pnand %p5421_p7, %p5385_p9  ;;  %p5430_p13 = por %p5429_p1, %p5428_p4 }
  0x21   : > { %p5424_p11 = pneg %p5423_p10 }
  0x23   : > { %p5431_p12 = pnand %p5430_p13, %p5424_p11 }
  0x25   : > { %5434 = shalt.err (!%p5431_p12)
}
  0x26   : > { %5211 = dma.hbm_to_vmem [thread:$0]  (!%p5662_p8), %s6609_s3, 4096, %s252_s16, [#allocation8], %s5564_s20, %s5564_s20, %s5565_s21  }
  0x27   : > { %s5446_s27 = scalar_lea.vmem %s274_s18, 2048  ;;  %p5454_p7 = scmp.lt.s32.totalorder %s274_s18, %s274_s18 }
  0x28   : > { %p5447_p0 = scmp.ne.s32.totalorder %s274_s18, %s5446_s27  ;;  %p5455_p10 = scmp.lt.s32.totalorder %s5446_s27, %s5446_s27 }
  0x2a   : > { %p5449_p2 = pnand %p5447_p0, %p5385_p9  ;;  %p5456_p5 = por %p5455_p10, %p5454_p7 }
  0x2c   : > { %p5450_p3 = pneg %p5449_p2 }
  0x2e   : > { %p5457_p1 = pnand %p5456_p5, %p5450_p3 }
  0x30   : > { %5460 = shalt.err (!%p5457_p1)
}
  0x31   : > { %s5566_s12 = smov 128   ;;  %s5567_s13 = smov 8  }
  0x32   : > { %5214 = dma.hbm_to_vmem [thread:$0]  (!%p5662_p8), %s6613_s7, 2048, %s274_s18, [#allocation11], %s5566_s12, %s5566_s12, %s5567_s13  }
  0x33   : > { %s5693_s17 = sadd.s32 1, %s5559_s30   ;;  %s31_s20 = sadd.s32 1, %s5555_s29 }
  0x34   : > { %s28_s19 = ssub.s32 %s5559_s30, %s5693_s17  ;;  %p38_p5 = scmp.ne.s32.totalorder %s5555_s29, %s5551_s28 }
  0x35   : > { %p29_p4 = scmp.eq.s32.totalorder %s28_s19, 0  ;;  %p39_p9 = scmp.eq.s32.totalorder %s5559_s30, 0 }
  0x36   : > { %p5222_p11 = scmp.lt.s32.totalorder %s5559_s30, 2  ;;  %s287_s22 = sand.u32 1, %s5555_s29  }
  0x37   : > { %s5703_s21 = scalar_select %p29_p4, %s5555_s29, %s31_s20  }
  0x38   : > { %p40_p13 = por %p39_p9, %p38_p5  ;;  %s3595_s23 = sshll.u32 %s287_s22, 6 }
  0x39   : > { %s3720_s24 = sshll.u32 %s5559_s30, 10  ;;  %s291_s18 = scalar_lea.vmem [#allocation4], %s3595_s23 }
  0x3a   : > { %s5710_s26 = scalar_lea.hbm %s6606_s0, %s3720_s24  ;;  %s299_s27 = sshll.u32 %s291_s18, 4  ;;  %s5712_s27 = int_to_ptr.vmem [resolvable:$true] %s299_s27 }
  0x3b   : > { %p5714_p8 = pnand %p5222_p11, %p40_p13  ;;  %s5718_s13 = scalar_lea.sflag [#allocation5], %s287_s22 }
  0x3c   : > { %s5461_s30 = scalar_lea.hbm %s5710_s26, 1024  ;;  %s5466_s19 = scalar_lea.hbm %s6606_s0, 2048 }
  0x3d   : > { %p5462_p12 = scmp.ne.s32.totalorder %s5710_s26, %s5461_s30  ;;  %p5463_p0 = pneg %p5714_p8 }
  0x3e   : > { %p5467_p7 = scmp.lt.s32.totalorder %s5710_s26, %s6606_s0  ;;  %p5468_p10 = scmp.lt.s32.totalorder %s5466_s19, %s5461_s30 }
  0x3f   : > { %p5464_p2 = pnand %p5463_p0, %p5462_p12 }
  0x40   : > { %p5469_p1 = por %p5468_p10, %p5467_p7 }
  0x41   : > { %p5465_p3 = pneg %p5464_p2 }
  0x43   : > { %p5470_p4 = pnand %p5469_p1, %p5465_p3 }
  0x45   : > { %5473 = shalt.err (!%p5470_p4)
}
  0x46   : > { %s5474_s22 = scalar_lea.vmem %s5712_s27, 1024  ;;  %s5568_s24 = smov [#allocation4]  }
  0x47   : > { %p5475_p5 = scmp.ne.s32.totalorder %s5712_s27, %s5474_s22  ;;  %s5479_s14 = sshll.u32 %s5568_s24, 4  ;;  %s5480_s14 = int_to_ptr.vmem [resolvable:$false] %s5479_s14 }
  0x48   : > { %s5481_s25 = scalar_lea.vmem %s5480_s14, 2048  ;;  %p5482_p13 = scmp.lt.s32.totalorder %s5712_s27, %s5480_s14 }
  0x49   : > { %p5477_p9 = pnand %p5475_p5, %p5463_p0  ;;  %p5483_p12 = scmp.lt.s32.totalorder %s5481_s25, %s5474_s22 }
  0x4b   : > { %p5478_p11 = pneg %p5477_p9  ;;  %p5484_p2 = por %p5483_p12, %p5482_p13 }
  0x4d   : > { %p5485_p6 = pnand %p5484_p2, %p5478_p11 }
  0x4f   : > { %5488 = shalt.err (!%p5485_p6)
}
  0x50   : > { %s5569_s18 = smov 512   ;;  %s5570_s30 = smov 32  }
  0x51   : > { %5218 = dma.hbm_to_vmem [thread:$0]  (!%p5714_p8), %s5710_s26, 1024, %s5712_s27, %s5718_s13, %s5569_s18, %s5569_s18, %s5570_s30  }
  0x52   : > { %p6622_p0 = scmp.ne.s32.totalorder %s6619_s11, 0 }
  0x53   : > { %s313_s15 = sand.u32 (!%p6622_p0), 1, %s5551_s28   ;;  %p6623_p3 = scmp.ne.s32.totalorder (!%p6622_p0), %s6618_s10, 0 }
  0x54   : > { %311 = sbr.rel (%p6622_p0) target bundleno = 3499 (0xdab), region = 52  ;;  %s3600_s16 = sshll.u32 (!%p6622_p0), %s313_s15, 6 }
  0x55   : > { %s314_s19 = scalar_lea.sflag (!%p6622_p0), [#allocation5], %s313_s15  ;;  %s5742_s20 = scalar_lea.vmem (!%p6622_p0), [#allocation4], %s3600_s16 }
  0x59   : > { %5530 = dma.done.wait (%p6623_p3), %s314_s19, 1024  }
  0x5a   : > { %5532 = vsyncadd (%p6623_p3), %s314_s19, 4294966272  ;;  %p6624_p6 = scmp.eq.s32.totalorder %s5641_s9, 0 }
  0x5c   : > { %5534 = dma.done.wait (%p6624_p6), [#allocation8], 12288   ;;  %p6625_p8 = pmov %p6624_p6 }
  0x5d   : > { %p6626_p7 = pmov %p6624_p6 }
  0x5e   : > { %5536 = vsyncadd (%p6625_p8), [#allocation8], 4294955008 }
  0x5f   : > { %5538 = dma.done.wait (%p6626_p7), [#allocation11], 2048   ;;  %p6627_p10 = pmov %p6624_p6 }
  0x60   : > { %p6628_p1 = scmp.ne.s32.totalorder %s5641_s9, 0 }
  0x61   : > { %5540 = vsyncadd (%p6627_p10), [#allocation11], 4294965248 }
  0x62   : > { %362 = sbr.rel (%p6628_p1) target bundleno = 105 (0x69), region = 72 }
  0x67   : > { %v5571_v0 = vmov 0.0  }
  0x68   : > { %363 = vst [vmem:[#allocation2] sm:$0x1] %v5571_v0  ;;  %364 = vst [vmem:[#allocation3] sm:$0x1] %v5571_v0 }
  0x69 PF: > { %v5275_v1 = vld [vmem:[#allocation7 + $0x78] sm:$0xff]   ;;  %v5279_v5 = vld [vmem:[#allocation7 + $0x70] sm:$0xff]   ;;  %v5283_v9 = vld [vmem:[#allocation7 + $0x68] sm:$0xff]   ;;  %s3677_s26 = sshll.u32 %s5641_s9, 4  ;;  %p3681_p4 = scmp.ne.s32.totalorder %s5641_s9, 1 }
  0x6a   : > { %v5276_v2 = vld [vmem:[#allocation7 + $0xf8] sm:$0xff]   ;;  %3899 = vmatprep.subr.bf16.mxu0 %v5275_v1  ;;  %v5280_v6 = vld [vmem:[#allocation7 + $0xf0] sm:$0xff]   ;;  %v5284_v10 = vld [vmem:[#allocation7 + $0xe8] sm:$0xff]   ;;  %s1130_s27 = sshra.s32 %s3677_s26, 3 }
  0x6b   : > { %v5277_v3 = vld [vmem:[#allocation7 + $0x38] sm:$0xff]   ;;  %3921 = vmatprep.subr.bf16.mxu1 %v5276_v2  ;;  %v5281_v7 = vld [vmem:[#allocation7 + $0x30] sm:$0xff]   ;;  %v5285_v11 = vld [vmem:[#allocation7 + $0x28] sm:$0xff]   ;;  %s3680_s12 = sshll.u32 %s1130_s27, 2 }
  0x6c   : > { %v5278_v4 = vld [vmem:[#allocation7 + $0xb8] sm:$0xff]   ;;  %3900 = vmatpush3.bf16.msra.mxu0 %v5277_v3  ;;  %v5282_v8 = vld [vmem:[#allocation7 + $0xb0] sm:$0xff]   ;;  %v5286_v12 = vld [vmem:[#allocation7 + $0xa8] sm:$0xff]   ;;  %s1133_s13 = scalar_lea.vmem [#allocation12], %s3680_s12 }
  0x6d   : > { %3922 = vmatpush3.bf16.msra.mxu1 %v5278_v4  ;;  %3901 = vmatprep.subr.bf16.mxu0 %v5279_v5  ;;  %v5287_v13 = vld [vmem:[#allocation7 + $0x60] sm:$0xff]   ;;  %v5291_v17 = vld [vmem:[#allocation7 + $0x58] sm:$0xff]   ;;  %v5295_v21 = vld [vmem:[#allocation7 + $0x50] sm:$0xff]  }
  0x6e   : > { %3923 = vmatprep.subr.bf16.mxu1 %v5280_v6  ;;  %v5288_v14 = vld [vmem:[#allocation7 + $0xe0] sm:$0xff]   ;;  %v5292_v18 = vld [vmem:[#allocation7 + $0xd8] sm:$0xff]   ;;  %v5296_v22 = vld [vmem:[#allocation7 + $0xd0] sm:$0xff]  }
  0x6f   : > { %v5289_v15 = vld [vmem:[#allocation7 + $0x20] sm:$0xff]   ;;  %v5293_v19 = vld [vmem:[#allocation7 + $0x18] sm:$0xff]   ;;  %v5297_v23 = vld [vmem:[#allocation7 + $0x10] sm:$0xff]  }
  0x70   : > { %3902 = vmatpush3.bf16.msra.mxu0 %v5281_v7  ;;  %v5290_v16 = vld [vmem:[#allocation7 + $0xa0] sm:$0xff]   ;;  %v5294_v20 = vld [vmem:[#allocation7 + $0x98] sm:$0xff]   ;;  %v5298_v24 = vld [vmem:[#allocation7 + $0x90] sm:$0xff]  }
  0x71   : > { %3924 = vmatpush3.bf16.msra.mxu1 %v5282_v8  ;;  %3903 = vmatprep.subr.bf16.mxu0 %v5283_v9  ;;  %v5299_v25 = vld [vmem:[#allocation7 + $0x48] sm:$0xff]   ;;  %v5303_v29 = vld [vmem:[#allocation7 + $0x40] sm:$0xff]   ;;  %v5307_v41 = vld [vmem:[#allocation7 + $0x178] sm:$0xff]  }
  0x72   : > { %3925 = vmatprep.subr.bf16.mxu1 %v5284_v10  ;;  %v5300_v26 = vld [vmem:[#allocation7 + $0xc8] sm:$0xff]   ;;  %v5304_v30 = vld [vmem:[#allocation7 + $0xc0] sm:$0xff]   ;;  %v5308_v42 = vld [vmem:[#allocation7 + $0x1f8] sm:$0xff]  }
  0x73   : > { %v5301_v27 = vld [vmem:[#allocation7 + $0x8] sm:$0xff]   ;;  %v5305_v31 = vld [vmem:[#allocation7] sm:$0xff]   ;;  %v5309_v43 = vld [vmem:[#allocation7 + $0x138] sm:$0xff]  }
  0x74   : > { %3904 = vmatpush3.bf16.msra.mxu0 %v5285_v11  ;;  %v5302_v28 = vld [vmem:[#allocation7 + $0x88] sm:$0xff]   ;;  %v5306_v32 = vld [vmem:[#allocation7 + $0x80] sm:$0xff]   ;;  %v5310_v44 = vld [vmem:[#allocation7 + $0x1b8] sm:$0xff]  }
  0x75   : > { %3926 = vmatpush3.bf16.msra.mxu1 %v5286_v12  ;;  %3905 = vmatprep.subr.bf16.mxu0 %v5287_v13  ;;  %v365_v33 = vld [vmem:[%s5742_s20] sm:$0xff]  ;;  %v366_v35 = vld [vmem:[%s5742_s20 + $0x8] sm:$0xff]  ;;  %v5311_v45 = vld [vmem:[#allocation7 + $0x170] sm:$0xff]  }
  0x76   : > { %3927 = vmatprep.subr.bf16.mxu1 %v5288_v14  ;;  %v369_v34 = vld [vmem:[%s5742_s20 + $0x20] sm:$0xff]  ;;  %v370_v38 = vld [vmem:[%s5742_s20 + $0x28] sm:$0xff]  ;;  %v5312_v46 = vld [vmem:[#allocation7 + $0x1f0] sm:$0xff]  }
  0x77   : > { %v3605_v36 = vcombine.low %v365_v33, %v369_v34  ;;  %v3606_v37 = vcombine.high %v365_v33, %v369_v34  ;;  %v3607_v39 = vcombine.low %v366_v35, %v370_v38  ;;  %v3608_v40 = vcombine.high %v366_v35, %v370_v38  ;;  %v5313_v47 = vld [vmem:[#allocation7 + $0x130] sm:$0xff]   ;;  %v5315_v49 = vld [vmem:[#allocation7 + $0x168] sm:$0xff]   ;;  %v5319_v53 = vld [vmem:[#allocation7 + $0x160] sm:$0xff]  }
  0x78   : > { %3906 = vmatpush3.bf16.msra.mxu0 %v5289_v15  ;;  %v5314_v48 = vld [vmem:[#allocation7 + $0x1b0] sm:$0xff]   ;;  %v5316_v50 = vld [vmem:[#allocation7 + $0x1e8] sm:$0xff]   ;;  %v5320_v54 = vld [vmem:[#allocation7 + $0x1e0] sm:$0xff]  }
  0x79   : > { %3928 = vmatpush3.bf16.msra.mxu1 %v5290_v16  ;;  %3907 = vmatprep.subr.bf16.mxu0 %v5291_v17  ;;  %v5317_v51 = vld [vmem:[#allocation7 + $0x128] sm:$0xff]   ;;  %v5321_v55 = vld [vmem:[#allocation7 + $0x120] sm:$0xff]   ;;  %v5323_v57 = vld [vmem:[#allocation7 + $0x158] sm:$0xff]   ;;  %v503_v17 = vlaneseq }
  0x7a   : > { %3929 = vmatprep.subr.bf16.mxu1 %v5292_v18  ;;  %963 = vmatprep.mubr.bf16.mxu0 %v3606_v37  ;;  %v5318_v52 = vld [vmem:[#allocation7 + $0x1a8] sm:$0xff]   ;;  %v5322_v56 = vld [vmem:[#allocation7 + $0x1a0] sm:$0xff]   ;;  %v5324_v58 = vld [vmem:[#allocation7 + $0x1d8] sm:$0xff]  }
  0x7b   : > { %1004 = vmatprep.mubr.bf16.mxu1 %v3608_v40  ;;  %v5325_v59 = vld [vmem:[#allocation7 + $0x118] sm:$0xff]   ;;  %v5327_v61 = vld [vmem:[#allocation7 + $0x150] sm:$0xff]   ;;  %v5331_v1 = vld [vmem:[#allocation7 + $0x148] sm:$0xff]  }
  0x7c   : > { %3908 = vmatpush3.bf16.msra.mxu0 %v5293_v19  ;;  %v5326_v60 = vld [vmem:[#allocation7 + $0x198] sm:$0xff]   ;;  %v5328_v62 = vld [vmem:[#allocation7 + $0x1d0] sm:$0xff]   ;;  %v5332_v2 = vld [vmem:[#allocation7 + $0x1c8] sm:$0xff]  }
  0x7d   : > { %3930 = vmatpush3.bf16.msra.mxu1 %v5294_v20  ;;  %3909 = vmatprep.subr.bf16.mxu0 %v5295_v21  ;;  %v5329_v63 = vld [vmem:[#allocation7 + $0x110] sm:$0xff]   ;;  %v5333_v3 = vld [vmem:[#allocation7 + $0x108] sm:$0xff]   ;;  %v5335_v5 = vld [vmem:[#allocation7 + $0x140] sm:$0xff]   ;;  %v5767_v20 = vshrl.u32 %v503_v17, 7 }
  0x7e   : > { %3931 = vmatprep.subr.bf16.mxu1 %v5296_v22  ;;  %v5330_v0 = vld [vmem:[#allocation7 + $0x190] sm:$0xff]   ;;  %v5334_v4 = vld [vmem:[#allocation7 + $0x188] sm:$0xff]   ;;  %v5336_v6 = vld [vmem:[#allocation7 + $0x1c0] sm:$0xff]  }
  0x7f   : > { %v5337_v7 = vld [vmem:[#allocation7 + $0x100] sm:$0xff]   ;;  %v367_v9 = vld [vmem:[%s5742_s20 + $0x10] sm:$0xff]  ;;  %v368_v13 = vld [vmem:[%s5742_s20 + $0x18] sm:$0xff] }
  0x80   : > { %3910 = vmatpush3.bf16.msra.mxu0 %v5297_v23  ;;  %v5338_v8 = vld [vmem:[#allocation7 + $0x180] sm:$0xff]   ;;  %v371_v10 = vld [vmem:[%s5742_s20 + $0x30] sm:$0xff]  ;;  %v372_v14 = vld [vmem:[%s5742_s20 + $0x38] sm:$0xff] }
  0x81   : > { %3932 = vmatpush3.bf16.msra.mxu1 %v5298_v24  ;;  %3911 = vmatprep.subr.bf16.mxu0 %v5299_v25  ;;  %v3609_v11 = vcombine.low %v367_v9, %v371_v10  ;;  %v3610_v12 = vcombine.high %v367_v9, %v371_v10  ;;  %v3611_v15 = vcombine.low %v368_v13, %v372_v14  ;;  %v501_v21 = vld [vmem:[%s6608_s2] sm:$0x1]  ;;  %v5773_v24 = vsub.s32 0, %v5767_v20 }
  0x82   : > { %3933 = vmatprep.subr.bf16.mxu1 %v5300_v26  ;;  %v3612_v16 = vcombine.high %v368_v13, %v372_v14  ;;  %v502_v23 = vunpack.c.l.bf16 %v501_v21  ;;  %v1100_v9 = vld [vmem:[#allocation2] sm:$0x1] }
  0x84   : > { %3912 = vmatpush3.bf16.msra.mxu0 %v5301_v27  ;;  %v506_v27 = vrot.slane %v502_v23, %v5773_v24 }
  0x85   : > { %3934 = vmatpush3.bf16.msra.mxu1 %v5302_v28  ;;  %3913 = vmatprep.subr.bf16.mxu0 %v5303_v29 }
  0x86   : > { %3935 = vmatprep.subr.bf16.mxu1 %v5304_v30 }
  0x88   : > { %3914 = vmatpush3.bf16.msra.mxu0 %v5305_v31 }
  0x89   : > { %3936 = vmatpush3.bf16.msra.mxu1 %v5306_v32  ;;  %3943 = vmatprep.subr.bf16.mxu0 %v5307_v41 }
  0x8a   : > { %3965 = vmatprep.subr.bf16.mxu1 %v5308_v42 }
  0x8b   : > { %964 = vmatmul.mubr.bf16.vlgmr.msra.gmra.mxu0 %v3605_v36 }
  0x8c   : > { %1005 = vmatmul.mubr.bf16.vlgmr.msra.gmra.mxu1 %v3607_v39  ;;  %3944 = vmatpush3.bf16.msra.mxu0 %v5309_v43 }
  0x8d   : > { %3966 = vmatpush3.bf16.msra.mxu1 %v5310_v44  ;;  %3945 = vmatprep.subr.bf16.mxu0 %v5311_v45 }
  0x8e   : > { %3967 = vmatprep.subr.bf16.mxu1 %v5312_v46  ;;  %1045 = vmatprep.mubr.bf16.mxu0 %v3610_v12  ;;  %v1110_v12 = vld [vmem:[#allocation3] sm:$0x1] }
  0x8f   : > { %1086 = vmatprep.mubr.bf16.mxu1 %v3612_v16 }
  0x90   : > { %3946 = vmatpush3.bf16.msra.mxu0 %v5313_v47 }
  0x91   : > { %3968 = vmatpush3.bf16.msra.mxu1 %v5314_v48  ;;  %3947 = vmatprep.subr.bf16.mxu0 %v5315_v49 }
  0x92   : > { %3969 = vmatprep.subr.bf16.mxu1 %v5316_v50 }
  0x94   : > { %3948 = vmatpush3.bf16.msra.mxu0 %v5317_v51 }
  0x95   : > { %3970 = vmatpush3.bf16.msra.mxu1 %v5318_v52  ;;  %3949 = vmatprep.subr.bf16.mxu0 %v5319_v53 }
  0x96   : > { %3971 = vmatprep.subr.bf16.mxu1 %v5320_v54 }
  0x98   : > { %3950 = vmatpush3.bf16.msra.mxu0 %v5321_v55 }
  0x99   : > { %3972 = vmatpush3.bf16.msra.mxu1 %v5322_v56  ;;  %3951 = vmatprep.subr.bf16.mxu0 %v5323_v57 }
  0x9a   : > { %3973 = vmatprep.subr.bf16.mxu1 %v5324_v58 }
  0x9c   : > { %3952 = vmatpush3.bf16.msra.mxu0 %v5325_v59 }
  0x9d   : > { %3974 = vmatpush3.bf16.msra.mxu1 %v5326_v60  ;;  %3953 = vmatprep.subr.bf16.mxu0 %v5327_v61 }
  0x9e   : > { %3975 = vmatprep.subr.bf16.mxu1 %v5328_v62 }
  0xa0   : > { %3954 = vmatpush3.bf16.msra.mxu0 %v5329_v63 }
  0xa1   : > { %3976 = vmatpush3.bf16.msra.mxu1 %v5330_v0  ;;  %3955 = vmatprep.subr.bf16.mxu0 %v5331_v1 }
  0xa2   : > { %3977 = vmatprep.subr.bf16.mxu1 %v5332_v2 }
  0xa4   : > { %3956 = vmatpush3.bf16.msra.mxu0 %v5333_v3 }
  0xa5   : > { %3978 = vmatpush3.bf16.msra.mxu1 %v5334_v4  ;;  %3957 = vmatprep.subr.bf16.mxu0 %v5335_v5 }
  0xa6   : > { %3979 = vmatprep.subr.bf16.mxu1 %v5336_v6 }
  0xa8   : > { %3958 = vmatpush3.bf16.msra.mxu0 %v5337_v7 }
  0xa9   : > { %3980 = vmatpush3.bf16.msra.mxu1 %v5338_v8 }
  0xab   : > { %1046 = vmatmul.mubr.bf16.vlgmr.msra.gmra.mxu0 %v3609_v11 }
  0xac   : > { %1087 = vmatmul.mubr.bf16.vlgmr.msra.gmra.mxu1 %v3611_v15 }
 0x14b   : > { %v3915_v18 = vpop.f32.mrf.mxu0 }
 0x14c   : > { %v3937_v19 = vpop.f32.mrf.mxu1 }
 0x14d   : > { %v3916_v22 = vpop.f32.mrf.mxu0 }
 0x14e   : > { %v3938_v25 = vpop.f32.mrf.mxu1  ;;  %v3917_v28 = vadd.f32 %v3916_v22, %v3915_v18 }
 0x14f   : > { %v3918_v26 = vpop.f32.mrf.mxu0  ;;  %v3939_v32 = vadd.f32 %v3938_v25, %v3937_v19 }
 0x150   : > { %v3940_v29 = vpop.f32.mrf.mxu1  ;;  %v966_v31 = vadd.f32 %v3917_v28, %v506_v27 }
 0x151   : > { %v3919_v30 = vpop.f32.mrf.mxu0 }
 0x152   : > { %v3920_v33 = vadd.f32 %v3919_v30, %v3918_v26  ;;  %v3941_v34 = vpop.f32.mrf.mxu1  ;;  %v1007_v38 = vadd.f32 %v3939_v32, %v966_v31 }
 0x153   : > { %v3942_v43 = vadd.f32 %v3941_v34, %v3940_v29 }
 0x154   : > { %v969_v39 = vadd.f32 %v3920_v33, %v506_v27 }
 0x156   : > { %v1010_v47 = vadd.f32 %v3942_v43, %v969_v39 }
 0x16b   : > { %v3959_v35 = vpop.f32.mrf.mxu0 }
 0x16c   : > { %v3981_v36 = vpop.f32.mrf.mxu1 }
 0x16d   : > { %v3960_v37 = vpop.f32.mrf.mxu0 }
 0x16e   : > { %v3961_v40 = vadd.f32 %v3960_v37, %v3959_v35  ;;  %v3982_v41 = vpop.f32.mrf.mxu1 }
 0x16f   : > { %v3962_v42 = vpop.f32.mrf.mxu0  ;;  %v3983_v48 = vadd.f32 %v3982_v41, %v3981_v36 }
 0x170   : > { %v1048_v44 = vadd.f32 %v3961_v40, %v1007_v38  ;;  %v3984_v45 = vpop.f32.mrf.mxu1 }
 0x171   : > { %v3963_v46 = vpop.f32.mrf.mxu0 }
 0x172   : > { %v3964_v49 = vadd.f32 %v3963_v46, %v3962_v42  ;;  %v3985_v50 = vpop.f32.mrf.mxu1  ;;  %v1089_v51 = vadd.f32 %v3983_v48, %v1048_v44 }
 0x173   : > { %v3986_v53 = vadd.f32 %v3985_v50, %v3984_v45 }
 0x174   : > { %v1051_v52 = vadd.f32 %v3964_v49, %v1010_v47  ;;  %v1095_v55 = vmax.f32 %v1089_v51, 0.0 }
 0x176   : > { %v1092_v54 = vadd.f32 %v3986_v53, %v1051_v52 }
 0x178   : > { %v1096_v56 = vmax.f32 %v1092_v54, 0.0 }
 0x17a   : > { %v1097_v57 = vpack.c.bf16 %v1096_v56, %v1095_v55 }
 0x17c   : > { %v1098_v58 = vunpack.c.l.bf16 %v1097_v57  ;;  %v1099_v59 = vunpack.c.h.bf16 %v1097_v57  ;;  %3731 = vst [vmem:[%s1133_s13] sm:$0xff] %v1097_v57  }
 0x17e   : > { %v1101_v60 = vadd.f32 %v1099_v59, %v1098_v58  ;;  %v1111_v61 = vmul.f32 %v1098_v58, %v1098_v58  ;;  %v1112_v62 = vmul.f32 %v1099_v59, %v1099_v59 }
 0x180   : > { %v1102_v63 = vrot.slane %v1101_v60, 4  ;;  %v1113_v0 = vadd.f32 %v1112_v62, %v1111_v61 }
 0x182   : > { %v1103_v1 = vadd.f32 %v1102_v63, %v1101_v60  ;;  %v1114_v2 = vrot.slane %v1113_v0, 4 }
 0x184   : > { %v1104_v3 = vrot.slane %v1103_v1, 2  ;;  %v1115_v4 = vadd.f32 %v1114_v2, %v1113_v0 }
 0x186   : > { %v1105_v5 = vadd.f32 %v1104_v3, %v1103_v1  ;;  %v1116_v6 = vrot.slane %v1115_v4, 2 }
 0x188   : > { %v1106_v7 = vrot.slane %v1105_v5, 1  ;;  %v1117_v8 = vadd.f32 %v1116_v6, %v1115_v4 }
 0x18a   : > { %v1107_v10 = vadd.f32 %v1106_v7, %v1105_v5  ;;  %v1118_v11 = vrot.slane %v1117_v8, 1 }
 0x18c   : > { %v1108_v13 = vadd.f32 %v1107_v10, %v1100_v9  ;;  %v1119_v14 = vadd.f32 %v1118_v11, %v1117_v8  ;;  %1139 = sbr.rel (%p3681_p4) target bundleno = 3483 (0xd9b), region = 76 }
 0x18e   : > { %1109 = vst [vmem:[#allocation2] sm:$0x1] %v1108_v13  ;;  %v1120_v15 = vadd.f32 %v1119_v14, %v1110_v12 }
 0x190   : > { %1121 = vst [vmem:[#allocation3] sm:$0x1] %v1120_v15 }
 0x191   : > { %v5778_v16 = vld [vmem:[#allocation10 + $0x78] sm:$0xff]  ;;  %v5572_v18 = vmov 0.0   ;;  %v5782_v19 = vld [vmem:[#allocation10 + $0x70] sm:$0xff]  ;;  %v5788_v21 = vld [vmem:[#allocation10 + $0x68] sm:$0xff]  ;;  %vm5573_vm0 = vmmov 0   ;;  %v5901_v9 = vand.u32 127, %v503_v17 }
 0x192   : > { %4393 = vmatprep.subr.mxu0 %v5572_v18  ;;  %4428 = vmatprep.subr.mxu1 %v5572_v18  ;;  %v5794_v22 = vld [vmem:[#allocation10 + $0x60] sm:$0xff]  ;;  %v5800_v23 = vld [vmem:[#allocation10 + $0x58] sm:$0xff]  ;;  %v5806_v25 = vld [vmem:[#allocation10 + $0x50] sm:$0xff]  ;;  %v1158_v10 = vadd.s32 8, %v5767_v20  ;;  %v1159_v12 = vadd.s32 16, %v5767_v20  ;;  %v1160_v15 = vadd.s32 24, %v5767_v20 }
 0x193   : > { %4394 = vmatpush3.msra.mxu0 %v5778_v16  ;;  %4429 = vmatpush3.msra.mxu1 %v5778_v16  ;;  %v5812_v26 = vld [vmem:[#allocation10 + $0x48] sm:$0xff]  ;;  %v5818_v27 = vld [vmem:[#allocation10 + $0x40] sm:$0xff]  ;;  %v5824_v28 = vld [vmem:[#allocation10 + $0x38] sm:$0xff]  ;;  %vm1175_vm1 = vcmp.eq.s32.totalorder %v5767_v20, %v5901_v9 }
 0x194   : > { %4395 = vmatprep.subr.mxu0 %v5572_v18  ;;  %4430 = vmatprep.subr.mxu1 %v5572_v18  ;;  %v5830_v29 = vld [vmem:[#allocation10 + $0x30] sm:$0xff]  ;;  %v5836_v30 = vld [vmem:[#allocation10 + $0x28] sm:$0xff]  ;;  %v5842_v31 = vld [vmem:[#allocation10 + $0x20] sm:$0xff]  ;;  %vm1176_vm2 = vcmp.eq.s32.totalorder %v1158_v10, %v5901_v9  ;;  %vm1177_vm3 = vcmp.eq.s32.totalorder %v1159_v12, %v5901_v9  ;;  %vm1178_vm4 = vcmp.eq.s32.totalorder %v1160_v15, %v5901_v9  ;;  %v1172_v12 = vadd.s32 120, %v5767_v20 }
 0x195   : > { %4396 = vmatpush3.msra.mxu0 %v5782_v19  ;;  %4431 = vmatpush3.msra.mxu1 %v5782_v19  ;;  %v5848_v32 = vld [vmem:[#allocation10 + $0x18] sm:$0xff]  ;;  %v5854_v33 = vld [vmem:[#allocation10 + $0x10] sm:$0xff]  ;;  %v5860_v34 = vld [vmem:[#allocation10 + $0x8] sm:$0xff] }
 0x196   : > { %4397 = vmatprep.subr.mxu0 %v5572_v18  ;;  %4432 = vmatprep.subr.mxu1 %v5572_v18  ;;  %v5866_v35 = vld [vmem:[#allocation10] sm:$0xff]  ;;  %v1223_v36 = vld [vmem:[#allocation2] sm:$0x1]  ;;  %v3875_v41 = vld [vmem:[#allocation9 + $0x30] sm:$0xff]  }
 0x197   : > { %4398 = vmatpush3.msra.mxu0 %v5788_v21  ;;  %4433 = vmatpush3.msra.mxu1 %v5788_v21  ;;  %v1224_v37 = vld [vmem:[#allocation3] sm:$0x1]  ;;  %v3759_v42 = vunpack.c.h.bf16 %v3875_v41  ;;  %v3758_v43 = vunpack.c.l.bf16 %v3875_v41  ;;  %v3874_v44 = vld [vmem:[#allocation9 + $0x28] sm:$0xff]   ;;  %v3873_v47 = vld [vmem:[#allocation9 + $0x20] sm:$0xff]  }
 0x198   : > { %4399 = vmatprep.subr.mxu0 %v5572_v18  ;;  %4434 = vmatprep.subr.mxu1 %v5572_v18  ;;  %v3876_v38 = vld [vmem:[#allocation9 + $0x38] sm:$0xff]   ;;  %v3755_v45 = vunpack.c.h.bf16 %v3874_v44  ;;  %v3754_v46 = vunpack.c.l.bf16 %v3874_v44  ;;  %v3751_v48 = vunpack.c.h.bf16 %v3873_v47  ;;  %v3750_v49 = vunpack.c.l.bf16 %v3873_v47  ;;  %v3871_v53 = vld [vmem:[#allocation9 + $0x10] sm:$0xff]   ;;  %v3870_v56 = vld [vmem:[#allocation9 + $0x8] sm:$0xff]  }
 0x199   : > { %4400 = vmatpush3.msra.mxu0 %v5794_v22  ;;  %4435 = vmatpush3.msra.mxu1 %v5794_v22  ;;  %v3763_v39 = vunpack.c.h.bf16 %v3876_v38  ;;  %v3762_v40 = vunpack.c.l.bf16 %v3876_v38  ;;  %v3872_v50 = vld [vmem:[#allocation9 + $0x18] sm:$0xff]   ;;  %v3743_v54 = vunpack.c.h.bf16 %v3871_v53  ;;  %v3742_v55 = vunpack.c.l.bf16 %v3871_v53  ;;  %v3733_v59 = vld [vmem:[#allocation9] sm:$0xff]  }
 0x19a   : > { %4401 = vmatprep.subr.mxu0 %v5572_v18  ;;  %4436 = vmatprep.subr.mxu1 %v5572_v18  ;;  %v3747_v51 = vunpack.c.h.bf16 %v3872_v50  ;;  %v3746_v52 = vunpack.c.l.bf16 %v3872_v50  ;;  %v3739_v57 = vunpack.c.h.bf16 %v3870_v56  ;;  %v3738_v58 = vunpack.c.l.bf16 %v3870_v56  ;;  %v1370_v8 = vld [vmem:[%s6611_s5] sm:$0x1] }
 0x19b   : > { %4402 = vmatpush3.msra.mxu0 %v5800_v23  ;;  %4437 = vmatpush3.msra.mxu1 %v5800_v23  ;;  %v3735_v60 = vunpack.c.h.bf16 %v3733_v59  ;;  %v3734_v61 = vunpack.c.l.bf16 %v3733_v59  ;;  %v1371_v11 = vunpack.c.l.bf16 %v1370_v8  ;;  %v1375_v13 = vld [vmem:[%s6612_s6] sm:$0x1]  ;;  %v5915_v38 = vsel %vm1175_vm1, 1.0, %v5572_v18 }
 0x19c   : > { %4403 = vmatprep.subr.mxu0 %v5572_v18  ;;  %4438 = vmatprep.subr.mxu1 %v5572_v18  ;;  %v1376_v17 = vunpack.c.l.bf16 %v1375_v13  ;;  %v1163_v44 = vadd.s32 48, %v5767_v20  ;;  %vm1190_vm1 = vcmp.eq.s32.totalorder %v1172_v12, %v5901_v9 }
 0x19d   : > { %4404 = vmatpush3.msra.mxu0 %v5806_v25  ;;  %4439 = vmatpush3.msra.mxu1 %v5806_v25 }
 0x19e   : > { %4405 = vmatprep.subr.mxu0 %v5572_v18  ;;  %4440 = vmatprep.subr.mxu1 %v5572_v18  ;;  %vm1181_vm7 = vcmp.eq.s32.totalorder %v1163_v44, %v5901_v9 }
 0x19f   : > { %4406 = vmatpush3.msra.mxu0 %v5812_v26  ;;  %4441 = vmatpush3.msra.mxu1 %v5812_v26  ;;  %v5959_v56 = vsel %vm1181_vm7, 1.0, %v5572_v18 }
 0x1a0   : > { %4407 = vmatprep.subr.mxu0 %v5572_v18  ;;  %4442 = vmatprep.subr.mxu1 %v5572_v18 }
 0x1a1   : > { %4408 = vmatpush3.msra.mxu0 %v5818_v27  ;;  %4443 = vmatpush3.msra.mxu1 %v5818_v27 }
 0x1a2   : > { %4409 = vmatprep.subr.mxu0 %v5572_v18  ;;  %4444 = vmatprep.subr.mxu1 %v5572_v18 }
 0x1a3   : > { %4410 = vmatpush3.msra.mxu0 %v5824_v28  ;;  %4445 = vmatpush3.msra.mxu1 %v5824_v28 }
 0x1a4   : > { %4411 = vmatprep.subr.mxu0 %v5572_v18  ;;  %4446 = vmatprep.subr.mxu1 %v5572_v18 }
 0x1a5   : > { %4412 = vmatpush3.msra.mxu0 %v5830_v29  ;;  %4447 = vmatpush3.msra.mxu1 %v5830_v29 }
 0x1a6   : > { %4413 = vmatprep.subr.mxu0 %v5572_v18  ;;  %4448 = vmatprep.subr.mxu1 %v5572_v18 }
 0x1a7   : > { %4414 = vmatpush3.msra.mxu0 %v5836_v30  ;;  %4449 = vmatpush3.msra.mxu1 %v5836_v30 }
 0x1a8   : > { %4415 = vmatprep.subr.mxu0 %v5572_v18  ;;  %4450 = vmatprep.subr.mxu1 %v5572_v18 }
 0x1a9   : > { %4416 = vmatpush3.msra.mxu0 %v5842_v31  ;;  %4451 = vmatpush3.msra.mxu1 %v5842_v31 }
 0x1aa   : > { %4417 = vmatprep.subr.mxu0 %v5572_v18  ;;  %4452 = vmatprep.subr.mxu1 %v5572_v18 }
 0x1ab   : > { %4418 = vmatpush3.msra.mxu0 %v5848_v32  ;;  %4453 = vmatpush3.msra.mxu1 %v5848_v32 }
 0x1ac   : > { %4419 = vmatprep.subr.mxu0 %v5572_v18  ;;  %4454 = vmatprep.subr.mxu1 %v5572_v18 }
 0x1ad   : > { %4420 = vmatpush3.msra.mxu0 %v5854_v33  ;;  %4455 = vmatpush3.msra.mxu1 %v5854_v33 }
 0x1ae   : > { %4421 = vmatprep.subr.mxu0 %v5572_v18  ;;  %4456 = vmatprep.subr.mxu1 %v5572_v18 }
 0x1af   : > { %4422 = vmatpush3.msra.mxu0 %v5860_v34  ;;  %4457 = vmatpush3.msra.mxu1 %v5860_v34 }
 0x1b0   : > { %4423 = vmatprep.subr.mxu0 %v5572_v18  ;;  %4458 = vmatprep.subr.mxu1 %v5572_v18 }
 0x1b1   : > { %4424 = vmatpush3.msra.mxu0 %v5866_v35  ;;  %4425 = vmatprep.mubr.msk.f32.mxu0 %vm5573_vm0, %v5572_v18 }
 0x1b2   : > { %4459 = vmatpush3.msra.mxu1 %v5866_v35  ;;  %4460 = vmatprep.mubr.msk.f32.mxu1 %vm5573_vm0, %v5572_v18 }
 0x1b3   : > { %4426 = vmatmul.mubr.f32.vlgmr.msra.gmra.mxu0 %v1223_v36  ;;  %4461 = vmatmul.mubr.f32.vlgmr.msra.gmra.mxu1 %v1224_v37  ;;  %v1161_v37 = vadd.s32 32, %v5767_v20 }
 0x1b4   : > { %4519 = vmatprep.subr.mxu1 %v5572_v18  ;;  %4551 = vmatprep.mubr.msk.f32.mxu1 %vm5573_vm0, %v5572_v18 }
 0x1b5   : > { %4463 = vmatprep.subr.mxu0 %v3763_v39  ;;  %4520 = vmatpush3.msra.mxu1 %v3763_v39  ;;  %vm1179_vm5 = vcmp.eq.s32.totalorder %v1161_v37, %v5901_v9  ;;  %v6041_v37 = vsel %vm1190_vm1, 1.0, %v5572_v18 }
 0x1b6   : > { %4464 = vmatpush3.msra.mxu0 %v3763_v39  ;;  %4521 = vmatprep.subr.mxu1 %v5572_v18  ;;  %v5918_v39 = vsel %vm1176_vm2, 1.0, %v5572_v18  ;;  %v5940_v50 = vsel %vm1179_vm5, 1.0, %v5572_v18 }
 0x1b7   : > { %4465 = vmatprep.subr.mxu0 %v3762_v40  ;;  %4522 = vmatpush3.msra.mxu1 %v3762_v40 }
 0x1b8   : > { %4466 = vmatpush3.msra.mxu0 %v3762_v40  ;;  %4523 = vmatprep.subr.mxu1 %v5572_v18 }
 0x1b9   : > { %4467 = vmatprep.subr.mxu0 %v3759_v42  ;;  %4524 = vmatpush3.msra.mxu1 %v3759_v42 }
 0x1ba   : > { %4468 = vmatpush3.msra.mxu0 %v3759_v42  ;;  %4525 = vmatprep.subr.mxu1 %v5572_v18  ;;  %v5924_v42 = vsel %vm1177_vm3, 1.0, %v5572_v18 }
 0x1bb   : > { %4469 = vmatprep.subr.mxu0 %v3758_v43  ;;  %4526 = vmatpush3.msra.mxu1 %v3758_v43 }
 0x1bc   : > { %4470 = vmatpush3.msra.mxu0 %v3758_v43  ;;  %4527 = vmatprep.subr.mxu1 %v5572_v18  ;;  %v1162_v43 = vadd.s32 40, %v5767_v20 }
 0x1bd   : > { %4471 = vmatprep.subr.mxu0 %v3755_v45  ;;  %4528 = vmatpush3.msra.mxu1 %v3755_v45 }
 0x1be   : > { %4472 = vmatpush3.msra.mxu0 %v3755_v45  ;;  %4529 = vmatprep.subr.mxu1 %v5572_v18  ;;  %vm1180_vm6 = vcmp.eq.s32.totalorder %v1162_v43, %v5901_v9 }
 0x1bf   : > { %4473 = vmatprep.subr.mxu0 %v3754_v46  ;;  %4530 = vmatpush3.msra.mxu1 %v3754_v46 }
 0x1c0   : > { %4474 = vmatpush3.msra.mxu0 %v3754_v46  ;;  %4531 = vmatprep.subr.mxu1 %v5572_v18 }
 0x1c1   : > { %4475 = vmatprep.subr.mxu0 %v3751_v48  ;;  %4532 = vmatpush3.msra.mxu1 %v3751_v48 }
 0x1c2   : > { %4476 = vmatpush3.msra.mxu0 %v3751_v48  ;;  %4533 = vmatprep.subr.mxu1 %v5572_v18 }
 0x1c3   : > { %4477 = vmatprep.subr.mxu0 %v3750_v49  ;;  %4534 = vmatpush3.msra.mxu1 %v3750_v49 }
 0x1c4   : > { %4478 = vmatpush3.msra.mxu0 %v3750_v49  ;;  %4535 = vmatprep.subr.mxu1 %v5572_v18  ;;  %v5937_v49 = vsel %vm1178_vm4, 1.0, %v5572_v18 }
 0x1c5   : > { %4479 = vmatprep.subr.mxu0 %v3747_v51  ;;  %4536 = vmatpush3.msra.mxu1 %v3747_v51 }
 0x1c6   : > { %4480 = vmatpush3.msra.mxu0 %v3747_v51  ;;  %4537 = vmatprep.subr.mxu1 %v5572_v18  ;;  %v1164_v51 = vadd.s32 56, %v5767_v20 }
 0x1c7   : > { %4481 = vmatprep.subr.mxu0 %v3746_v52  ;;  %4538 = vmatpush3.msra.mxu1 %v3746_v52 }
 0x1c8   : > { %4482 = vmatpush3.msra.mxu0 %v3746_v52  ;;  %4539 = vmatprep.subr.mxu1 %v5572_v18  ;;  %v1165_v52 = vadd.s32 64, %v5767_v20  ;;  %vm1182_vm8 = vcmp.eq.s32.totalorder %v1164_v51, %v5901_v9 }
 0x1c9   : > { %4483 = vmatprep.subr.mxu0 %v3743_v54  ;;  %4540 = vmatpush3.msra.mxu1 %v3743_v54 }
 0x1ca   : > { %4484 = vmatpush3.msra.mxu0 %v3743_v54  ;;  %4541 = vmatprep.subr.mxu1 %v5572_v18  ;;  %vm1183_vm9 = vcmp.eq.s32.totalorder %v1165_v52, %v5901_v9 }
 0x1cb   : > { %4485 = vmatprep.subr.mxu0 %v3742_v55  ;;  %4542 = vmatpush3.msra.mxu1 %v3742_v55 }
 0x1cc   : > { %4486 = vmatpush3.msra.mxu0 %v3742_v55  ;;  %4543 = vmatprep.subr.mxu1 %v5572_v18  ;;  %v5955_v55 = vsel %vm1180_vm6, 1.0, %v5572_v18 }
 0x1cd   : > { %4487 = vmatprep.subr.mxu0 %v3739_v57  ;;  %4544 = vmatpush3.msra.mxu1 %v3739_v57 }
 0x1ce   : > { %4488 = vmatpush3.msra.mxu0 %v3739_v57  ;;  %4545 = vmatprep.subr.mxu1 %v5572_v18  ;;  %v1166_v57 = vadd.s32 72, %v5767_v20 }
 0x1cf   : > { %4489 = vmatprep.subr.mxu0 %v3738_v58  ;;  %4546 = vmatpush3.msra.mxu1 %v3738_v58 }
 0x1d0   : > { %4490 = vmatpush3.msra.mxu0 %v3738_v58  ;;  %4547 = vmatprep.subr.mxu1 %v5572_v18  ;;  %v1167_v58 = vadd.s32 80, %v5767_v20  ;;  %vm1184_vm10 = vcmp.eq.s32.totalorder %v1166_v57, %v5901_v9 }
 0x1d1   : > { %4491 = vmatprep.subr.mxu0 %v3735_v60  ;;  %4548 = vmatpush3.msra.mxu1 %v3735_v60 }
 0x1d2   : > { %4492 = vmatpush3.msra.mxu0 %v3735_v60  ;;  %4549 = vmatprep.subr.mxu1 %v5572_v18  ;;  %vm1185_vm11 = vcmp.eq.s32.totalorder %v1167_v58, %v5901_v9 }
 0x1d3   : > { %4493 = vmatprep.subr.mxu0 %v3734_v61  ;;  %4550 = vmatpush3.msra.mxu1 %v3734_v61 }
 0x1d4   : > { %4494 = vmatpush3.msra.mxu0 %v3734_v61  ;;  %4574 = vmatprep.subr.mxu1 %v5572_v18  ;;  %v5973_v61 = vsel %vm1182_vm8, 1.0, %v5572_v18 }
 0x273   : > { %v1291_v62 = vpop.f32.mrf.mxu0  ;;  %v1362_v63 = vpop.f32.mrf.mxu1 }
 0x274   : > { %v1295_v0 = vmul.f32 0.0078125, %v1291_v62  ;;  %v1366_v1 = vmul.f32 0.0078125, %v1362_v63  ;;  %v5977_v62 = vsel %vm1183_vm9, 1.0, %v5572_v18  ;;  %v1168_v63 = vadd.s32 88, %v5767_v20 }
 0x275   : > { %v4427_v2 = vpop.f32.mrf.mxu0  ;;  %v4462_v3 = vpop.f32.mrf.mxu1 }
 0x276   : > { %v1367_v4 = vmul.f32 %v1295_v0, %v1295_v0  ;;  %v5991_v3 = vsel %vm1184_vm10, 1.0, %v5572_v18  ;;  %vm1186_vm12 = vcmp.eq.s32.totalorder %v1168_v63, %v5901_v9 }
 0x277   : > { %v6009_v10 = vsel %vm1186_vm12, 1.0, %v5572_v18 }
 0x278   : > { %v1368_v5 = vsub.f32 %v1366_v1, %v1367_v4  ;;  %v5995_v4 = vsel %vm1185_vm11, 1.0, %v5572_v18 }
 0x27a   : > { %v1369_v6 = vmax.f32 %v1368_v5, 0.0  ;;  %v1170_v5 = vadd.s32 104, %v5767_v20 }
 0x27c   : > { %v1372_v7 = vadd.f32 1e-05, %v1369_v6  ;;  %v1171_v6 = vadd.s32 112, %v5767_v20  ;;  %vm1188_vm14 = vcmp.eq.s32.totalorder %v1170_v5, %v5901_v9 }
 0x27d   : > { %v6026_v15 = vsel %vm1188_vm14, 1.0, %v5572_v18 }
 0x27e   : > { %5341 = vrsqrt.f32 %v1372_v7  ;;  %vm1189_vm15 = vcmp.eq.s32.totalorder %v1171_v6, %v5901_v9 }
 0x28b   : > { %v5342_v14 = vpop.eup %5341 }
 0x28c   : > { %v1374_v36 = vmul.f32 %v5342_v14, %v1371_v11 }
 0x28e   : > { %v5921_v40 = vrot.slane %v1374_v36, %v5773_v24  ;;  %v1377_v41 = vmul.f32 %v1374_v36, %v1295_v0  ;;  %v1169_v0 = vadd.s32 96, %v5767_v20  ;;  %v6030_v20 = vsel %vm1189_vm15, 1.0, %v5572_v18 }
 0x290   : > { %v1419_v45 = vmul.f32 %v5915_v38, %v5921_v40  ;;  %v1378_v46 = vsub.f32 %v1376_v17, %v1377_v41  ;;  %v1420_v47 = vmul.f32 %v5918_v39, %v5921_v40  ;;  %v1421_v48 = vmul.f32 %v5924_v42, %v5921_v40  ;;  %v5339_v41 = vld [vmem:[#allocation12] sm:$0xff]  }
 0x291   : > { %v1422_v53 = vmul.f32 %v5937_v49, %v5921_v40  ;;  %v1423_v54 = vmul.f32 %v5940_v50, %v5921_v40  ;;  %v1424_v59 = vmul.f32 %v5955_v55, %v5921_v40  ;;  %v1425_v60 = vmul.f32 %v5959_v56, %v5921_v40 }
 0x292   : > { %4495 = vmatprep.mubr.f32.mxu0 %v1419_v45  ;;  %4552 = vmatmul.mubr.f32.vlgmr.msra.gmra.mxu1 %v1378_v46  ;;  %v1426_v1 = vmul.f32 %v5973_v61, %v5921_v40  ;;  %v1427_v2 = vmul.f32 %v5977_v62, %v5921_v40  ;;  %vm1187_vm13 = vcmp.eq.s32.totalorder %v1169_v0, %v5901_v9 }
 0x293   : > { %4496 = vmatmul.mubr.f32.vlgmr.msra.gmra.mxu0 %v1420_v47  ;;  %4575 = vmatpush3.msra.mxu1 %v5778_v16  ;;  %v1428_v7 = vmul.f32 %v5991_v3, %v5921_v40  ;;  %v1429_v8 = vmul.f32 %v5995_v4, %v5921_v40  ;;  %v6013_v11 = vsel %vm1187_vm13, 1.0, %v5572_v18  ;;  %v1430_v13 = vmul.f32 %v6009_v10, %v5921_v40 }
 0x294   : > { %4498 = vmatprep.mubr.f32.mxu0 %v1421_v48  ;;  %4576 = vmatprep.subr.mxu1 %v5572_v18  ;;  %v1431_v14 = vmul.f32 %v6013_v11, %v5921_v40  ;;  %v1432_v36 = vmul.f32 %v6026_v15, %v5921_v40  ;;  %v1433_v17 = vmul.f32 %v6030_v20, %v5921_v40 }
 0x295   : > { %4606 = vmatprep.mubr.msk.f32.mxu1 %vm5573_vm0, %v5572_v18  ;;  %4577 = vmatpush3.msra.mxu1 %v5782_v19  ;;  %v1434_v9 = vmul.f32 %v6041_v37, %v5921_v40 }
 0x296   : > { %4578 = vmatprep.subr.mxu1 %v5572_v18 }
 0x297   : > { %4499 = vmatmul.mubr.f32.gmra.mxu0 %v1422_v53  ;;  %4579 = vmatpush3.msra.mxu1 %v5788_v21 }
 0x298   : > { %4501 = vmatprep.mubr.f32.mxu0 %v1423_v54  ;;  %4580 = vmatprep.subr.mxu1 %v5572_v18 }
 0x299   : > { %4581 = vmatpush3.msra.mxu1 %v5794_v22 }
 0x29a   : > { %4582 = vmatprep.subr.mxu1 %v5572_v18 }
 0x29b   : > { %4502 = vmatmul.mubr.f32.gmra.mxu0 %v1424_v59  ;;  %4583 = vmatpush3.msra.mxu1 %v5800_v23 }
 0x29c   : > { %4504 = vmatprep.mubr.f32.mxu0 %v1425_v60  ;;  %4584 = vmatprep.subr.mxu1 %v5572_v18 }
 0x29d   : > { %4585 = vmatpush3.msra.mxu1 %v5806_v25 }
 0x29e   : > { %4586 = vmatprep.subr.mxu1 %v5572_v18 }
 0x29f   : > { %4505 = vmatmul.mubr.f32.gmra.mxu0 %v1426_v1  ;;  %4587 = vmatpush3.msra.mxu1 %v5812_v26 }
 0x2a0   : > { %4507 = vmatprep.mubr.f32.mxu0 %v1427_v2  ;;  %4588 = vmatprep.subr.mxu1 %v5572_v18 }
 0x2a1   : > { %4589 = vmatpush3.msra.mxu1 %v5818_v27 }
 0x2a2   : > { %4590 = vmatprep.subr.mxu1 %v5572_v18 }
 0x2a3   : > { %4508 = vmatmul.mubr.f32.gmra.mxu0 %v1428_v7  ;;  %4591 = vmatpush3.msra.mxu1 %v5824_v28 }
 0x2a4   : > { %4510 = vmatprep.mubr.f32.mxu0 %v1429_v8  ;;  %4592 = vmatprep.subr.mxu1 %v5572_v18 }
 0x2a5   : > { %4593 = vmatpush3.msra.mxu1 %v5830_v29 }
 0x2a6   : > { %4594 = vmatprep.subr.mxu1 %v5572_v18 }
 0x2a7   : > { %4511 = vmatmul.mubr.f32.gmra.mxu0 %v1430_v13  ;;  %4595 = vmatpush3.msra.mxu1 %v5836_v30 }
 0x2a8   : > { %4513 = vmatprep.mubr.f32.mxu0 %v1431_v14  ;;  %4596 = vmatprep.subr.mxu1 %v5572_v18 }
 0x2a9   : > { %4597 = vmatpush3.msra.mxu1 %v5842_v31 }
 0x2aa   : > { %4598 = vmatprep.subr.mxu1 %v5572_v18 }
 0x2ab   : > { %4514 = vmatmul.mubr.f32.gmra.mxu0 %v1432_v36  ;;  %4599 = vmatpush3.msra.mxu1 %v5848_v32  ;;  %v5340_v36 = vld [vmem:[#allocation12 + $0x8] sm:$0xff]  }
 0x2ac   : > { %4516 = vmatprep.mubr.f32.mxu0 %v1433_v17  ;;  %4600 = vmatprep.subr.mxu1 %v5572_v18 }
 0x2ad   : > { %4601 = vmatpush3.msra.mxu1 %v5854_v33 }
 0x2ae   : > { %4602 = vmatprep.subr.mxu1 %v5572_v18 }
 0x2af   : > { %4517 = vmatmul.mubr.f32.gmra.mxu0 %v1434_v9  ;;  %4603 = vmatpush3.msra.mxu1 %v5860_v34 }
 0x2b0   : > { %4604 = vmatprep.subr.mxu1 %v5572_v18  ;;  %4570 = vmatprep.mubr.bf16.mxu0 %v5339_v41 }
 0x2b1   : > { %4605 = vmatpush3.msra.mxu1 %v5866_v35 }
 0x352   : > { %v6054_v43 = vpop.f32.mrf.mxu1 }
 0x353   : > { %v4497_v44 = vpop.f32.mrf.mxu0 }
 0x354   : > { %v4553_v45 = vpop.f32.mrf.mxu1 }
 0x355   : > { %v1501_v40 = vpop.f32.mrf.mxu0 }
 0x356   : > { %v1580_v14 = vpack.c.bf16 %v4497_v44, %v1501_v40 }
 0x357   : > { %v4500_v46 = vpop.f32.mrf.mxu0 }
 0x359   : > { %v1511_v47 = vpop.f32.mrf.mxu0 }
 0x35a   : > { %v1581_v13 = vpack.c.bf16 %v4500_v46, %v1511_v47 }
 0x35b   : > { %v4503_v48 = vpop.f32.mrf.mxu0 }
 0x35d   : > { %v1521_v51 = vpop.f32.mrf.mxu0 }
 0x35e   : > { %v1582_v12 = vpack.c.bf16 %v4503_v48, %v1521_v51 }
 0x35f   : > { %v4506_v52 = vpop.f32.mrf.mxu0 }
 0x361   : > { %v1531_v53 = vpop.f32.mrf.mxu0 }
 0x362   : > { %v1583_v8 = vpack.c.bf16 %v4506_v52, %v1531_v53 }
 0x363   : > { %v4509_v54 = vpop.f32.mrf.mxu0 }
 0x365   : > { %v1541_v57 = vpop.f32.mrf.mxu0 }
 0x366   : > { %v1584_v7 = vpack.c.bf16 %v4509_v54, %v1541_v57 }
 0x367   : > { %v4512_v58 = vpop.f32.mrf.mxu0 }
 0x369   : > { %v1551_v59 = vpop.f32.mrf.mxu0 }
 0x36a   : > { %v1585_v6 = vpack.c.bf16 %v4512_v58, %v1551_v59 }
 0x36b   : > { %v4515_v60 = vpop.f32.mrf.mxu0 }
 0x36d   : > { %v1561_v63 = vpop.f32.mrf.mxu0 }
 0x36e   : > { %v1586_v5 = vpack.c.bf16 %v4515_v60, %v1561_v63 }
 0x36f   : > { %v4518_v0 = vpop.f32.mrf.mxu0 }
 0x371   : > { %v1571_v1 = vpop.f32.mrf.mxu0 }
 0x372   : > { %v1587_v2 = vpack.c.bf16 %v4518_v0, %v1571_v1 }
 0x374   : > { %4554 = vmatprep.subr.bf16.mxu0 %v1587_v2 }
 0x375   : > { %4555 = vmatpush3.bf16.msra.mxu0 %v1587_v2 }
 0x376   : > { %4556 = vmatprep.subr.bf16.mxu0 %v1586_v5 }
 0x379   : > { %4557 = vmatpush3.bf16.msra.mxu0 %v1586_v5 }
 0x37a   : > { %4558 = vmatprep.subr.bf16.mxu0 %v1585_v6 }
 0x37d   : > { %4559 = vmatpush3.bf16.msra.mxu0 %v1585_v6 }
 0x37e   : > { %4560 = vmatprep.subr.bf16.mxu0 %v1584_v7 }
 0x381   : > { %4561 = vmatpush3.bf16.msra.mxu0 %v1584_v7 }
 0x382   : > { %4562 = vmatprep.subr.bf16.mxu0 %v1583_v8 }
 0x385   : > { %4563 = vmatpush3.bf16.msra.mxu0 %v1583_v8 }
 0x386   : > { %4564 = vmatprep.subr.bf16.mxu0 %v1582_v12 }
 0x389   : > { %4565 = vmatpush3.bf16.msra.mxu0 %v1582_v12 }
 0x38a   : > { %4566 = vmatprep.subr.bf16.mxu0 %v1581_v13 }
 0x38d   : > { %4567 = vmatpush3.bf16.msra.mxu0 %v1581_v13 }
 0x38e   : > { %4568 = vmatprep.subr.bf16.mxu0 %v1580_v14 }
 0x391   : > { %4569 = vmatpush3.bf16.msra.mxu0 %v1580_v14  ;;  %v3883_v14 = vld [vmem:[#allocation9 + $0x78] sm:$0xff]  }
 0x392   : > { %4609 = vmatprep.subr.mxu0 %v5572_v18 }
 0x394   : > { %4571 = vmatmul.mubr.bf16.vlgmr.msra.gmra.mxu0 %v5340_v36  ;;  %v3795_v36 = vunpack.c.h.bf16 %v3883_v14 }
 0x395   : > { %4610 = vmatpush3.msra.mxu0 %v5778_v16  ;;  %4641 = vmatprep.mubr.msk.f32.mxu0 %vm5573_vm0, %v5572_v18  ;;  %v1588_v16 = vld [vmem:[%s6610_s4] sm:$0x1] }
 0x396   : > { %4611 = vmatprep.subr.mxu0 %v5572_v18  ;;  %4644 = vmatprep.subr.mxu1 %v3795_v36 }
 0x397   : > { %4612 = vmatpush3.msra.mxu0 %v5782_v19  ;;  %v1589_v19 = vunpack.c.l.bf16 %v1588_v16  ;;  %v3794_v16 = vunpack.c.l.bf16 %v3883_v14 }
 0x398   : > { %4613 = vmatprep.subr.mxu0 %v5572_v18 }
 0x399   : > { %4614 = vmatpush3.msra.mxu0 %v5788_v21  ;;  %v1657_v21 = vadd.f32 %v6054_v43, %v1589_v19  ;;  %v3882_v19 = vld [vmem:[#allocation9 + $0x70] sm:$0xff]  }
 0x39a   : > { %4615 = vmatprep.subr.mxu0 %v5572_v18 }
 0x39b   : > { %4616 = vmatpush3.msra.mxu0 %v5794_v22 }
 0x39c   : > { %4617 = vmatprep.subr.mxu0 %v5572_v18 }
 0x39d   : > { %4618 = vmatpush3.msra.mxu0 %v5800_v23  ;;  %v1663_v23 = vrot.slane %v1657_v21, %v5773_v24  ;;  %v3791_v21 = vunpack.c.h.bf16 %v3882_v19 }
 0x39e   : > { %4619 = vmatprep.subr.mxu0 %v5572_v18 }
 0x39f   : > { %4620 = vmatpush3.msra.mxu0 %v5806_v25 }
 0x3a0   : > { %4621 = vmatprep.subr.mxu0 %v5572_v18 }
 0x3a1   : > { %4622 = vmatpush3.msra.mxu0 %v5812_v26 }
 0x3a2   : > { %4623 = vmatprep.subr.mxu0 %v5572_v18 }
 0x3a3   : > { %4624 = vmatpush3.msra.mxu0 %v5818_v27 }
 0x3a4   : > { %4625 = vmatprep.subr.mxu0 %v5572_v18 }
 0x3a5   : > { %4626 = vmatpush3.msra.mxu0 %v5824_v28 }
 0x3a6   : > { %4627 = vmatprep.subr.mxu0 %v5572_v18 }
 0x3a7   : > { %4628 = vmatpush3.msra.mxu0 %v5830_v29 }
 0x3a8   : > { %4629 = vmatprep.subr.mxu0 %v5572_v18 }
 0x3a9   : > { %4630 = vmatpush3.msra.mxu0 %v5836_v30 }
 0x3aa   : > { %4631 = vmatprep.subr.mxu0 %v5572_v18 }
 0x3ab   : > { %4632 = vmatpush3.msra.mxu0 %v5842_v31 }
 0x3ac   : > { %4633 = vmatprep.subr.mxu0 %v5572_v18 }
 0x3ad   : > { %4634 = vmatpush3.msra.mxu0 %v5848_v32 }
 0x3ae   : > { %4635 = vmatprep.subr.mxu0 %v5572_v18 }
 0x3af   : > { %4636 = vmatpush3.msra.mxu0 %v5854_v33 }
 0x3b0   : > { %4637 = vmatprep.subr.mxu0 %v5572_v18 }
 0x3b1   : > { %4638 = vmatpush3.msra.mxu0 %v5860_v34 }
 0x3b2   : > { %4639 = vmatprep.subr.mxu0 %v5572_v18 }
 0x3b3   : > { %4640 = vmatpush3.msra.mxu0 %v5866_v35 }
 0x3b4   : > { %4700 = vmatprep.subr.mxu0 %v5572_v18 }
 0x454   : > { %v4572_v22 = vpop.f32.mrf.mxu0 }
 0x455   : > { %v1719_v26 = vadd.f32 %v4572_v22, %v1663_v23  ;;  %v3790_v22 = vunpack.c.l.bf16 %v3882_v19 }
 0x456   : > { %v1710_v25 = vpop.f32.mrf.mxu0 }
 0x457   : > { %v1711_v28 = vadd.f32 %v1710_v25, %v1663_v23  ;;  %v1727_v31 = vmax.f32 %v1719_v26, 0.0 }
 0x458   : > { %v4573_v27 = vpop.f32.mrf.mxu0 }
 0x459   : > { %v1722_v29 = vadd.f32 %v4573_v27, %v1663_v23  ;;  %v1725_v34 = vmax.f32 %v1711_v28, 0.0  ;;  %v3880_v27 = vld [vmem:[#allocation9 + $0x60] sm:$0xff]  }
 0x45a   : > { %v1713_v30 = vpop.f32.mrf.mxu0  ;;  %v3783_v28 = vunpack.c.h.bf16 %v3880_v27 }
 0x45b   : > { %v1728_v32 = vmax.f32 %v1722_v29, 0.0  ;;  %v1714_v33 = vadd.f32 %v1713_v30, %v1663_v23  ;;  %v3881_v23 = vld [vmem:[#allocation9 + $0x68] sm:$0xff]   ;;  %v3782_v29 = vunpack.c.l.bf16 %v3880_v27  ;;  %v3879_v30 = vld [vmem:[#allocation9 + $0x58] sm:$0xff]   ;;  %v6159_v27 = vld [vmem:[#allocation10 + $0x60] sm:$0xff] }
 0x45c   : > { %v3787_v25 = vunpack.c.h.bf16 %v3881_v23  ;;  %v3786_v26 = vunpack.c.l.bf16 %v3881_v23  ;;  %v6151_v23 = vld [vmem:[#allocation10 + $0x68] sm:$0xff] }
 0x45d   : > { %v6096_v35 = vpack.c.bf16 %v1728_v32, %v1727_v31  ;;  %v1726_v17 = vmax.f32 %v1714_v33, 0.0  ;;  %v3779_v31 = vunpack.c.h.bf16 %v3879_v30  ;;  %v3778_v32 = vunpack.c.l.bf16 %v3879_v30  ;;  %v3878_v33 = vld [vmem:[#allocation9 + $0x50] sm:$0xff]  }
 0x45f   : > { %v6098_v9 = vpack.c.bf16 %v1726_v17, %v1725_v34  ;;  %v1733_v41 = vunpack.c.l.bf16 %v6096_v35  ;;  %v1734_v45 = vunpack.c.h.bf16 %v6096_v35  ;;  %v3775_v34 = vunpack.c.h.bf16 %v3878_v33 }
 0x460   : > { %v3774_v17 = vunpack.c.l.bf16 %v3878_v33 }
 0x461   : > { %v1731_v43 = vunpack.c.l.bf16 %v6098_v9  ;;  %v1732_v44 = vunpack.c.h.bf16 %v6098_v9  ;;  %v1746_v48 = vmul.f32 %v1733_v41, %v1733_v41  ;;  %v1747_v53 = vmul.f32 %v1734_v45, %v1734_v45 }
 0x463   : > { %v1735_v40 = vadd.f32 %v1732_v44, %v1731_v43  ;;  %v1744_v46 = vmul.f32 %v1731_v43, %v1731_v43  ;;  %v1745_v47 = vmul.f32 %v1732_v44, %v1732_v44 }
 0x465   : > { %v1736_v51 = vadd.f32 %v1735_v40, %v1733_v41  ;;  %v1748_v52 = vadd.f32 %v1745_v47, %v1744_v46  ;;  %v3877_v41 = vld [vmem:[#allocation9 + $0x48] sm:$0xff]  }
 0x466   : > { %v3771_v43 = vunpack.c.h.bf16 %v3877_v41  ;;  %v3770_v44 = vunpack.c.l.bf16 %v3877_v41  ;;  %v6187_v41 = vld [vmem:[#allocation10 + $0x38] sm:$0xff] }
 0x467   : > { %v1749_v54 = vadd.f32 %v1748_v52, %v1746_v48  ;;  %v1737_v57 = vadd.f32 %v1736_v51, %v1734_v45  ;;  %v3765_v45 = vld [vmem:[#allocation9 + $0x40] sm:$0xff]  }
 0x468   : > { %v3767_v40 = vunpack.c.h.bf16 %v3765_v45  ;;  %v3766_v46 = vunpack.c.l.bf16 %v3765_v45  ;;  %v6195_v45 = vld [vmem:[#allocation10 + $0x30] sm:$0xff] }
 0x469   : > { %v1738_v58 = vrot.slane %v1737_v57, 4  ;;  %v1750_v59 = vadd.f32 %v1749_v54, %v1747_v53 }
 0x46b   : > { %v1739_v60 = vadd.f32 %v1738_v58, %v1737_v57  ;;  %v1751_v63 = vrot.slane %v1750_v59, 4 }
 0x46d   : > { %v1740_v0 = vrot.slane %v1739_v60, 2  ;;  %v1752_v1 = vadd.f32 %v1751_v63, %v1750_v59  ;;  %v3700_v63 = vld [vmem:[%s6611_s5 + $0x1] sm:$0x1] }
 0x46f   : > { %v1741_v2 = vadd.f32 %v1740_v0, %v1739_v60  ;;  %v1753_v5 = vrot.slane %v1752_v1, 2  ;;  %v1904_v0 = vunpack.c.l.bf16 %v3700_v63 }
 0x471   : > { %v1742_v6 = vrot.slane %v1741_v2, 1  ;;  %v1754_v7 = vadd.f32 %v1753_v5, %v1752_v1  ;;  %v3701_v1 = vld [vmem:[%s6612_s6 + $0x1] sm:$0x1] }
 0x473   : > { %v1743_v8 = vadd.f32 %v1742_v6, %v1741_v2  ;;  %v1755_v12 = vrot.slane %v1754_v7, 1  ;;  %v1910_v6 = vunpack.c.l.bf16 %v3701_v1 }
 0x475   : > { %4607 = vmatmul.mubr.f32.vlgmr.msra.gmra.mxu1 %v1743_v8  ;;  %v1756_v13 = vadd.f32 %v1755_v12, %v1754_v7 }
 0x476   : > { %4645 = vmatpush3.msra.mxu1 %v3795_v36 }
 0x477   : > { %4642 = vmatmul.mubr.f32.vlgmr.msra.gmra.mxu0 %v1756_v13  ;;  %4646 = vmatprep.subr.mxu1 %v3794_v16 }
 0x478   : > { %4732 = vmatprep.mubr.msk.f32.mxu0 %vm5573_vm0, %v5572_v18  ;;  %4701 = vmatpush3.msra.mxu0 %v3795_v36 }
 0x479   : > { %4702 = vmatprep.subr.mxu0 %v5572_v18  ;;  %4647 = vmatpush3.msra.mxu1 %v3794_v16 }
 0x47a   : > { %4703 = vmatpush3.msra.mxu0 %v3794_v16  ;;  %4648 = vmatprep.subr.mxu1 %v3791_v21  ;;  %v6137_v16 = vld [vmem:[#allocation10 + $0x78] sm:$0xff] }
 0x47b   : > { %4704 = vmatprep.subr.mxu0 %v5572_v18  ;;  %4649 = vmatpush3.msra.mxu1 %v3791_v21 }
 0x47c   : > { %4705 = vmatpush3.msra.mxu0 %v3791_v21  ;;  %4650 = vmatprep.subr.mxu1 %v3790_v22 }
 0x47d   : > { %4706 = vmatprep.subr.mxu0 %v5572_v18  ;;  %4651 = vmatpush3.msra.mxu1 %v3790_v22 }
 0x47e   : > { %4707 = vmatpush3.msra.mxu0 %v3790_v22  ;;  %4652 = vmatprep.subr.mxu1 %v3787_v25  ;;  %v6147_v22 = vld [vmem:[#allocation10 + $0x70] sm:$0xff] }
 0x47f   : > { %4708 = vmatprep.subr.mxu0 %v5572_v18  ;;  %4653 = vmatpush3.msra.mxu1 %v3787_v25 }
 0x480   : > { %4709 = vmatpush3.msra.mxu0 %v3787_v25  ;;  %4654 = vmatprep.subr.mxu1 %v3786_v26 }
 0x481   : > { %4710 = vmatprep.subr.mxu0 %v5572_v18  ;;  %4655 = vmatpush3.msra.mxu1 %v3786_v26 }
 0x482   : > { %4711 = vmatpush3.msra.mxu0 %v3786_v26  ;;  %4656 = vmatprep.subr.mxu1 %v3783_v28 }
 0x483   : > { %4712 = vmatprep.subr.mxu0 %v5572_v18  ;;  %4657 = vmatpush3.msra.mxu1 %v3783_v28 }
 0x484   : > { %4713 = vmatpush3.msra.mxu0 %v3783_v28  ;;  %4658 = vmatprep.subr.mxu1 %v3782_v29  ;;  %v6163_v28 = vld [vmem:[#allocation10 + $0x58] sm:$0xff] }
 0x485   : > { %4714 = vmatprep.subr.mxu0 %v5572_v18  ;;  %4659 = vmatpush3.msra.mxu1 %v3782_v29 }
 0x486   : > { %4715 = vmatpush3.msra.mxu0 %v3782_v29  ;;  %4660 = vmatprep.subr.mxu1 %v3779_v31 }
 0x487   : > { %4716 = vmatprep.subr.mxu0 %v5572_v18  ;;  %4661 = vmatpush3.msra.mxu1 %v3779_v31 }
 0x488   : > { %4717 = vmatpush3.msra.mxu0 %v3779_v31  ;;  %4662 = vmatprep.subr.mxu1 %v3778_v32  ;;  %v6171_v31 = vld [vmem:[#allocation10 + $0x50] sm:$0xff] }
 0x489   : > { %4718 = vmatprep.subr.mxu0 %v5572_v18  ;;  %4663 = vmatpush3.msra.mxu1 %v3778_v32 }
 0x48a   : > { %4719 = vmatpush3.msra.mxu0 %v3778_v32  ;;  %4664 = vmatprep.subr.mxu1 %v3775_v34  ;;  %v6175_v32 = vld [vmem:[#allocation10 + $0x48] sm:$0xff] }
 0x48b   : > { %4720 = vmatprep.subr.mxu0 %v5572_v18  ;;  %4665 = vmatpush3.msra.mxu1 %v3775_v34 }
 0x48c   : > { %4721 = vmatpush3.msra.mxu0 %v3775_v34  ;;  %4666 = vmatprep.subr.mxu1 %v3774_v17 }
 0x48d   : > { %4722 = vmatprep.subr.mxu0 %v5572_v18  ;;  %4667 = vmatpush3.msra.mxu1 %v3774_v17 }
 0x48e   : > { %4723 = vmatpush3.msra.mxu0 %v3774_v17  ;;  %4668 = vmatprep.subr.mxu1 %v3771_v43  ;;  %v6183_v17 = vld [vmem:[#allocation10 + $0x40] sm:$0xff] }
 0x48f   : > { %4724 = vmatprep.subr.mxu0 %v5572_v18  ;;  %4669 = vmatpush3.msra.mxu1 %v3771_v43 }
 0x490   : > { %4725 = vmatpush3.msra.mxu0 %v3771_v43  ;;  %4670 = vmatprep.subr.mxu1 %v3770_v44 }
 0x491   : > { %4726 = vmatprep.subr.mxu0 %v5572_v18  ;;  %4671 = vmatpush3.msra.mxu1 %v3770_v44 }
 0x492   : > { %4727 = vmatpush3.msra.mxu0 %v3770_v44  ;;  %4672 = vmatprep.subr.mxu1 %v3767_v40 }
 0x493   : > { %4728 = vmatprep.subr.mxu0 %v5572_v18  ;;  %4673 = vmatpush3.msra.mxu1 %v3767_v40 }
 0x494   : > { %4729 = vmatpush3.msra.mxu0 %v3767_v40  ;;  %4674 = vmatprep.subr.mxu1 %v3766_v46  ;;  %v6199_v40 = vld [vmem:[#allocation10 + $0x28] sm:$0xff] }
 0x495   : > { %4730 = vmatprep.subr.mxu0 %v5572_v18  ;;  %4675 = vmatpush3.msra.mxu1 %v3766_v46 }
 0x496   : > { %4731 = vmatpush3.msra.mxu0 %v3766_v46 }
 0x497   : > { %4755 = vmatprep.subr.mxu0 %v5572_v18 }
 0x535   : > { %v1823_v47 = vpop.f32.mrf.mxu1 }
 0x536   : > { %v1827_v48 = vmul.f32 0.0078125, %v1823_v47 }
 0x537   : > { %v4608_v51 = vpop.f32.mrf.mxu1  ;;  %v1894_v52 = vpop.f32.mrf.mxu0 }
 0x538   : > { %v1899_v53 = vmul.f32 %v1827_v48, %v1827_v48  ;;  %v1898_v54 = vmul.f32 0.0078125, %v1894_v52  ;;  %v6211_v51 = vld [vmem:[#allocation10 + $0x18] sm:$0xff] }
 0x539   : > { %v4643_v57 = vpop.f32.mrf.mxu0 }
 0x53a   : > { %v1900_v58 = vsub.f32 %v1898_v54, %v1899_v53  ;;  %v6217_v53 = vld [vmem:[#allocation10 + $0x10] sm:$0xff]  ;;  %v6222_v54 = vld [vmem:[#allocation10 + $0x8] sm:$0xff]  ;;  %v6226_v57 = vld [vmem:[#allocation10] sm:$0xff] }
 0x53c   : > { %v1901_v59 = vmax.f32 %v1900_v58, 0.0 }
 0x53e   : > { %v1905_v60 = vadd.f32 1e-05, %v1901_v59 }
 0x540   : > { %5343 = vrsqrt.f32 %v1905_v60 }
 0x54d   : > { %v5344_v2 = vpop.eup %5343 }
 0x54e   : > { %v1907_v5 = vmul.f32 %v5344_v2, %v1904_v0 }
 0x550   : > { %v6129_v7 = vrot.slane %v1907_v5, %v5773_v24  ;;  %v1911_v8 = vmul.f32 %v1907_v5, %v1827_v48  ;;  %v6207_v48 = vld [vmem:[#allocation10 + $0x20] sm:$0xff] }
 0x552   : > { %v1950_v12 = vmul.f32 %v5915_v38, %v6129_v7  ;;  %v1912_v13 = vsub.f32 %v1910_v6, %v1911_v8  ;;  %v1951_v14 = vmul.f32 %v5918_v39, %v6129_v7  ;;  %v1952_v36 = vmul.f32 %v5924_v42, %v6129_v7 }
 0x553   : > { %v1953_v19 = vmul.f32 %v5937_v49, %v6129_v7  ;;  %v1954_v21 = vmul.f32 %v5940_v50, %v6129_v7  ;;  %v1955_v25 = vmul.f32 %v5955_v55, %v6129_v7  ;;  %v1956_v26 = vmul.f32 %v5959_v56, %v6129_v7 }
 0x554   : > { %4676 = vmatprep.mubr.f32.mxu1 %v1950_v12  ;;  %4733 = vmatmul.mubr.f32.vlgmr.msra.gmra.mxu0 %v1912_v13  ;;  %v1957_v29 = vmul.f32 %v5973_v61, %v6129_v7  ;;  %v1958_v30 = vmul.f32 %v5977_v62, %v6129_v7  ;;  %v1959_v33 = vmul.f32 %v5991_v3, %v6129_v7 }
 0x555   : > { %4677 = vmatmul.mubr.f32.vlgmr.msra.gmra.mxu1 %v1951_v14  ;;  %4756 = vmatpush3.msra.mxu0 %v6137_v16  ;;  %v1960_v34 = vmul.f32 %v5995_v4, %v6129_v7  ;;  %v1961_v43 = vmul.f32 %v6009_v10, %v6129_v7  ;;  %v1962_v44 = vmul.f32 %v6013_v11, %v6129_v7 }
 0x556   : > { %4679 = vmatprep.mubr.f32.mxu1 %v1952_v36  ;;  %4757 = vmatprep.subr.mxu0 %v5572_v18  ;;  %v1963_v46 = vmul.f32 %v6026_v15, %v6129_v7  ;;  %v1964_v47 = vmul.f32 %v6030_v20, %v6129_v7  ;;  %v1965_v52 = vmul.f32 %v6041_v37, %v6129_v7 }
 0x557   : > { %4787 = vmatprep.mubr.msk.f32.mxu0 %vm5573_vm0, %v5572_v18  ;;  %4758 = vmatpush3.msra.mxu0 %v6147_v22 }
 0x558   : > { %4759 = vmatprep.subr.mxu0 %v5572_v18 }
 0x559   : > { %4680 = vmatmul.mubr.f32.gmra.mxu1 %v1953_v19  ;;  %4760 = vmatpush3.msra.mxu0 %v6151_v23 }
 0x55a   : > { %4682 = vmatprep.mubr.f32.mxu1 %v1954_v21  ;;  %4761 = vmatprep.subr.mxu0 %v5572_v18 }
 0x55b   : > { %4762 = vmatpush3.msra.mxu0 %v6159_v27 }
 0x55c   : > { %4763 = vmatprep.subr.mxu0 %v5572_v18 }
 0x55d   : > { %4683 = vmatmul.mubr.f32.gmra.mxu1 %v1955_v25  ;;  %4764 = vmatpush3.msra.mxu0 %v6163_v28 }
 0x55e   : > { %4685 = vmatprep.mubr.f32.mxu1 %v1956_v26  ;;  %4765 = vmatprep.subr.mxu0 %v5572_v18 }
 0x55f   : > { %4766 = vmatpush3.msra.mxu0 %v6171_v31 }
 0x560   : > { %4767 = vmatprep.subr.mxu0 %v5572_v18 }
 0x561   : > { %4686 = vmatmul.mubr.f32.gmra.mxu1 %v1957_v29  ;;  %4768 = vmatpush3.msra.mxu0 %v6175_v32 }
 0x562   : > { %4688 = vmatprep.mubr.f32.mxu1 %v1958_v30  ;;  %4769 = vmatprep.subr.mxu0 %v5572_v18 }
 0x563   : > { %4770 = vmatpush3.msra.mxu0 %v6183_v17 }
 0x564   : > { %4771 = vmatprep.subr.mxu0 %v5572_v18 }
 0x565   : > { %4689 = vmatmul.mubr.f32.gmra.mxu1 %v1959_v33  ;;  %4772 = vmatpush3.msra.mxu0 %v6187_v41 }
 0x566   : > { %4691 = vmatprep.mubr.f32.mxu1 %v1960_v34  ;;  %4773 = vmatprep.subr.mxu0 %v5572_v18 }
 0x567   : > { %4774 = vmatpush3.msra.mxu0 %v6195_v45 }
 0x568   : > { %4775 = vmatprep.subr.mxu0 %v5572_v18 }
 0x569   : > { %4692 = vmatmul.mubr.f32.gmra.mxu1 %v1961_v43  ;;  %4776 = vmatpush3.msra.mxu0 %v6199_v40 }
 0x56a   : > { %4694 = vmatprep.mubr.f32.mxu1 %v1962_v44  ;;  %4777 = vmatprep.subr.mxu0 %v5572_v18 }
 0x56b   : > { %4778 = vmatpush3.msra.mxu0 %v6207_v48 }
 0x56c   : > { %4779 = vmatprep.subr.mxu0 %v5572_v18 }
 0x56d   : > { %4695 = vmatmul.mubr.f32.gmra.mxu1 %v1963_v46  ;;  %4780 = vmatpush3.msra.mxu0 %v6211_v51 }
 0x56e   : > { %4697 = vmatprep.mubr.f32.mxu1 %v1964_v47  ;;  %4781 = vmatprep.subr.mxu0 %v5572_v18 }
 0x56f   : > { %4782 = vmatpush3.msra.mxu0 %v6217_v53 }
 0x570   : > { %4783 = vmatprep.subr.mxu0 %v5572_v18 }
 0x571   : > { %4698 = vmatmul.mubr.f32.gmra.mxu1 %v1965_v52  ;;  %4784 = vmatpush3.msra.mxu0 %v6222_v54 }
 0x572   : > { %4751 = vmatprep.mubr.bf16.mxu1 %v6098_v9  ;;  %4785 = vmatprep.subr.mxu0 %v5572_v18 }
 0x573   : > { %4786 = vmatpush3.msra.mxu0 %v6226_v57 }
 0x614   : > { %v6229_v58 = vpop.f32.mrf.mxu0 }
 0x615   : > { %v4678_v59 = vpop.f32.mrf.mxu1 }
 0x616   : > { %v4734_v60 = vpop.f32.mrf.mxu0 }
 0x617   : > { %v2032_v63 = vpop.f32.mrf.mxu1 }
 0x618   : > { %v2111_v44 = vpack.c.bf16 %v4678_v59, %v2032_v63 }
 0x619   : > { %v4681_v0 = vpop.f32.mrf.mxu1 }
 0x61b   : > { %v2042_v1 = vpop.f32.mrf.mxu1 }
 0x61c   : > { %v2112_v43 = vpack.c.bf16 %v4681_v0, %v2042_v1 }
 0x61d   : > { %v4684_v2 = vpop.f32.mrf.mxu1 }
 0x61f   : > { %v2052_v5 = vpop.f32.mrf.mxu1 }
 0x620   : > { %v2113_v34 = vpack.c.bf16 %v4684_v2, %v2052_v5 }
 0x621   : > { %v4687_v9 = vpop.f32.mrf.mxu1 }
 0x623   : > { %v2062_v6 = vpop.f32.mrf.mxu1 }
 0x624   : > { %v2114_v33 = vpack.c.bf16 %v4687_v9, %v2062_v6 }
 0x625   : > { %v4690_v7 = vpop.f32.mrf.mxu1 }
 0x627   : > { %v2072_v8 = vpop.f32.mrf.mxu1 }
 0x628   : > { %v2115_v30 = vpack.c.bf16 %v4690_v7, %v2072_v8 }
 0x629   : > { %v4693_v12 = vpop.f32.mrf.mxu1 }
 0x62b   : > { %v2082_v13 = vpop.f32.mrf.mxu1 }
 0x62c   : > { %v2116_v29 = vpack.c.bf16 %v4693_v12, %v2082_v13 }
 0x62d   : > { %v4696_v14 = vpop.f32.mrf.mxu1 }
 0x62f   : > { %v2092_v36 = vpop.f32.mrf.mxu1 }
 0x630   : > { %v2117_v26 = vpack.c.bf16 %v4696_v14, %v2092_v36 }
 0x631   : > { %v4699_v19 = vpop.f32.mrf.mxu1 }
 0x633   : > { %v2102_v21 = vpop.f32.mrf.mxu1 }
 0x634   : > { %v2118_v25 = vpack.c.bf16 %v4699_v19, %v2102_v21 }
 0x636   : > { %4735 = vmatprep.subr.bf16.mxu1 %v2118_v25 }
 0x637   : > { %4736 = vmatpush3.bf16.msra.mxu1 %v2118_v25 }
 0x638   : > { %4737 = vmatprep.subr.bf16.mxu1 %v2117_v26 }
 0x63b   : > { %4738 = vmatpush3.bf16.msra.mxu1 %v2117_v26 }
 0x63c   : > { %4739 = vmatprep.subr.bf16.mxu1 %v2116_v29 }
 0x63f   : > { %4740 = vmatpush3.bf16.msra.mxu1 %v2116_v29 }
 0x640   : > { %4741 = vmatprep.subr.bf16.mxu1 %v2115_v30 }
 0x643   : > { %4742 = vmatpush3.bf16.msra.mxu1 %v2115_v30 }
 0x644   : > { %4743 = vmatprep.subr.bf16.mxu1 %v2114_v33 }
 0x647   : > { %4744 = vmatpush3.bf16.msra.mxu1 %v2114_v33 }
 0x648   : > { %4745 = vmatprep.subr.bf16.mxu1 %v2113_v34 }
 0x64b   : > { %4746 = vmatpush3.bf16.msra.mxu1 %v2113_v34 }
 0x64c   : > { %4747 = vmatprep.subr.bf16.mxu1 %v2112_v43 }
 0x64f   : > { %4748 = vmatpush3.bf16.msra.mxu1 %v2112_v43 }
 0x650   : > { %4749 = vmatprep.subr.bf16.mxu1 %v2111_v44 }
 0x653   : > { %4750 = vmatpush3.bf16.msra.mxu1 %v2111_v44 }
 0x654   : > { %4790 = vmatprep.subr.mxu1 %v5572_v18 }
 0x656   : > { %4752 = vmatmul.mubr.bf16.vlgmr.msra.gmra.mxu1 %v6096_v35  ;;  %v3702_v35 = vld [vmem:[%s6610_s4 + $0x1] sm:$0x1] }
 0x657   : > { %4791 = vmatpush3.msra.mxu1 %v6137_v16  ;;  %4822 = vmatprep.mubr.msk.f32.mxu1 %vm5573_vm0, %v5572_v18  ;;  %v2121_v46 = vunpack.c.l.bf16 %v3702_v35 }
 0x658   : > { %4792 = vmatprep.subr.mxu1 %v5572_v18 }
 0x659   : > { %4793 = vmatpush3.msra.mxu1 %v6147_v22  ;;  %v2189_v47 = vadd.f32 %v6229_v58, %v2121_v46 }
 0x65a   : > { %4794 = vmatprep.subr.mxu1 %v5572_v18 }
 0x65b   : > { %4795 = vmatpush3.msra.mxu1 %v6151_v23  ;;  %v2195_v59 = vrot.slane %v2189_v47, %v5773_v24 }
 0x65c   : > { %4796 = vmatprep.subr.mxu1 %v5572_v18 }
 0x65d   : > { %4797 = vmatpush3.msra.mxu1 %v6159_v27 }
 0x65e   : > { %4798 = vmatprep.subr.mxu1 %v5572_v18 }
 0x65f   : > { %4799 = vmatpush3.msra.mxu1 %v6163_v28 }
 0x660   : > { %4800 = vmatprep.subr.mxu1 %v5572_v18 }
 0x661   : > { %4801 = vmatpush3.msra.mxu1 %v6171_v31 }
 0x662   : > { %4802 = vmatprep.subr.mxu1 %v5572_v18 }
 0x663   : > { %4803 = vmatpush3.msra.mxu1 %v6175_v32 }
 0x664   : > { %4804 = vmatprep.subr.mxu1 %v5572_v18 }
 0x665   : > { %4805 = vmatpush3.msra.mxu1 %v6183_v17 }
 0x666   : > { %4806 = vmatprep.subr.mxu1 %v5572_v18 }
 0x667   : > { %4807 = vmatpush3.msra.mxu1 %v6187_v41 }
 0x668   : > { %4808 = vmatprep.subr.mxu1 %v5572_v18 }
 0x669   : > { %4809 = vmatpush3.msra.mxu1 %v6195_v45 }
 0x66a   : > { %4810 = vmatprep.subr.mxu1 %v5572_v18 }
 0x66b   : > { %4811 = vmatpush3.msra.mxu1 %v6199_v40 }
 0x66c   : > { %4812 = vmatprep.subr.mxu1 %v5572_v18 }
 0x66d   : > { %4813 = vmatpush3.msra.mxu1 %v6207_v48 }
 0x66e   : > { %4814 = vmatprep.subr.mxu1 %v5572_v18 }
 0x66f   : > { %4815 = vmatpush3.msra.mxu1 %v6211_v51 }
 0x670   : > { %4816 = vmatprep.subr.mxu1 %v5572_v18 }
 0x671   : > { %4817 = vmatpush3.msra.mxu1 %v6217_v53 }
 0x672   : > { %4818 = vmatprep.subr.mxu1 %v5572_v18 }
 0x673   : > { %4819 = vmatpush3.msra.mxu1 %v6222_v54 }
 0x674   : > { %4820 = vmatprep.subr.mxu1 %v5572_v18 }
 0x675   : > { %4821 = vmatpush3.msra.mxu1 %v6226_v57 }
 0x676   : > { %4881 = vmatprep.subr.mxu1 %v5572_v18 }
 0x716   : > { %v4753_v52 = vpop.f32.mrf.mxu1 }
 0x717   : > { %v2239_v63 = vadd.f32 %v4753_v52, %v2195_v59 }
 0x718   : > { %v2230_v60 = vpop.f32.mrf.mxu1 }
 0x719   : > { %v2231_v1 = vadd.f32 %v2230_v60, %v2195_v59  ;;  %v2247_v9 = vmax.f32 %v2239_v63, 0.0 }
 0x71a   : > { %v4754_v0 = vpop.f32.mrf.mxu1 }
 0x71b   : > { %v2242_v2 = vadd.f32 %v4754_v0, %v2195_v59  ;;  %v2245_v8 = vmax.f32 %v2231_v1, 0.0 }
 0x71c   : > { %v2233_v5 = vpop.f32.mrf.mxu1 }
 0x71d   : > { %v2248_v6 = vmax.f32 %v2242_v2, 0.0  ;;  %v2234_v7 = vadd.f32 %v2233_v5, %v2195_v59 }
 0x71f   : > { %v6272_v12 = vpack.c.bf16 %v2248_v6, %v2247_v9  ;;  %v2246_v13 = vmax.f32 %v2234_v7, 0.0 }
 0x721   : > { %v6274_v14 = vpack.c.bf16 %v2246_v13, %v2245_v8  ;;  %v2253_v58 = vunpack.c.l.bf16 %v6272_v12  ;;  %v2254_v21 = vunpack.c.h.bf16 %v6272_v12  ;;  %v3890_v8 = vld [vmem:[#allocation9 + $0xb8] sm:$0xff]  }
 0x722   : > { %v3827_v13 = vunpack.c.h.bf16 %v3890_v8 }
 0x723   : > { %v2251_v36 = vunpack.c.l.bf16 %v6274_v14  ;;  %v2252_v19 = vunpack.c.h.bf16 %v6274_v14  ;;  %v2266_v30 = vmul.f32 %v2253_v58, %v2253_v58  ;;  %v2267_v43 = vmul.f32 %v2254_v21, %v2254_v21 }
 0x724   : > { %4825 = vmatprep.subr.mxu0 %v3827_v13 }
 0x725   : > { %v2255_v25 = vadd.f32 %v2252_v19, %v2251_v36  ;;  %v2264_v26 = vmul.f32 %v2251_v36, %v2251_v36  ;;  %v2265_v29 = vmul.f32 %v2252_v19, %v2252_v19  ;;  %v3889_v36 = vld [vmem:[#allocation9 + $0xb0] sm:$0xff]  }
 0x726   : > { %v3823_v19 = vunpack.c.h.bf16 %v3889_v36 }
 0x727   : > { %v2256_v33 = vadd.f32 %v2255_v25, %v2253_v58  ;;  %v2268_v34 = vadd.f32 %v2265_v29, %v2264_v26  ;;  %v3826_v58 = vunpack.c.l.bf16 %v3890_v8  ;;  %v3888_v25 = vld [vmem:[#allocation9 + $0xa8] sm:$0xff]  }
 0x728   : > { %v3819_v26 = vunpack.c.h.bf16 %v3888_v25  ;;  %v3818_v29 = vunpack.c.l.bf16 %v3888_v25  ;;  %v3703_v25 = vld [vmem:[%s6611_s5 + $0x2] sm:$0x1] }
 0x729   : > { %v2269_v44 = vadd.f32 %v2268_v34, %v2266_v30  ;;  %v2257_v35 = vadd.f32 %v2256_v33, %v2254_v21  ;;  %v3822_v21 = vunpack.c.l.bf16 %v3889_v36  ;;  %v3887_v30 = vld [vmem:[#allocation9 + $0xa0] sm:$0xff]  }
 0x72a   : > { %v3815_v33 = vunpack.c.h.bf16 %v3887_v30  ;;  %v3814_v34 = vunpack.c.l.bf16 %v3887_v30 }
 0x72b   : > { %v2258_v46 = vrot.slane %v2257_v35, 4  ;;  %v2270_v47 = vadd.f32 %v2269_v44, %v2267_v43  ;;  %v3886_v43 = vld [vmem:[#allocation9 + $0x98] sm:$0xff]  }
 0x72c   : > { %v3811_v44 = vunpack.c.h.bf16 %v3886_v43 }
 0x72d   : > { %v2259_v52 = vadd.f32 %v2258_v46, %v2257_v35  ;;  %v2271_v59 = vrot.slane %v2270_v47, 4  ;;  %v3810_v35 = vunpack.c.l.bf16 %v3886_v43  ;;  %v3885_v46 = vld [vmem:[#allocation9 + $0x90] sm:$0xff]  }
 0x72f   : > { %v2260_v60 = vrot.slane %v2259_v52, 2  ;;  %v2272_v63 = vadd.f32 %v2271_v59, %v2270_v47  ;;  %v3807_v47 = vunpack.c.h.bf16 %v3885_v46  ;;  %v3884_v59 = vld [vmem:[#allocation9 + $0x88] sm:$0xff]  }
 0x731   : > { %v2261_v0 = vadd.f32 %v2260_v60, %v2259_v52  ;;  %v2273_v1 = vrot.slane %v2272_v63, 2  ;;  %v3806_v52 = vunpack.c.l.bf16 %v3885_v46  ;;  %v3803_v60 = vunpack.c.h.bf16 %v3884_v59 }
 0x733   : > { %v2262_v2 = vrot.slane %v2261_v0, 1  ;;  %v2274_v5 = vadd.f32 %v2273_v1, %v2272_v63  ;;  %v3802_v63 = vunpack.c.l.bf16 %v3884_v59 }
 0x735   : > { %v2263_v9 = vadd.f32 %v2262_v2, %v2261_v0  ;;  %v2275_v6 = vrot.slane %v2274_v5, 1  ;;  %v3797_v0 = vld [vmem:[#allocation9 + $0x80] sm:$0xff]  }
 0x736   : > { %v3799_v1 = vunpack.c.h.bf16 %v3797_v0  ;;  %v3798_v2 = vunpack.c.l.bf16 %v3797_v0 }
 0x737   : > { %4788 = vmatmul.mubr.f32.vlgmr.msra.gmra.mxu0 %v2263_v9  ;;  %v2276_v7 = vadd.f32 %v2275_v6, %v2274_v5 }
 0x738   : > { %4826 = vmatpush3.msra.mxu0 %v3827_v13 }
 0x739   : > { %4823 = vmatmul.mubr.f32.vlgmr.msra.gmra.mxu1 %v2276_v7  ;;  %4827 = vmatprep.subr.mxu0 %v3826_v58 }
 0x73a   : > { %4913 = vmatprep.mubr.msk.f32.mxu1 %vm5573_vm0, %v5572_v18  ;;  %4882 = vmatpush3.msra.mxu1 %v3827_v13 }
 0x73b   : > { %4883 = vmatprep.subr.mxu1 %v5572_v18  ;;  %4828 = vmatpush3.msra.mxu0 %v3826_v58 }
 0x73c   : > { %4884 = vmatpush3.msra.mxu1 %v3826_v58  ;;  %4829 = vmatprep.subr.mxu0 %v3823_v19 }
 0x73d   : > { %4885 = vmatprep.subr.mxu1 %v5572_v18  ;;  %4830 = vmatpush3.msra.mxu0 %v3823_v19 }
 0x73e   : > { %4886 = vmatpush3.msra.mxu1 %v3823_v19  ;;  %4831 = vmatprep.subr.mxu0 %v3822_v21 }
 0x73f   : > { %4887 = vmatprep.subr.mxu1 %v5572_v18  ;;  %4832 = vmatpush3.msra.mxu0 %v3822_v21 }
 0x740   : > { %4888 = vmatpush3.msra.mxu1 %v3822_v21  ;;  %4833 = vmatprep.subr.mxu0 %v3819_v26 }
 0x741   : > { %4889 = vmatprep.subr.mxu1 %v5572_v18  ;;  %4834 = vmatpush3.msra.mxu0 %v3819_v26 }
 0x742   : > { %4890 = vmatpush3.msra.mxu1 %v3819_v26  ;;  %4835 = vmatprep.subr.mxu0 %v3818_v29  ;;  %v2424_v26 = vunpack.c.l.bf16 %v3703_v25 }
 0x743   : > { %4891 = vmatprep.subr.mxu1 %v5572_v18  ;;  %4836 = vmatpush3.msra.mxu0 %v3818_v29 }
 0x744   : > { %4892 = vmatpush3.msra.mxu1 %v3818_v29  ;;  %4837 = vmatprep.subr.mxu0 %v3815_v33  ;;  %v3704_v29 = vld [vmem:[%s6612_s6 + $0x2] sm:$0x1] }
 0x745   : > { %4893 = vmatprep.subr.mxu1 %v5572_v18  ;;  %4838 = vmatpush3.msra.mxu0 %v3815_v33 }
 0x746   : > { %4894 = vmatpush3.msra.mxu1 %v3815_v33  ;;  %4839 = vmatprep.subr.mxu0 %v3814_v34 }
 0x747   : > { %4895 = vmatprep.subr.mxu1 %v5572_v18  ;;  %4840 = vmatpush3.msra.mxu0 %v3814_v34 }
 0x748   : > { %4896 = vmatpush3.msra.mxu1 %v3814_v34  ;;  %4841 = vmatprep.subr.mxu0 %v3811_v44  ;;  %v2430_v34 = vunpack.c.l.bf16 %v3704_v29 }
 0x749   : > { %4897 = vmatprep.subr.mxu1 %v5572_v18  ;;  %4842 = vmatpush3.msra.mxu0 %v3811_v44 }
 0x74a   : > { %4898 = vmatpush3.msra.mxu1 %v3811_v44  ;;  %4843 = vmatprep.subr.mxu0 %v3810_v35 }
 0x74b   : > { %4899 = vmatprep.subr.mxu1 %v5572_v18  ;;  %4844 = vmatpush3.msra.mxu0 %v3810_v35 }
 0x74c   : > { %4900 = vmatpush3.msra.mxu1 %v3810_v35  ;;  %4845 = vmatprep.subr.mxu0 %v3807_v47 }
 0x74d   : > { %4901 = vmatprep.subr.mxu1 %v5572_v18  ;;  %4846 = vmatpush3.msra.mxu0 %v3807_v47 }
 0x74e   : > { %4902 = vmatpush3.msra.mxu1 %v3807_v47  ;;  %4847 = vmatprep.subr.mxu0 %v3806_v52 }
 0x74f   : > { %4903 = vmatprep.subr.mxu1 %v5572_v18  ;;  %4848 = vmatpush3.msra.mxu0 %v3806_v52 }
 0x750   : > { %4904 = vmatpush3.msra.mxu1 %v3806_v52  ;;  %4849 = vmatprep.subr.mxu0 %v3803_v60 }
 0x751   : > { %4905 = vmatprep.subr.mxu1 %v5572_v18  ;;  %4850 = vmatpush3.msra.mxu0 %v3803_v60 }
 0x752   : > { %4906 = vmatpush3.msra.mxu1 %v3803_v60  ;;  %4851 = vmatprep.subr.mxu0 %v3802_v63 }
 0x753   : > { %4907 = vmatprep.subr.mxu1 %v5572_v18  ;;  %4852 = vmatpush3.msra.mxu0 %v3802_v63 }
 0x754   : > { %4908 = vmatpush3.msra.mxu1 %v3802_v63  ;;  %4853 = vmatprep.subr.mxu0 %v3799_v1 }
 0x755   : > { %4909 = vmatprep.subr.mxu1 %v5572_v18  ;;  %4854 = vmatpush3.msra.mxu0 %v3799_v1 }
 0x756   : > { %4910 = vmatpush3.msra.mxu1 %v3799_v1  ;;  %4855 = vmatprep.subr.mxu0 %v3798_v2 }
 0x757   : > { %4911 = vmatprep.subr.mxu1 %v5572_v18  ;;  %4856 = vmatpush3.msra.mxu0 %v3798_v2 }
 0x758   : > { %4912 = vmatpush3.msra.mxu1 %v3798_v2 }
 0x759   : > { %4936 = vmatprep.subr.mxu1 %v5572_v18 }
 0x7f7   : > { %v2343_v5 = vpop.f32.mrf.mxu0 }
 0x7f8   : > { %v2347_v9 = vmul.f32 0.0078125, %v2343_v5 }
 0x7f9   : > { %v4789_v6 = vpop.f32.mrf.mxu0  ;;  %v2414_v7 = vpop.f32.mrf.mxu1 }
 0x7fa   : > { %v2419_v8 = vmul.f32 %v2347_v9, %v2347_v9  ;;  %v2418_v13 = vmul.f32 0.0078125, %v2414_v7 }
 0x7fb   : > { %v4824_v58 = vpop.f32.mrf.mxu1 }
 0x7fc   : > { %v2420_v36 = vsub.f32 %v2418_v13, %v2419_v8 }
 0x7fe   : > { %v2421_v19 = vmax.f32 %v2420_v36, 0.0 }
 0x800   : > { %v2425_v21 = vadd.f32 1e-05, %v2421_v19 }
 0x802   : > { %5345 = vrsqrt.f32 %v2425_v21 }
 0x80f   : > { %v5346_v30 = vpop.eup %5345 }
 0x810   : > { %v2427_v33 = vmul.f32 %v5346_v30, %v2424_v26 }
 0x812   : > { %v2469_v43 = vrot.slane %v2427_v33, %v5773_v24  ;;  %v2431_v44 = vmul.f32 %v2427_v33, %v2347_v9 }
 0x814   : > { %v2470_v35 = vmul.f32 %v5915_v38, %v2469_v43  ;;  %v2432_v46 = vsub.f32 %v2430_v34, %v2431_v44  ;;  %v2471_v47 = vmul.f32 %v5918_v39, %v2469_v43  ;;  %v2472_v52 = vmul.f32 %v5924_v42, %v2469_v43 }
 0x815   : > { %v2473_v59 = vmul.f32 %v5937_v49, %v2469_v43  ;;  %v2474_v60 = vmul.f32 %v5940_v50, %v2469_v43  ;;  %v2475_v63 = vmul.f32 %v5955_v55, %v2469_v43  ;;  %v2476_v0 = vmul.f32 %v5959_v56, %v2469_v43 }
 0x816   : > { %4857 = vmatprep.mubr.f32.mxu0 %v2470_v35  ;;  %4914 = vmatmul.mubr.f32.vlgmr.msra.gmra.mxu1 %v2432_v46  ;;  %v2477_v1 = vmul.f32 %v5973_v61, %v2469_v43  ;;  %v2478_v2 = vmul.f32 %v5977_v62, %v2469_v43  ;;  %v2479_v5 = vmul.f32 %v5991_v3, %v2469_v43 }
 0x817   : > { %4858 = vmatmul.mubr.f32.vlgmr.msra.gmra.mxu0 %v2471_v47  ;;  %4937 = vmatpush3.msra.mxu1 %v6137_v16  ;;  %v2480_v9 = vmul.f32 %v5995_v4, %v2469_v43  ;;  %v2481_v6 = vmul.f32 %v6009_v10, %v2469_v43  ;;  %v2482_v7 = vmul.f32 %v6013_v11, %v2469_v43 }
 0x818   : > { %4860 = vmatprep.mubr.f32.mxu0 %v2472_v52  ;;  %4938 = vmatprep.subr.mxu1 %v5572_v18  ;;  %v2483_v8 = vmul.f32 %v6026_v15, %v2469_v43  ;;  %v2484_v13 = vmul.f32 %v6030_v20, %v2469_v43  ;;  %v2485_v58 = vmul.f32 %v6041_v37, %v2469_v43 }
 0x819   : > { %4968 = vmatprep.mubr.msk.f32.mxu1 %vm5573_vm0, %v5572_v18  ;;  %4939 = vmatpush3.msra.mxu1 %v6147_v22 }
 0x81a   : > { %4940 = vmatprep.subr.mxu1 %v5572_v18 }
 0x81b   : > { %4861 = vmatmul.mubr.f32.gmra.mxu0 %v2473_v59  ;;  %4941 = vmatpush3.msra.mxu1 %v6151_v23 }
 0x81c   : > { %4863 = vmatprep.mubr.f32.mxu0 %v2474_v60  ;;  %4942 = vmatprep.subr.mxu1 %v5572_v18 }
 0x81d   : > { %4943 = vmatpush3.msra.mxu1 %v6159_v27 }
 0x81e   : > { %4944 = vmatprep.subr.mxu1 %v5572_v18 }
 0x81f   : > { %4864 = vmatmul.mubr.f32.gmra.mxu0 %v2475_v63  ;;  %4945 = vmatpush3.msra.mxu1 %v6163_v28 }
 0x820   : > { %4866 = vmatprep.mubr.f32.mxu0 %v2476_v0  ;;  %4946 = vmatprep.subr.mxu1 %v5572_v18 }
 0x821   : > { %4947 = vmatpush3.msra.mxu1 %v6171_v31 }
 0x822   : > { %4948 = vmatprep.subr.mxu1 %v5572_v18 }
 0x823   : > { %4867 = vmatmul.mubr.f32.gmra.mxu0 %v2477_v1  ;;  %4949 = vmatpush3.msra.mxu1 %v6175_v32 }
 0x824   : > { %4869 = vmatprep.mubr.f32.mxu0 %v2478_v2  ;;  %4950 = vmatprep.subr.mxu1 %v5572_v18 }
 0x825   : > { %4951 = vmatpush3.msra.mxu1 %v6183_v17 }
 0x826   : > { %4952 = vmatprep.subr.mxu1 %v5572_v18 }
 0x827   : > { %4870 = vmatmul.mubr.f32.gmra.mxu0 %v2479_v5  ;;  %4953 = vmatpush3.msra.mxu1 %v6187_v41 }
 0x828   : > { %4872 = vmatprep.mubr.f32.mxu0 %v2480_v9  ;;  %4954 = vmatprep.subr.mxu1 %v5572_v18 }
 0x829   : > { %4955 = vmatpush3.msra.mxu1 %v6195_v45 }
 0x82a   : > { %4956 = vmatprep.subr.mxu1 %v5572_v18 }
 0x82b   : > { %4873 = vmatmul.mubr.f32.gmra.mxu0 %v2481_v6  ;;  %4957 = vmatpush3.msra.mxu1 %v6199_v40 }
 0x82c   : > { %4875 = vmatprep.mubr.f32.mxu0 %v2482_v7  ;;  %4958 = vmatprep.subr.mxu1 %v5572_v18 }
 0x82d   : > { %4959 = vmatpush3.msra.mxu1 %v6207_v48 }
 0x82e   : > { %4960 = vmatprep.subr.mxu1 %v5572_v18 }
 0x82f   : > { %4876 = vmatmul.mubr.f32.gmra.mxu0 %v2483_v8  ;;  %4961 = vmatpush3.msra.mxu1 %v6211_v51 }
 0x830   : > { %4878 = vmatprep.mubr.f32.mxu0 %v2484_v13  ;;  %4962 = vmatprep.subr.mxu1 %v5572_v18 }
 0x831   : > { %4963 = vmatpush3.msra.mxu1 %v6217_v53 }
 0x832   : > { %4964 = vmatprep.subr.mxu1 %v5572_v18 }
 0x833   : > { %4879 = vmatmul.mubr.f32.gmra.mxu0 %v2485_v58  ;;  %4965 = vmatpush3.msra.mxu1 %v6222_v54 }
 0x834   : > { %4932 = vmatprep.mubr.bf16.mxu0 %v6274_v14  ;;  %4966 = vmatprep.subr.mxu1 %v5572_v18 }
 0x835   : > { %4967 = vmatpush3.msra.mxu1 %v6226_v57 }
 0x8d6   : > { %v6355_v36 = vpop.f32.mrf.mxu1 }
 0x8d7   : > { %v4859_v19 = vpop.f32.mrf.mxu0 }
 0x8d8   : > { %v4915_v21 = vpop.f32.mrf.mxu1 }
 0x8d9   : > { %v2552_v25 = vpop.f32.mrf.mxu0 }
 0x8da   : > { %v2631_v7 = vpack.c.bf16 %v4859_v19, %v2552_v25 }
 0x8db   : > { %v4862_v26 = vpop.f32.mrf.mxu0 }
 0x8dd   : > { %v2562_v29 = vpop.f32.mrf.mxu0 }
 0x8de   : > { %v2632_v6 = vpack.c.bf16 %v4862_v26, %v2562_v29 }
 0x8df   : > { %v4865_v30 = vpop.f32.mrf.mxu0 }
 0x8e1   : > { %v2572_v33 = vpop.f32.mrf.mxu0 }
 0x8e2   : > { %v2633_v9 = vpack.c.bf16 %v4865_v30, %v2572_v33 }
 0x8e3   : > { %v4868_v34 = vpop.f32.mrf.mxu0 }
 0x8e5   : > { %v2582_v43 = vpop.f32.mrf.mxu0 }
 0x8e6   : > { %v2634_v5 = vpack.c.bf16 %v4868_v34, %v2582_v43 }
 0x8e7   : > { %v4871_v44 = vpop.f32.mrf.mxu0 }
 0x8e9   : > { %v2592_v35 = vpop.f32.mrf.mxu0 }
 0x8ea   : > { %v2635_v2 = vpack.c.bf16 %v4871_v44, %v2592_v35 }
 0x8eb   : > { %v4874_v14 = vpop.f32.mrf.mxu0 }
 0x8ed   : > { %v2602_v46 = vpop.f32.mrf.mxu0 }
 0x8ee   : > { %v2636_v1 = vpack.c.bf16 %v4874_v14, %v2602_v46 }
 0x8ef   : > { %v4877_v47 = vpop.f32.mrf.mxu0 }
 0x8f1   : > { %v2612_v52 = vpop.f32.mrf.mxu0 }
 0x8f2   : > { %v2637_v0 = vpack.c.bf16 %v4877_v47, %v2612_v52 }
 0x8f3   : > { %v4880_v59 = vpop.f32.mrf.mxu0 }
 0x8f5   : > { %v2622_v60 = vpop.f32.mrf.mxu0 }
 0x8f6   : > { %v2638_v63 = vpack.c.bf16 %v4880_v59, %v2622_v60 }
 0x8f8   : > { %4916 = vmatprep.subr.bf16.mxu0 %v2638_v63 }
 0x8f9   : > { %4917 = vmatpush3.bf16.msra.mxu0 %v2638_v63 }
 0x8fa   : > { %4918 = vmatprep.subr.bf16.mxu0 %v2637_v0 }
 0x8fd   : > { %4919 = vmatpush3.bf16.msra.mxu0 %v2637_v0 }
 0x8fe   : > { %4920 = vmatprep.subr.bf16.mxu0 %v2636_v1 }
 0x901   : > { %4921 = vmatpush3.bf16.msra.mxu0 %v2636_v1 }
 0x902   : > { %4922 = vmatprep.subr.bf16.mxu0 %v2635_v2 }
 0x905   : > { %4923 = vmatpush3.bf16.msra.mxu0 %v2635_v2 }
 0x906   : > { %4924 = vmatprep.subr.bf16.mxu0 %v2634_v5 }
 0x909   : > { %4925 = vmatpush3.bf16.msra.mxu0 %v2634_v5 }
 0x90a   : > { %4926 = vmatprep.subr.bf16.mxu0 %v2633_v9 }
 0x90d   : > { %4927 = vmatpush3.bf16.msra.mxu0 %v2633_v9 }
 0x90e   : > { %4928 = vmatprep.subr.bf16.mxu0 %v2632_v6 }
 0x911   : > { %4929 = vmatpush3.bf16.msra.mxu0 %v2632_v6  ;;  %v3897_v6 = vld [vmem:[#allocation9 + $0xf8] sm:$0xff]  }
 0x912   : > { %4930 = vmatprep.subr.bf16.mxu0 %v2631_v7 }
 0x915   : > { %4931 = vmatpush3.bf16.msra.mxu0 %v2631_v7  ;;  %v3859_v7 = vunpack.c.h.bf16 %v3897_v6 }
 0x916   : > { %4971 = vmatprep.subr.mxu0 %v5572_v18 }
 0x917   : > { %5006 = vmatprep.subr.mxu1 %v3859_v7 }
 0x918   : > { %4933 = vmatmul.mubr.bf16.vlgmr.msra.gmra.mxu0 %v6272_v12 }
 0x919   : > { %4972 = vmatpush3.msra.mxu0 %v6137_v16  ;;  %5003 = vmatprep.mubr.msk.f32.mxu0 %vm5573_vm0, %v5572_v18  ;;  %v3705_v16 = vld [vmem:[%s6610_s4 + $0x2] sm:$0x1] }
 0x91a   : > { %4973 = vmatprep.subr.mxu0 %v5572_v18 }
 0x91b   : > { %4974 = vmatpush3.msra.mxu0 %v6147_v22  ;;  %v2641_v22 = vunpack.c.l.bf16 %v3705_v16  ;;  %v3858_v16 = vunpack.c.l.bf16 %v3897_v6 }
 0x91c   : > { %4975 = vmatprep.subr.mxu0 %v5572_v18 }
 0x91d   : > { %4976 = vmatpush3.msra.mxu0 %v6151_v23  ;;  %v2709_v23 = vadd.f32 %v6355_v36, %v2641_v22  ;;  %v3896_v22 = vld [vmem:[#allocation9 + $0xf0] sm:$0xff]  }
 0x91e   : > { %4977 = vmatprep.subr.mxu0 %v5572_v18 }
 0x91f   : > { %4978 = vmatpush3.msra.mxu0 %v6159_v27 }
 0x920   : > { %4979 = vmatprep.subr.mxu0 %v5572_v18 }
 0x921   : > { %4980 = vmatpush3.msra.mxu0 %v6163_v28  ;;  %v2715_v28 = vrot.slane %v2709_v23, %v5773_v24  ;;  %v3855_v23 = vunpack.c.h.bf16 %v3896_v22 }
 0x922   : > { %4981 = vmatprep.subr.mxu0 %v5572_v18 }
 0x923   : > { %4982 = vmatpush3.msra.mxu0 %v6171_v31 }
 0x924   : > { %4983 = vmatprep.subr.mxu0 %v5572_v18 }
 0x925   : > { %4984 = vmatpush3.msra.mxu0 %v6175_v32 }
 0x926   : > { %4985 = vmatprep.subr.mxu0 %v5572_v18 }
 0x927   : > { %4986 = vmatpush3.msra.mxu0 %v6183_v17 }
 0x928   : > { %4987 = vmatprep.subr.mxu0 %v5572_v18 }
 0x929   : > { %4988 = vmatpush3.msra.mxu0 %v6187_v41 }
 0x92a   : > { %4989 = vmatprep.subr.mxu0 %v5572_v18 }
 0x92b   : > { %4990 = vmatpush3.msra.mxu0 %v6195_v45 }
 0x92c   : > { %4991 = vmatprep.subr.mxu0 %v5572_v18 }
 0x92d   : > { %4992 = vmatpush3.msra.mxu0 %v6199_v40 }
 0x92e   : > { %4993 = vmatprep.subr.mxu0 %v5572_v18 }
 0x92f   : > { %4994 = vmatpush3.msra.mxu0 %v6207_v48 }
 0x930   : > { %4995 = vmatprep.subr.mxu0 %v5572_v18 }
 0x931   : > { %4996 = vmatpush3.msra.mxu0 %v6211_v51 }
 0x932   : > { %4997 = vmatprep.subr.mxu0 %v5572_v18 }
 0x933   : > { %4998 = vmatpush3.msra.mxu0 %v6217_v53 }
 0x934   : > { %4999 = vmatprep.subr.mxu0 %v5572_v18 }
 0x935   : > { %5000 = vmatpush3.msra.mxu0 %v6222_v54 }
 0x936   : > { %5001 = vmatprep.subr.mxu0 %v5572_v18 }
 0x937   : > { %5002 = vmatpush3.msra.mxu0 %v6226_v57 }
 0x938   : > { %5062 = vmatprep.subr.mxu0 %v5572_v18 }
 0x9d8   : > { %v4934_v27 = vpop.f32.mrf.mxu0 }
 0x9d9   : > { %v2759_v32 = vadd.f32 %v4934_v27, %v2715_v28  ;;  %v3854_v27 = vunpack.c.l.bf16 %v3896_v22 }
 0x9da   : > { %v2750_v31 = vpop.f32.mrf.mxu0 }
 0x9db   : > { %v2751_v41 = vadd.f32 %v2750_v31, %v2715_v28  ;;  %v2767_v48 = vmax.f32 %v2759_v32, 0.0 }
 0x9dc   : > { %v4935_v17 = vpop.f32.mrf.mxu0 }
 0x9dd   : > { %v2762_v45 = vadd.f32 %v4935_v17, %v2715_v28  ;;  %v2765_v54 = vmax.f32 %v2751_v41, 0.0  ;;  %v3894_v17 = vld [vmem:[#allocation9 + $0xe0] sm:$0xff]  }
 0x9de   : > { %v2753_v40 = vpop.f32.mrf.mxu0  ;;  %v3847_v41 = vunpack.c.h.bf16 %v3894_v17 }
 0x9df   : > { %v2768_v51 = vmax.f32 %v2762_v45, 0.0  ;;  %v2754_v53 = vadd.f32 %v2753_v40, %v2715_v28  ;;  %v3895_v28 = vld [vmem:[#allocation9 + $0xe8] sm:$0xff]   ;;  %v3846_v45 = vunpack.c.l.bf16 %v3894_v17  ;;  %v3893_v40 = vld [vmem:[#allocation9 + $0xd8] sm:$0xff]  }
 0x9e0   : > { %v3851_v31 = vunpack.c.h.bf16 %v3895_v28  ;;  %v3850_v32 = vunpack.c.l.bf16 %v3895_v28  ;;  %v6473_v28 = vld [vmem:[#allocation10 + $0x50] sm:$0xff]  ;;  %v6489_v17 = vld [vmem:[#allocation10 + $0x38] sm:$0xff] }
 0x9e1   : > { %v6398_v57 = vpack.c.bf16 %v2768_v51, %v2767_v48  ;;  %v2766_v12 = vmax.f32 %v2754_v53, 0.0  ;;  %v3843_v48 = vunpack.c.h.bf16 %v3893_v40  ;;  %v3842_v51 = vunpack.c.l.bf16 %v3893_v40  ;;  %v3892_v53 = vld [vmem:[#allocation9 + $0xd0] sm:$0xff]   ;;  %v6509_v40 = vld [vmem:[#allocation10 + $0x20] sm:$0xff] }
 0x9e3   : > { %v6400_v8 = vpack.c.bf16 %v2766_v12, %v2765_v54  ;;  %v2773_v13 = vunpack.c.l.bf16 %v6398_v57  ;;  %v2774_v19 = vunpack.c.h.bf16 %v6398_v57  ;;  %v3839_v54 = vunpack.c.h.bf16 %v3892_v53 }
 0x9e4   : > { %v3838_v12 = vunpack.c.l.bf16 %v3892_v53  ;;  %v6528_v53 = vld [vmem:[#allocation10] sm:$0xff] }
 0x9e5   : > { %v2771_v58 = vunpack.c.l.bf16 %v6400_v8  ;;  %v2772_v36 = vunpack.c.h.bf16 %v6400_v8  ;;  %v2786_v29 = vmul.f32 %v2773_v13, %v2773_v13  ;;  %v2787_v34 = vmul.f32 %v2774_v19, %v2774_v19 }
 0x9e7   : > { %v2775_v21 = vadd.f32 %v2772_v36, %v2771_v58  ;;  %v2784_v25 = vmul.f32 %v2771_v58, %v2771_v58  ;;  %v2785_v26 = vmul.f32 %v2772_v36, %v2772_v36 }
 0x9e9   : > { %v2776_v30 = vadd.f32 %v2775_v21, %v2773_v13  ;;  %v2788_v33 = vadd.f32 %v2785_v26, %v2784_v25  ;;  %v3891_v13 = vld [vmem:[#allocation9 + $0xc8] sm:$0xff]  }
 0x9ea   : > { %v3835_v58 = vunpack.c.h.bf16 %v3891_v13  ;;  %v3834_v36 = vunpack.c.l.bf16 %v3891_v13 }
 0x9eb   : > { %v2789_v43 = vadd.f32 %v2788_v33, %v2786_v29  ;;  %v2777_v44 = vadd.f32 %v2776_v30, %v2774_v19  ;;  %v3829_v19 = vld [vmem:[#allocation9 + $0xc0] sm:$0xff]  }
 0x9ec   : > { %v3831_v21 = vunpack.c.h.bf16 %v3829_v19  ;;  %v3830_v25 = vunpack.c.l.bf16 %v3829_v19 }
 0x9ed   : > { %v2778_v35 = vrot.slane %v2777_v44, 4  ;;  %v2790_v14 = vadd.f32 %v2789_v43, %v2787_v34 }
 0x9ef   : > { %v2779_v46 = vadd.f32 %v2778_v35, %v2777_v44  ;;  %v2791_v47 = vrot.slane %v2790_v14, 4 }
 0x9f1   : > { %v2780_v52 = vrot.slane %v2779_v46, 2  ;;  %v2792_v59 = vadd.f32 %v2791_v47, %v2790_v14  ;;  %v3706_v47 = vld [vmem:[%s6611_s5 + $0x3] sm:$0x1] }
 0x9f3   : > { %v2781_v60 = vadd.f32 %v2780_v52, %v2779_v46  ;;  %v2793_v63 = vrot.slane %v2792_v59, 2  ;;  %v2944_v52 = vunpack.c.l.bf16 %v3706_v47 }
 0x9f5   : > { %v2782_v0 = vrot.slane %v2781_v60, 1  ;;  %v2794_v1 = vadd.f32 %v2793_v63, %v2792_v59  ;;  %v3707_v59 = vld [vmem:[%s6612_s6 + $0x3] sm:$0x1] }
 0x9f7   : > { %v2783_v2 = vadd.f32 %v2782_v0, %v2781_v60  ;;  %v2795_v5 = vrot.slane %v2794_v1, 1  ;;  %v2950_v0 = vunpack.c.l.bf16 %v3707_v59 }
 0x9f9   : > { %4969 = vmatmul.mubr.f32.vlgmr.msra.gmra.mxu1 %v2783_v2  ;;  %v2796_v9 = vadd.f32 %v2795_v5, %v2794_v1 }
 0x9fa   : > { %5007 = vmatpush3.msra.mxu1 %v3859_v7 }
 0x9fb   : > { %5004 = vmatmul.mubr.f32.vlgmr.msra.gmra.mxu0 %v2796_v9  ;;  %5008 = vmatprep.subr.mxu1 %v3858_v16 }
 0x9fc   : > { %5094 = vmatprep.mubr.msk.f32.mxu0 %vm5573_vm0, %v5572_v18  ;;  %5063 = vmatpush3.msra.mxu0 %v3859_v7 }
 0x9fd   : > { %5064 = vmatprep.subr.mxu0 %v5572_v18  ;;  %5009 = vmatpush3.msra.mxu1 %v3858_v16 }
 0x9fe   : > { %5065 = vmatpush3.msra.mxu0 %v3858_v16  ;;  %5010 = vmatprep.subr.mxu1 %v3855_v23  ;;  %v6439_v16 = vld [vmem:[#allocation10 + $0x78] sm:$0xff] }
 0x9ff   : > { %5066 = vmatprep.subr.mxu0 %v5572_v18  ;;  %5011 = vmatpush3.msra.mxu1 %v3855_v23 }
 0xa00   : > { %5067 = vmatpush3.msra.mxu0 %v3855_v23  ;;  %5012 = vmatprep.subr.mxu1 %v3854_v27  ;;  %v6461_v23 = vld [vmem:[#allocation10 + $0x60] sm:$0xff] }
 0xa01   : > { %5068 = vmatprep.subr.mxu0 %v5572_v18  ;;  %5013 = vmatpush3.msra.mxu1 %v3854_v27 }
 0xa02   : > { %5069 = vmatpush3.msra.mxu0 %v3854_v27  ;;  %5014 = vmatprep.subr.mxu1 %v3851_v31  ;;  %v6465_v27 = vld [vmem:[#allocation10 + $0x58] sm:$0xff] }
 0xa03   : > { %5070 = vmatprep.subr.mxu0 %v5572_v18  ;;  %5015 = vmatpush3.msra.mxu1 %v3851_v31 }
 0xa04   : > { %5071 = vmatpush3.msra.mxu0 %v3851_v31  ;;  %5016 = vmatprep.subr.mxu1 %v3850_v32  ;;  %v6477_v31 = vld [vmem:[#allocation10 + $0x48] sm:$0xff] }
 0xa05   : > { %5072 = vmatprep.subr.mxu0 %v5572_v18  ;;  %5017 = vmatpush3.msra.mxu1 %v3850_v32 }
 0xa06   : > { %5073 = vmatpush3.msra.mxu0 %v3850_v32  ;;  %5018 = vmatprep.subr.mxu1 %v3847_v41  ;;  %v6485_v32 = vld [vmem:[#allocation10 + $0x40] sm:$0xff] }
 0xa07   : > { %5074 = vmatprep.subr.mxu0 %v5572_v18  ;;  %5019 = vmatpush3.msra.mxu1 %v3847_v41 }
 0xa08   : > { %5075 = vmatpush3.msra.mxu0 %v3847_v41  ;;  %5020 = vmatprep.subr.mxu1 %v3846_v45  ;;  %v6497_v41 = vld [vmem:[#allocation10 + $0x30] sm:$0xff] }
 0xa09   : > { %5076 = vmatprep.subr.mxu0 %v5572_v18  ;;  %5021 = vmatpush3.msra.mxu1 %v3846_v45 }
 0xa0a   : > { %5077 = vmatpush3.msra.mxu0 %v3846_v45  ;;  %5022 = vmatprep.subr.mxu1 %v3843_v48  ;;  %v6501_v45 = vld [vmem:[#allocation10 + $0x28] sm:$0xff] }
 0xa0b   : > { %5078 = vmatprep.subr.mxu0 %v5572_v18  ;;  %5023 = vmatpush3.msra.mxu1 %v3843_v48 }
 0xa0c   : > { %5079 = vmatpush3.msra.mxu0 %v3843_v48  ;;  %5024 = vmatprep.subr.mxu1 %v3842_v51  ;;  %v6513_v48 = vld [vmem:[#allocation10 + $0x18] sm:$0xff] }
 0xa0d   : > { %5080 = vmatprep.subr.mxu0 %v5572_v18  ;;  %5025 = vmatpush3.msra.mxu1 %v3842_v51 }
 0xa0e   : > { %5081 = vmatpush3.msra.mxu0 %v3842_v51  ;;  %5026 = vmatprep.subr.mxu1 %v3839_v54  ;;  %v6519_v51 = vld [vmem:[#allocation10 + $0x10] sm:$0xff] }
 0xa0f   : > { %5082 = vmatprep.subr.mxu0 %v5572_v18  ;;  %5027 = vmatpush3.msra.mxu1 %v3839_v54 }
 0xa10   : > { %5083 = vmatpush3.msra.mxu0 %v3839_v54  ;;  %5028 = vmatprep.subr.mxu1 %v3838_v12 }
 0xa11   : > { %5084 = vmatprep.subr.mxu0 %v5572_v18  ;;  %5029 = vmatpush3.msra.mxu1 %v3838_v12 }
 0xa12   : > { %5085 = vmatpush3.msra.mxu0 %v3838_v12  ;;  %5030 = vmatprep.subr.mxu1 %v3835_v58 }
 0xa13   : > { %5086 = vmatprep.subr.mxu0 %v5572_v18  ;;  %5031 = vmatpush3.msra.mxu1 %v3835_v58 }
 0xa14   : > { %5087 = vmatpush3.msra.mxu0 %v3835_v58  ;;  %5032 = vmatprep.subr.mxu1 %v3834_v36 }
 0xa15   : > { %5088 = vmatprep.subr.mxu0 %v5572_v18  ;;  %5033 = vmatpush3.msra.mxu1 %v3834_v36 }
 0xa16   : > { %5089 = vmatpush3.msra.mxu0 %v3834_v36  ;;  %5034 = vmatprep.subr.mxu1 %v3831_v21 }
 0xa17   : > { %5090 = vmatprep.subr.mxu0 %v5572_v18  ;;  %5035 = vmatpush3.msra.mxu1 %v3831_v21 }
 0xa18   : > { %5091 = vmatpush3.msra.mxu0 %v3831_v21  ;;  %5036 = vmatprep.subr.mxu1 %v3830_v25 }
 0xa19   : > { %5092 = vmatprep.subr.mxu0 %v5572_v18  ;;  %5037 = vmatpush3.msra.mxu1 %v3830_v25 }
 0xa1a   : > { %5093 = vmatpush3.msra.mxu0 %v3830_v25 }
 0xa1b   : > { %5117 = vmatprep.subr.mxu0 %v5572_v18 }
 0xab9   : > { %v2863_v26 = vpop.f32.mrf.mxu1 }
 0xaba   : > { %v2867_v29 = vmul.f32 0.0078125, %v2863_v26 }
 0xabb   : > { %v4970_v30 = vpop.f32.mrf.mxu1  ;;  %v2934_v33 = vpop.f32.mrf.mxu0 }
 0xabc   : > { %v2939_v34 = vmul.f32 %v2867_v29, %v2867_v29  ;;  %v2938_v43 = vmul.f32 0.0078125, %v2934_v33 }
 0xabd   : > { %v5005_v44 = vpop.f32.mrf.mxu0 }
 0xabe   : > { %v2940_v35 = vsub.f32 %v2938_v43, %v2939_v34 }
 0xac0   : > { %v2941_v14 = vmax.f32 %v2940_v35, 0.0 }
 0xac2   : > { %v2945_v46 = vadd.f32 1e-05, %v2941_v14 }
 0xac4   : > { %5347 = vrsqrt.f32 %v2945_v46 }
 0xad1   : > { %v5348_v60 = vpop.eup %5347 }
 0xad2   : > { %v2947_v63 = vmul.f32 %v5348_v60, %v2944_v52 }
 0xad4   : > { %v6431_v1 = vrot.slane %v2947_v63, %v5773_v24  ;;  %v2951_v2 = vmul.f32 %v2947_v63, %v2867_v29 }
 0xad6   : > { %v2990_v5 = vmul.f32 %v5915_v38, %v6431_v1  ;;  %v2952_v9 = vsub.f32 %v2950_v0, %v2951_v2  ;;  %v2991_v6 = vmul.f32 %v5918_v39, %v6431_v1  ;;  %v2992_v7 = vmul.f32 %v5924_v42, %v6431_v1  ;;  %v6449_v39 = vld [vmem:[#allocation10 + $0x70] sm:$0xff]  ;;  %v6453_v42 = vld [vmem:[#allocation10 + $0x68] sm:$0xff] }
 0xad7   : > { %v2993_v22 = vmul.f32 %v5937_v49, %v6431_v1  ;;  %v2994_v38 = vmul.f32 %v5940_v50, %v6431_v1  ;;  %v2995_v49 = vmul.f32 %v5955_v55, %v6431_v1  ;;  %v2996_v50 = vmul.f32 %v5959_v56, %v6431_v1 }
 0xad8   : > { %5038 = vmatprep.mubr.f32.mxu1 %v2990_v5  ;;  %5095 = vmatmul.mubr.f32.vlgmr.msra.gmra.mxu0 %v2952_v9  ;;  %v2997_v55 = vmul.f32 %v5973_v61, %v6431_v1  ;;  %v2998_v56 = vmul.f32 %v5977_v62, %v6431_v1  ;;  %v2999_v61 = vmul.f32 %v5991_v3, %v6431_v1 }
 0xad9   : > { %5039 = vmatmul.mubr.f32.vlgmr.msra.gmra.mxu1 %v2991_v6  ;;  %5118 = vmatpush3.msra.mxu0 %v6439_v16  ;;  %v3000_v62 = vmul.f32 %v5995_v4, %v6431_v1  ;;  %v3001_v3 = vmul.f32 %v6009_v10, %v6431_v1  ;;  %v3002_v4 = vmul.f32 %v6013_v11, %v6431_v1 }
 0xada   : > { %5041 = vmatprep.mubr.f32.mxu1 %v2992_v7  ;;  %5119 = vmatprep.subr.mxu0 %v5572_v18  ;;  %v3003_v10 = vmul.f32 %v6026_v15, %v6431_v1  ;;  %v3004_v11 = vmul.f32 %v6030_v20, %v6431_v1  ;;  %v3005_v15 = vmul.f32 %v6041_v37, %v6431_v1  ;;  %v6524_v20 = vld [vmem:[#allocation10 + $0x8] sm:$0xff] }
 0xadb   : > { %5149 = vmatprep.mubr.msk.f32.mxu0 %vm5573_vm0, %v5572_v18  ;;  %5120 = vmatpush3.msra.mxu0 %v6449_v39 }
 0xadc   : > { %5121 = vmatprep.subr.mxu0 %v5572_v18 }
 0xadd   : > { %5042 = vmatmul.mubr.f32.gmra.mxu1 %v2993_v22  ;;  %5122 = vmatpush3.msra.mxu0 %v6453_v42 }
 0xade   : > { %5044 = vmatprep.mubr.f32.mxu1 %v2994_v38  ;;  %5123 = vmatprep.subr.mxu0 %v5572_v18 }
 0xadf   : > { %5124 = vmatpush3.msra.mxu0 %v6461_v23 }
 0xae0   : > { %5125 = vmatprep.subr.mxu0 %v5572_v18 }
 0xae1   : > { %5045 = vmatmul.mubr.f32.gmra.mxu1 %v2995_v49  ;;  %5126 = vmatpush3.msra.mxu0 %v6465_v27 }
 0xae2   : > { %5047 = vmatprep.mubr.f32.mxu1 %v2996_v50  ;;  %5127 = vmatprep.subr.mxu0 %v5572_v18 }
 0xae3   : > { %5128 = vmatpush3.msra.mxu0 %v6473_v28 }
 0xae4   : > { %5129 = vmatprep.subr.mxu0 %v5572_v18 }
 0xae5   : > { %5048 = vmatmul.mubr.f32.gmra.mxu1 %v2997_v55  ;;  %5130 = vmatpush3.msra.mxu0 %v6477_v31 }
 0xae6   : > { %5050 = vmatprep.mubr.f32.mxu1 %v2998_v56  ;;  %5131 = vmatprep.subr.mxu0 %v5572_v18 }
 0xae7   : > { %5132 = vmatpush3.msra.mxu0 %v6485_v32 }
 0xae8   : > { %5133 = vmatprep.subr.mxu0 %v5572_v18 }
 0xae9   : > { %5051 = vmatmul.mubr.f32.gmra.mxu1 %v2999_v61  ;;  %5134 = vmatpush3.msra.mxu0 %v6489_v17 }
 0xaea   : > { %5053 = vmatprep.mubr.f32.mxu1 %v3000_v62  ;;  %5135 = vmatprep.subr.mxu0 %v5572_v18 }
 0xaeb   : > { %5136 = vmatpush3.msra.mxu0 %v6497_v41 }
 0xaec   : > { %5137 = vmatprep.subr.mxu0 %v5572_v18 }
 0xaed   : > { %5054 = vmatmul.mubr.f32.gmra.mxu1 %v3001_v3  ;;  %5138 = vmatpush3.msra.mxu0 %v6501_v45 }
 0xaee   : > { %5056 = vmatprep.mubr.f32.mxu1 %v3002_v4  ;;  %5139 = vmatprep.subr.mxu0 %v5572_v18 }
 0xaef   : > { %5140 = vmatpush3.msra.mxu0 %v6509_v40 }
 0xaf0   : > { %5141 = vmatprep.subr.mxu0 %v5572_v18 }
 0xaf1   : > { %5057 = vmatmul.mubr.f32.gmra.mxu1 %v3003_v10  ;;  %5142 = vmatpush3.msra.mxu0 %v6513_v48 }
 0xaf2   : > { %5059 = vmatprep.mubr.f32.mxu1 %v3004_v11  ;;  %5143 = vmatprep.subr.mxu0 %v5572_v18 }
 0xaf3   : > { %5144 = vmatpush3.msra.mxu0 %v6519_v51 }
 0xaf4   : > { %5145 = vmatprep.subr.mxu0 %v5572_v18 }
 0xaf5   : > { %5060 = vmatmul.mubr.f32.gmra.mxu1 %v3005_v15  ;;  %5146 = vmatpush3.msra.mxu0 %v6524_v20 }
 0xaf6   : > { %5113 = vmatprep.mubr.bf16.mxu1 %v6400_v8  ;;  %5147 = vmatprep.subr.mxu0 %v5572_v18 }
 0xaf7   : > { %5148 = vmatpush3.msra.mxu0 %v6528_v53 }
 0xb98   : > { %v6531_v37 = vpop.f32.mrf.mxu0 }
 0xb99   : > { %v5040_v54 = vpop.f32.mrf.mxu1 }
 0xb9a   : > { %v5096_v12 = vpop.f32.mrf.mxu0 }
 0xb9b   : > { %v3072_v13 = vpop.f32.mrf.mxu1 }
 0xb9c   : > { %v3151_v0 = vpack.c.bf16 %v5040_v54, %v3072_v13 }
 0xb9d   : > { %v5043_v58 = vpop.f32.mrf.mxu1 }
 0xb9f   : > { %v3082_v36 = vpop.f32.mrf.mxu1 }
 0xba0   : > { %v3152_v63 = vpack.c.bf16 %v5043_v58, %v3082_v36 }
 0xba1   : > { %v5046_v19 = vpop.f32.mrf.mxu1 }
 0xba3   : > { %v3092_v21 = vpop.f32.mrf.mxu1 }
 0xba4   : > { %v3153_v60 = vpack.c.bf16 %v5046_v19, %v3092_v21  ;;  %v3709_v21 = vld [vmem:[%s6611_s5 + $0x4] sm:$0x1] }
 0xba5   : > { %v5049_v8 = vpop.f32.mrf.mxu1 }
 0xba7   : > { %v3102_v25 = vpop.f32.mrf.mxu1 }
 0xba8   : > { %v3154_v59 = vpack.c.bf16 %v5049_v8, %v3102_v25  ;;  %v3454_v8 = vunpack.c.l.bf16 %v3709_v21  ;;  %v3710_v25 = vld [vmem:[%s6612_s6 + $0x4] sm:$0x1] }
 0xba9   : > { %v5052_v26 = vpop.f32.mrf.mxu1 }
 0xbab   : > { %v3112_v29 = vpop.f32.mrf.mxu1 }
 0xbac   : > { %v3155_v52 = vpack.c.bf16 %v5052_v26, %v3112_v29 }
 0xbad   : > { %v5055_v30 = vpop.f32.mrf.mxu1 }
 0xbaf   : > { %v3122_v33 = vpop.f32.mrf.mxu1 }
 0xbb0   : > { %v3156_v47 = vpack.c.bf16 %v5055_v30, %v3122_v33  ;;  %v3460_v30 = vunpack.c.l.bf16 %v3710_v25 }
 0xbb1   : > { %v5058_v34 = vpop.f32.mrf.mxu1 }
 0xbb3   : > { %v3132_v43 = vpop.f32.mrf.mxu1 }
 0xbb4   : > { %v3157_v46 = vpack.c.bf16 %v5058_v34, %v3132_v43 }
 0xbb5   : > { %v5061_v44 = vpop.f32.mrf.mxu1 }
 0xbb7   : > { %v3142_v35 = vpop.f32.mrf.mxu1 }
 0xbb8   : > { %v3158_v14 = vpack.c.bf16 %v5061_v44, %v3142_v35 }
 0xbba   : > { %5097 = vmatprep.subr.bf16.mxu1 %v3158_v14 }
 0xbbb   : > { %5098 = vmatpush3.bf16.msra.mxu1 %v3158_v14 }
 0xbbc   : > { %5099 = vmatprep.subr.bf16.mxu1 %v3157_v46 }
 0xbbf   : > { %5100 = vmatpush3.bf16.msra.mxu1 %v3157_v46 }
 0xbc0   : > { %5101 = vmatprep.subr.bf16.mxu1 %v3156_v47 }
 0xbc3   : > { %5102 = vmatpush3.bf16.msra.mxu1 %v3156_v47 }
 0xbc4   : > { %5103 = vmatprep.subr.bf16.mxu1 %v3155_v52 }
 0xbc7   : > { %5104 = vmatpush3.bf16.msra.mxu1 %v3155_v52 }
 0xbc8   : > { %5105 = vmatprep.subr.bf16.mxu1 %v3154_v59 }
 0xbcb   : > { %5106 = vmatpush3.bf16.msra.mxu1 %v3154_v59 }
 0xbcc   : > { %5107 = vmatprep.subr.bf16.mxu1 %v3153_v60 }
 0xbcf   : > { %5108 = vmatpush3.bf16.msra.mxu1 %v3153_v60 }
 0xbd0   : > { %5109 = vmatprep.subr.bf16.mxu1 %v3152_v63 }
 0xbd3   : > { %5110 = vmatpush3.bf16.msra.mxu1 %v3152_v63 }
 0xbd4   : > { %5111 = vmatprep.subr.bf16.mxu1 %v3151_v0 }
 0xbd7   : > { %5112 = vmatpush3.bf16.msra.mxu1 %v3151_v0 }
 0xbd8   : > { %5152 = vmatprep.subr.mxu1 %v5572_v18 }
 0xbda   : > { %5114 = vmatmul.mubr.bf16.vlgmr.msra.gmra.mxu1 %v6398_v57  ;;  %v3708_v57 = vld [vmem:[%s6610_s4 + $0x3] sm:$0x1] }
 0xbdb   : > { %5153 = vmatpush3.msra.mxu1 %v6439_v16  ;;  %5184 = vmatprep.mubr.msk.f32.mxu1 %vm5573_vm0, %v5572_v18  ;;  %v3161_v1 = vunpack.c.l.bf16 %v3708_v57 }
 0xbdc   : > { %5154 = vmatprep.subr.mxu1 %v5572_v18 }
 0xbdd   : > { %5155 = vmatpush3.msra.mxu1 %v6449_v39  ;;  %v3229_v2 = vadd.f32 %v6531_v37, %v3161_v1 }
 0xbde   : > { %5156 = vmatprep.subr.mxu1 %v5572_v18 }
 0xbdf   : > { %5157 = vmatpush3.msra.mxu1 %v6453_v42  ;;  %v3235_v6 = vrot.slane %v3229_v2, %v5773_v24 }
 0xbe0   : > { %5158 = vmatprep.subr.mxu1 %v5572_v18 }
 0xbe1   : > { %5159 = vmatpush3.msra.mxu1 %v6461_v23 }
 0xbe2   : > { %5160 = vmatprep.subr.mxu1 %v5572_v18 }
 0xbe3   : > { %5161 = vmatpush3.msra.mxu1 %v6465_v27 }
 0xbe4   : > { %5162 = vmatprep.subr.mxu1 %v5572_v18 }
 0xbe5   : > { %5163 = vmatpush3.msra.mxu1 %v6473_v28 }
 0xbe6   : > { %5164 = vmatprep.subr.mxu1 %v5572_v18 }
 0xbe7   : > { %5165 = vmatpush3.msra.mxu1 %v6477_v31 }
 0xbe8   : > { %5166 = vmatprep.subr.mxu1 %v5572_v18 }
 0xbe9   : > { %5167 = vmatpush3.msra.mxu1 %v6485_v32 }
 0xbea   : > { %5168 = vmatprep.subr.mxu1 %v5572_v18 }
 0xbeb   : > { %5169 = vmatpush3.msra.mxu1 %v6489_v17 }
 0xbec   : > { %5170 = vmatprep.subr.mxu1 %v5572_v18 }
 0xbed   : > { %5171 = vmatpush3.msra.mxu1 %v6497_v41 }
 0xbee   : > { %5172 = vmatprep.subr.mxu1 %v5572_v18 }
 0xbef   : > { %5173 = vmatpush3.msra.mxu1 %v6501_v45 }
 0xbf0   : > { %5174 = vmatprep.subr.mxu1 %v5572_v18 }
 0xbf1   : > { %5175 = vmatpush3.msra.mxu1 %v6509_v40 }
 0xbf2   : > { %5176 = vmatprep.subr.mxu1 %v5572_v18 }
 0xbf3   : > { %5177 = vmatpush3.msra.mxu1 %v6513_v48 }
 0xbf4   : > { %5178 = vmatprep.subr.mxu1 %v5572_v18 }
 0xbf5   : > { %5179 = vmatpush3.msra.mxu1 %v6519_v51 }
 0xbf6   : > { %5180 = vmatprep.subr.mxu1 %v5572_v18 }
 0xbf7   : > { %5181 = vmatpush3.msra.mxu1 %v6524_v20 }
 0xbf8   : > { %5182 = vmatprep.subr.mxu1 %v5572_v18 }
 0xbf9   : > { %5183 = vmatpush3.msra.mxu1 %v6528_v53 }
 0xc9a   : > { %v5115_v5 = vpop.f32.mrf.mxu1 }
 0xc9b   : > { %v3279_v38 = vadd.f32 %v5115_v5, %v3235_v6 }
 0xc9c   : > { %v3270_v9 = vpop.f32.mrf.mxu1 }
 0xc9d   : > { %v3271_v16 = vadd.f32 %v3270_v9, %v3235_v6  ;;  %v3296_v23 = vmul.f32 %v3279_v38, %v3279_v38 }
 0xc9e   : > { %v5116_v7 = vpop.f32.mrf.mxu1 }
 0xc9f   : > { %v3294_v42 = vmul.f32 %v3271_v16, %v3271_v16  ;;  %v3282_v18 = vadd.f32 %v5116_v7, %v3235_v6 }
 0xca0   : > { %v3273_v22 = vpop.f32.mrf.mxu1 }
 0xca1   : > { %v3274_v39 = vadd.f32 %v3273_v22, %v3235_v6  ;;  %v3297_v56 = vmul.f32 %v3282_v18, %v3282_v18 }
 0xca3   : > { %v3285_v49 = vadd.f32 %v3274_v39, %v3271_v16  ;;  %v3295_v50 = vmul.f32 %v3274_v39, %v3274_v39 }
 0xca5   : > { %v3286_v27 = vadd.f32 %v3285_v49, %v3279_v38  ;;  %v3298_v55 = vadd.f32 %v3295_v50, %v3294_v42 }
 0xca7   : > { %v3287_v28 = vadd.f32 %v3286_v27, %v3282_v18  ;;  %v3299_v31 = vadd.f32 %v3298_v55, %v3296_v23 }
 0xca9   : > { %v3288_v61 = vrot.slane %v3287_v28, 4  ;;  %v3300_v62 = vadd.f32 %v3299_v31, %v3297_v56 }
 0xcab   : > { %v3289_v32 = vadd.f32 %v3288_v61, %v3287_v28  ;;  %v3301_v17 = vrot.slane %v3300_v62, 4 }
 0xcad   : > { %v3290_v3 = vrot.slane %v3289_v32, 2  ;;  %v3302_v4 = vadd.f32 %v3301_v17, %v3300_v62 }
 0xcaf   : > { %v3291_v41 = vadd.f32 %v3290_v3, %v3289_v32  ;;  %v3303_v45 = vrot.slane %v3302_v4, 2 }
 0xcb1   : > { %v3292_v10 = vrot.slane %v3291_v41, 1  ;;  %v3304_v11 = vadd.f32 %v3303_v45, %v3302_v4 }
 0xcb3   : > { %v3293_v40 = vadd.f32 %v3292_v10, %v3291_v41  ;;  %v3305_v48 = vrot.slane %v3304_v11, 1 }
 0xcb5   : > { %5150 = vmatmul.mubr.f32.vlgmr.msra.gmra.mxu0 %v3293_v40  ;;  %v3306_v15 = vadd.f32 %v3305_v48, %v3304_v11 }
 0xcb7   : > { %5185 = vmatmul.mubr.f32.vlgmr.msra.gmra.mxu1 %v3306_v15 }
 0xd75   : > { %v3373_v51 = vpop.f32.mrf.mxu0 }
 0xd76   : > { %v3377_v20 = vmul.f32 0.0078125, %v3373_v51 }
 0xd77   : > { %v5151_v53 = vpop.f32.mrf.mxu0  ;;  %v3444_v37 = vpop.f32.mrf.mxu1 }
 0xd78   : > { %v3449_v54 = vmul.f32 %v3377_v20, %v3377_v20  ;;  %v3448_v12 = vmul.f32 0.0078125, %v3444_v37 }
 0xd79   : > { %v5186_v13 = vpop.f32.mrf.mxu1 }
 0xd7a   : > { %v3450_v58 = vsub.f32 %v3448_v12, %v3449_v54 }
 0xd7c   : > { %v3451_v36 = vmax.f32 %v3450_v58, 0.0 }
 0xd7e   : > { %v3455_v19 = vadd.f32 1e-05, %v3451_v36 }
 0xd80   : > { %5349 = vrsqrt.f32 %v3455_v19 }
 0xd8d   : > { %v5350_v26 = vpop.eup %5349 }
 0xd8e   : > { %v3457_v29 = vmul.f32 %v5350_v26, %v3454_v8 }
 0xd90   : > { %v3461_v33 = vmul.f32 %v3457_v29, %v3377_v20  ;;  %v3466_v34 = vrot.slane %v3457_v29, %v5773_v24 }
 0xd92   : > { %v3462_v43 = vsub.f32 %v3460_v30, %v3461_v33  ;;  %v3467_v44 = vmul.f32 %v3466_v34, %v3271_v16  ;;  %v3468_v35 = vmul.f32 %v3466_v34, %v3274_v39  ;;  %v3469_v14 = vmul.f32 %v3466_v34, %v3279_v38 }
 0xd93   : > { %v3470_v46 = vmul.f32 %v3466_v34, %v3282_v18 }
 0xd94   : > { %v3474_v47 = vrot.slane %v3462_v43, %v5773_v24 }
 0xd96   : > { %v3475_v52 = vadd.f32 %v3474_v47, %v3467_v44  ;;  %v3476_v59 = vadd.f32 %v3474_v47, %v3468_v35  ;;  %v3477_v60 = vadd.f32 %v3474_v47, %v3469_v14  ;;  %v3478_v63 = vadd.f32 %v3474_v47, %v3470_v46 }
 0xd98   : > { %v3863_v0 = vpack.c.bf16 %v3476_v59, %v3475_v52  ;;  %v3868_v57 = vpack.c.bf16 %v3478_v63, %v3477_v60 }
 0xd9a   : > { %3864 = vst [vmem:[#allocation12] sm:$0xff] %v3863_v0   ;;  %3898 = vst [vmem:[#allocation12 + $0x8] sm:$0xff] %v3868_v57  }
 0xd9b PF: > { %p5226_p5 = scmp.eq.s32.totalorder %s5641_s9, 1  ;;  %s5574_s10 = smov [#allocation12]  }
 0xd9c   : > { %s3505_s11 = sshll.u32 %s5574_s10, 4  ;;  %s3506_s11 = int_to_ptr.vmem [resolvable:$true] %s3505_s11 }
 0xd9d   : > { %s5489_s26 = scalar_lea.vmem %s3506_s11, 256  ;;  %p5496_p12 = scmp.lt.s32.totalorder %s3506_s11, %s3506_s11 }
 0xd9e   : > { %p5490_p9 = scmp.ne.s32.totalorder %s3506_s11, %s5489_s26  ;;  %p5497_p2 = scmp.lt.s32.totalorder %s5489_s26, %s5489_s26 }
 0xda0   : > { %p5491_p11 = pnand %p5490_p9, %p5226_p5  ;;  %p5498_p0 = por %p5497_p2, %p5496_p12 }
 0xda2   : > { %p5492_p13 = pneg %p5491_p11 }
 0xda4   : > { %p5499_p3 = pnand %p5498_p0, %p5492_p13 }
 0xda6   : > { %5502 = shalt.err (!%p5499_p3)
}
 0xda7   : > { %s5575_s27 = smov 64   ;;  %s5576_s12 = smov 4  }
 0xda8   : > { %5202 = dma.vmem_to_hbm [thread:$0]  (%p5226_p5), %s3506_s11, 256, %s6614_s8, [#allocation6], %s5575_s27, %s5575_s27, %s5576_s12  }
 0xda9   : > { %5542 = dma.done.wait (%p5226_p5), [#allocation6], 256  }
 0xdaa   : > { %5544 = vsyncadd (%p5226_p5), [#allocation6], 4294967040 }
 0xdab PF: > { %p21_p6 = scmp.ge.s32.totalorder %s5693_s17, 4   ;;  %s6629_s27 = smov %s5551_s28 }
 0xdac   : > { %s6630_s28 = smov %s5555_s29  ;;  %s6631_s29 = smov %s5703_s21 }
 0xdad   : > { %s6632_s30 = smov %s5693_s17  ;;  %23 = sbr.rel (!%p21_p6) target bundleno = 6 (0x6), region = 124 }
 0xdb2   :  { %3521 = vsyncpa [#allocation5], 1 }
 0xdb3   :  { %3523 = vsyncpa [#allocation5 + $0x1], 1 }
 0xdb4   :  { %3524 = vsyncpa [#allocation8], 1 }
 0xdb5   :  { %3525 = vsyncpa [#allocation11], 1 }
 0xdb6   :  { %3526 = vsyncpa [#allocation6], 1 }
 0xdb7   :  { %3528 = vsyncpa [#allocation6 + $0x1], 1 }

</bundles_post_ra>
